<compile_context>
chip_gen: v6e
topology: v6e:2x2x1
jax: 0.10.0
libtpu: 0.0.40
codegen_flags: <defaults>
</compile_context>

<pallas_src>
import functools

import numpy as np
import jax
import jax.numpy as jnp
from jax.experimental import pallas as pl
from jax.experimental.pallas import tpu as pltpu

BN_EPS = 1e-5
POOL_K = 5
POOL_S = 2
N_TAPS = 4       # 2x2 pooled map -> 4 taps, consumed whole by the 2x2 conv
C_MID = 128      # channels after the 1x1 conv
C_OUT = 768      # channels after the 2x2 conv


def _round_up(x, m):
    return -(-x // m) * m


# ----------------------------------------------------------------------------
# Kernel: per batch tile, the whole head is three lane-dense MXU matmuls.
# ----------------------------------------------------------------------------
def _aux_head_kernel(x_ref, wpc_ref, s1_ref, b1_ref, w2_ref, wc_ref, bc_ref,
                     o_ref):
    # 1) ReLU on the incoming activations (bf16, VMEM resident).
    x = jnp.maximum(x_ref[...], 0.0)                                 # (BT, H*W*C)

    # 2) AvgPool2d(5, stride=2, pad=0) + Conv2d(C, 128, 1) fused into ONE
    #    matmul against the precomputed (H*W*C, 4*128) weight.  The output is
    #    already laid out (batch, tap*128); the 1/25 divisor lives in s1.
    y1 = jnp.dot(x, wpc_ref[...], preferred_element_type=jnp.float32)  # (BT, 512)

    # 3) Folded eval-mode BatchNorm + ReLU (f32 epilogue), back to bf16.
    y1 = jnp.maximum(y1 * s1_ref[...] + b1_ref[...], 0.0).astype(jnp.bfloat16)

    # 4) Conv2d(128, 768, 2) on the 2x2 map == ONE K=512 matmul, then ReLU.
    y2 = jnp.maximum(jnp.dot(y1, w2_ref[...],
                             preferred_element_type=jnp.float32), 0.0)
    y2 = y2.astype(jnp.bfloat16)                                      # (BT, 768)

    # 5) Linear(768, num_classes) into a 128-lane-padded output, + f32 bias.
    o_ref[...] = jnp.dot(y2, wc_ref[...],
                         preferred_element_type=jnp.float32) + bc_ref[...]


# ----------------------------------------------------------------------------
# One-time constant preparation (hoisted out of the per-call path)
# ----------------------------------------------------------------------------
def init_aux_head_params(key, C, num_classes):
    ks = jax.random.split(key, 8)
    return dict(
        conv1_w=0.1 * jax.random.normal(ks[0], (C, C_MID), jnp.float32),
        bn1=dict(
            gamma=1.0 + 0.1 * jax.random.normal(ks[1], (C_MID,), jnp.float32),
            beta=0.1 * jax.random.normal(ks[2], (C_MID,), jnp.float32),
            mean=0.1 * jax.random.normal(ks[3], (C_MID,), jnp.float32),
            var=1.0 + 0.1 * jnp.abs(jax.random.normal(ks[4], (C_MID,), jnp.float32)),
        ),
        # conv2 weight stored (kh, kw, cin, cout) so it flattens directly into
        # the (4*128, 768) matmul operand used by the kernel.
        conv2_w=0.05 * jax.random.normal(ks[5], (2, 2, C_MID, C_OUT), jnp.float32),
        fc_w=0.05 * jax.random.normal(ks[6], (C_OUT, num_classes), jnp.float32),
        fc_b=0.1 * jax.random.normal(ks[7], (num_classes,), jnp.float32),
    )


def prepare_aux_head_constants(params, num_classes, H, W):
    """Fold ALL call-invariant prep once; returns device arrays to reuse."""
    Hp = (H - POOL_K) // POOL_S + 1
    Wp = (W - POOL_K) // POOL_S + 1
    assert Hp == 2 and Wp == 2, "Linear(768,.) needs a 2x2 pooled map (7x7/8x8 input)"
    C = params["conv1_w"].shape[0]

    # {0,1} pooling taps, batch-independent.  The 1/25 divisor is folded into
    # the f32 BN scale below, so no 0.04 is ever rounded to bf16.
    # (count_include_pad is moot: padding=0, divisor always 25.)
    pool01 = np.zeros((N_TAPS, H * W), np.float32)
    for ph in range(Hp):
        for pw in range(Wp):
            p = ph * Wp + pw
            for kh in range(POOL_K):
                for kw in range(POOL_K):
                    pool01[p, (ph * POOL_S + kh) * W + (pw * POOL_S + kw)] = 1.0

    # Fused pool + 1x1-conv weight (pool and conv1 commute, both linear):
    #   W_pc[hw*C + c, p*C_MID + k] = pool01[p, hw] * w1[c, k]
    # bf16 entries are exactly bf16(w1) or 0 -> same precision as plain w1.
    w_pc = jnp.einsum("ph,ck->hcpk", jnp.asarray(pool01),
                      params["conv1_w"].astype(jnp.float32))
    w_pc = w_pc.reshape(H * W * C, N_TAPS * C_MID).astype(jnp.bfloat16)

    # Eval-mode BatchNorm folded to per-channel scale/shift, tiled over taps;
    # the pool divisor rides along in the f32 scale.
    # TODO(synk): training-mode batch statistics / running-stat updates are
    # not implemented; eval-mode folded BN only.
    bn = params["bn1"]
    scale0 = bn["gamma"] / jnp.sqrt(bn["var"] + BN_EPS)
    shift0 = bn["beta"] - bn["mean"] * scale0
    s1 = jnp.tile(scale0 / float(POOL_K * POOL_K), N_TAPS).reshape(1, -1)
    b1 = jnp.tile(shift0, N_TAPS).reshape(1, -1)

    w2 = params["conv2_w"].reshape(N_TAPS * C_MID, C_OUT).astype(jnp.bfloat16)

    n_pad = _round_up(max(num_classes, 128), 128)     # lane-dense classifier out
    wc = jnp.zeros((C_OUT, n_pad), jnp.bfloat16).at[:, :num_classes].set(
        params["fc_w"].astype(jnp.bfloat16))
    bc = jnp.zeros((1, n_pad), jnp.float32).at[0, :num_classes].set(
        params["fc_b"].astype(jnp.float32))

    return dict(w_pc=w_pc, s1=s1.astype(jnp.float32), b1=b1.astype(jnp.float32),
                w2=w2, wc=wc, bc=bc)


# ----------------------------------------------------------------------------
# Per-call wrapper: minimal x relayout + one pallas_call
# ----------------------------------------------------------------------------
def aux_head_forward(x_nchw, consts, num_classes, block_b=128):
    B, C, H, W = x_nchw.shape
    hwc = H * W * C
    assert consts["w_pc"].shape[0] == hwc, "prepared constants don't match input"
    n_pad = consts["wc"].shape[1]

    bp8 = _round_up(B, 8)                 # sublane-aligned batch
    bt = min(bp8, block_b)                # batch tile per grid step
    num_bt = -(-bp8 // bt)
    bp = num_bt * bt

    # Only per-call prep: NCHW -> (Bp, H*W*C) bf16 in one fused
    # transpose+reshape+cast (+ batch pad).
    # TODO(synk): accept NHWC / bf16 activations directly from the producer to
    # skip this extra HBM pass over x at training batch sizes.
    x = jnp.transpose(x_nchw, (0, 2, 3, 1)).reshape(B, hwc).astype(jnp.bfloat16)
    if bp > B:
        x = jnp.pad(x, ((0, bp - B), (0, 0)))

    out = pl.pallas_call(
        _aux_head_kernel,
        out_shape=jax.ShapeDtypeStruct((bp, n_pad), jnp.float32),
        grid=(num_bt,),
        in_specs=[
            pl.BlockSpec((bt, hwc), lambda i: (i, 0)),               # x: batch-tiled
            pl.BlockSpec((hwc, N_TAPS * C_MID), lambda i: (0, 0)),   # weights: constant block
            pl.BlockSpec((1, N_TAPS * C_MID), lambda i: (0, 0)),
            pl.BlockSpec((1, N_TAPS * C_MID), lambda i: (0, 0)),
            pl.BlockSpec((N_TAPS * C_MID, C_OUT), lambda i: (0, 0)),
            pl.BlockSpec((C_OUT, n_pad), lambda i: (0, 0)),
            pl.BlockSpec((1, n_pad), lambda i: (0, 0)),
        ],
        out_specs=pl.BlockSpec((bt, n_pad), lambda i: (i, 0)),
        compiler_params=pltpu.CompilerParams(
            dimension_semantics=("parallel",)),   # batch tiles shard across TCs
    )(x, consts["w_pc"], consts["s1"], consts["b1"],
      consts["w2"], consts["wc"], consts["bc"])
    return out[:B, :num_classes]


# ----------------------------------------------------------------------------
# Pure-JAX f32 reference (sanity check)
# ----------------------------------------------------------------------------
def _reference_forward(x_nchw, params, num_classes):
    x = jnp.maximum(x_nchw.astype(jnp.float32), 0.0)            # ReLU
    B, C, H, W = x.shape
    Hp = (H - POOL_K) // POOL_S + 1
    Wp = (W - POOL_K) // POOL_S + 1
    rows = []
    for ph in range(Hp):
        cols = []
        for pw in range(Wp):
            win = x[:, :, ph * POOL_S:ph * POOL_S + POOL_K,
                    pw * POOL_S:pw * POOL_S + POOL_K]
            cols.append(jnp.mean(win, axis=(2, 3)))             # (B, C)
        rows.append(jnp.stack(cols, axis=-1))                   # (B, C, Wp)
    pooled = jnp.stack(rows, axis=-2)                           # (B, C, Hp, Wp)

    y1 = jnp.einsum("bchw,ck->bkhw", pooled, params["conv1_w"])
    bn = params["bn1"]
    scale = bn["gamma"] / jnp.sqrt(bn["var"] + BN_EPS)
    shift = bn["beta"] - bn["mean"] * scale
    y1 = jnp.maximum(y1 * scale[None, :, None, None] + shift[None, :, None, None], 0.0)

    y2 = jnp.einsum("bchw,hwck->bk", y1, params["conv2_w"])     # 2x2 conv -> 1x1
    y2 = jnp.maximum(y2, 0.0)
    return y2 @ params["fc_w"] + params["fc_b"]


# ----------------------------------------------------------------------------
# Main
# ----------------------------------------------------------------------------
if __name__ == "__main__":
    # 7x7 is the spatial size this aux head actually receives in DARTS
    # NetworkImageNet (a literal 14x14 would break Linear(768, .)).
    B, C, H, W = 2, 64, 7, 7
    num_classes = 10

    root = jax.random.PRNGKey(0)
    pkey, xkey = jax.random.split(root)
    params = init_aux_head_params(pkey, C, num_classes)
    x = jax.random.normal(xkey, (B, C, H, W), jnp.float32)

    # One-time constant prep (fused pool+conv1 weight, folded BN, padded FC).
    consts = prepare_aux_head_constants(params, num_classes, H, W)

    fwd = jax.jit(functools.partial(aux_head_forward, num_classes=num_classes))
    logits = jax.block_until_ready(fwd(x, consts))

    assert logits.shape == (B, num_classes)
    assert bool(jnp.all(jnp.isfinite(logits)))

    ref = _reference_forward(x, params, num_classes)
    np.testing.assert_allclose(np.asarray(logits), np.asarray(ref),
                               rtol=0.1, atol=0.1)
    print("KERNEL_OK")
</pallas_src>

<mosaic_0001>
module attributes {stable_mosaic.version = 11 : i64} {
  func.func @_aux_head_kernel(%arg0: i32, %arg1: memref<8x3136xbf16, #tpu.memory_space<vmem>>, %arg2: memref<3136x512xbf16, #tpu.memory_space<vmem>>, %arg3: memref<1x512xf32, #tpu.memory_space<vmem>>, %arg4: memref<1x512xf32, #tpu.memory_space<vmem>>, %arg5: memref<512x768xbf16, #tpu.memory_space<vmem>>, %arg6: memref<768x128xbf16, #tpu.memory_space<vmem>>, %arg7: memref<1x128xf32, #tpu.memory_space<vmem>>, %arg8: memref<8x128xf32, #tpu.memory_space<vmem>>) attributes {dimension_semantics = [#tpu.dimension_semantics<parallel>], iteration_bounds = array<i64: 1>, scalar_prefetch = 0 : i64, scratch_operands = 0 : i64, tpu.core_type = #tpu.core_type<tc>, window_params = [{transform_indices = @transform_0, window_bounds = array<i64: 8, 3136>}, {pipeline_mode = #tpu.pipeline_mode<synchronous>, transform_indices = @transform_1, window_bounds = array<i64: 3136, 512>}, {pipeline_mode = #tpu.pipeline_mode<synchronous>, transform_indices = @transform_2, window_bounds = array<i64: 1, 512>}, {pipeline_mode = #tpu.pipeline_mode<synchronous>, transform_indices = @transform_3, window_bounds = array<i64: 1, 512>}, {pipeline_mode = #tpu.pipeline_mode<synchronous>, transform_indices = @transform_4, window_bounds = array<i64: 512, 768>}, {pipeline_mode = #tpu.pipeline_mode<synchronous>, transform_indices = @transform_5, window_bounds = array<i64: 768, 128>}, {pipeline_mode = #tpu.pipeline_mode<synchronous>, transform_indices = @transform_6, window_bounds = array<i64: 1, 128>}, {transform_indices = @transform_7, window_bounds = array<i64: 8, 128>}]} {
    %c0 = arith.constant 0 : index
    %c0_0 = arith.constant 0 : index
    %0 = vector.load %arg1[%c0, %c0_0] : memref<8x3136xbf16, #tpu.memory_space<vmem>>, vector<8x3136xbf16>
    %cst = arith.constant 0.000000e+00 : bf16
    %1 = vector.broadcast %cst : bf16 to vector<8x3136xbf16>
    %2 = arith.maximumf %0, %1 : vector<8x3136xbf16>
    %c0_1 = arith.constant 0 : index
    %c0_2 = arith.constant 0 : index
    %3 = vector.load %arg2[%c0_1, %c0_2] : memref<3136x512xbf16, #tpu.memory_space<vmem>>, vector<3136x512xbf16>
    %cst_3 = arith.constant dense<0.000000e+00> : vector<8x512xf32>
    %4 = tpu.matmul %2, %3, %cst_3 {dimension_numbers = #tpu.dot_dimension_numbers<[1], [0], [0], [1], [0, 0, 1, 1], [], []>} : vector<8x3136xbf16>, vector<3136x512xbf16>, vector<8x512xf32> -> vector<8x512xf32>
    %c0_4 = arith.constant 0 : index
    %c0_5 = arith.constant 0 : index
    %5 = vector.load %arg3[%c0_4, %c0_5] : memref<1x512xf32, #tpu.memory_space<vmem>>, vector<1x512xf32>
    %6 = vector.broadcast %5 : vector<1x512xf32> to vector<8x512xf32>
    %7 = arith.mulf %4, %6 : vector<8x512xf32>
    %c0_6 = arith.constant 0 : index
    %c0_7 = arith.constant 0 : index
    %8 = vector.load %arg4[%c0_6, %c0_7] : memref<1x512xf32, #tpu.memory_space<vmem>>, vector<1x512xf32>
    %9 = vector.broadcast %8 : vector<1x512xf32> to vector<8x512xf32>
    %10 = arith.addf %7, %9 : vector<8x512xf32>
    %cst_8 = arith.constant 0.000000e+00 : f32
    %11 = vector.broadcast %cst_8 : f32 to vector<8x512xf32>
    %12 = arith.maximumf %10, %11 : vector<8x512xf32>
    %13 = arith.truncf %12 : vector<8x512xf32> to vector<8x512xbf16>
    %c0_9 = arith.constant 0 : index
    %c0_10 = arith.constant 0 : index
    %14 = vector.load %arg5[%c0_9, %c0_10] : memref<512x768xbf16, #tpu.memory_space<vmem>>, vector<512x768xbf16>
    %cst_11 = arith.constant dense<0.000000e+00> : vector<8x768xf32>
    %15 = tpu.matmul %13, %14, %cst_11 {dimension_numbers = #tpu.dot_dimension_numbers<[1], [0], [0], [1], [0, 0, 1, 1], [], []>} : vector<8x512xbf16>, vector<512x768xbf16>, vector<8x768xf32> -> vector<8x768xf32>
    %cst_12 = arith.constant 0.000000e+00 : f32
    %16 = vector.broadcast %cst_12 : f32 to vector<8x768xf32>
    %17 = arith.maximumf %15, %16 : vector<8x768xf32>
    %18 = arith.truncf %17 : vector<8x768xf32> to vector<8x768xbf16>
    %c0_13 = arith.constant 0 : index
    %c0_14 = arith.constant 0 : index
    %19 = vector.load %arg6[%c0_13, %c0_14] : memref<768x128xbf16, #tpu.memory_space<vmem>>, vector<768x128xbf16>
    %cst_15 = arith.constant dense<0.000000e+00> : vector<8x128xf32>
    %20 = tpu.matmul %18, %19, %cst_15 {dimension_numbers = #tpu.dot_dimension_numbers<[1], [0], [0], [1], [0, 0, 1, 1], [], []>} : vector<8x768xbf16>, vector<768x128xbf16>, vector<8x128xf32> -> vector<8x128xf32>
    %c0_16 = arith.constant 0 : index
    %c0_17 = arith.constant 0 : index
    %21 = vector.load %arg7[%c0_16, %c0_17] : memref<1x128xf32, #tpu.memory_space<vmem>>, vector<1x128xf32>
    %22 = vector.broadcast %21 : vector<1x128xf32> to vector<8x128xf32>
    %23 = arith.addf %20, %22 : vector<8x128xf32>
    %c0_18 = arith.constant 0 : index
    %c0_19 = arith.constant 0 : index
    %24 = vector.load %arg8[%c0_18, %c0_19] : memref<8x128xf32, #tpu.memory_space<vmem>>, vector<8x128xf32>
    tpu.vector_store %arg8[%c0_18, %c0_19], %23 {strides = array<i32>} : memref<8x128xf32, #tpu.memory_space<vmem>>, vector<8x128xf32>,
    return
  }
  func.func @transform_0(%arg0: i32) -> (i32, i32) {
    %c0_i32 = arith.constant 0 : i32
    %c0_i32_0 = arith.constant 0 : i32
    return %arg0, %c0_i32 : i32, i32
  }
  func.func @transform_1(%arg0: i32) -> (i32, i32) {
    %c0_i32 = arith.constant 0 : i32
    %c0_i32_0 = arith.constant 0 : i32
    %c0_i32_1 = arith.constant 0 : i32
    return %c0_i32, %c0_i32_0 : i32, i32
  }
  func.func @transform_2(%arg0: i32) -> (i32, i32) {
    %c0_i32 = arith.constant 0 : i32
    %c0_i32_0 = arith.constant 0 : i32
    %c0_i32_1 = arith.constant 0 : i32
    return %c0_i32, %c0_i32_0 : i32, i32
  }
  func.func @transform_3(%arg0: i32) -> (i32, i32) {
    %c0_i32 = arith.constant 0 : i32
    %c0_i32_0 = arith.constant 0 : i32
    %c0_i32_1 = arith.constant 0 : i32
    return %c0_i32, %c0_i32_0 : i32, i32
  }
  func.func @transform_4(%arg0: i32) -> (i32, i32) {
    %c0_i32 = arith.constant 0 : i32
    %c0_i32_0 = arith.constant 0 : i32
    %c0_i32_1 = arith.constant 0 : i32
    return %c0_i32, %c0_i32_0 : i32, i32
  }
  func.func @transform_5(%arg0: i32) -> (i32, i32) {
    %c0_i32 = arith.constant 0 : i32
    %c0_i32_0 = arith.constant 0 : i32
    %c0_i32_1 = arith.constant 0 : i32
    return %c0_i32, %c0_i32_0 : i32, i32
  }
  func.func @transform_6(%arg0: i32) -> (i32, i32) {
    %c0_i32 = arith.constant 0 : i32
    %c0_i32_0 = arith.constant 0 : i32
    %c0_i32_1 = arith.constant 0 : i32
    return %c0_i32, %c0_i32_0 : i32, i32
  }
  func.func @transform_7(%arg0: i32) -> (i32, i32) {
    %c0_i32 = arith.constant 0 : i32
    %c0_i32_0 = arith.constant 0 : i32
    return %arg0, %c0_i32 : i32, i32
  }
}

</mosaic_0001>

<bundles_post_ra>
// kernel: aux_head_forward.1
= control target key start
LH: loop header
LB: loop body
LE: loop exit
PB: predicated region body
PF: predicated region fallthrough
CT: control target
= control target key end

     0   :  { %12 = vsyncpa [#allocation3], 0  ;;  %s11157_s0 = inlined_call_operand.vmem [shape: bf16[8,3136], index: 0, kind: input, shape index: {}]   ;;  %s11158_s1 = inlined_call_operand.hbm [shape: bf16[3136,512], index: 1, kind: input, shape index: {}]   ;;  %s11159_s2 = inlined_call_operand.hbm [shape: f32[1,512], index: 2, kind: input, shape index: {}]   ;;  %s11160_s3 = inlined_call_operand.hbm [shape: f32[1,512], index: 3, kind: input, shape index: {}]   ;;  %s11161_s4 = inlined_call_operand.hbm [shape: bf16[512,768], index: 4, kind: input, shape index: {}]   ;;  %s11162_s5 = inlined_call_operand.hbm [shape: bf16[768,128], index: 5, kind: input, shape index: {}]   ;;  %s11163_s6 = inlined_call_operand.hbm [shape: f32[1,128], index: 6, kind: input, shape index: {}]   ;;  %s11164_s7 = inlined_call_operand.vmem [shape: f32[8,128], index: 7, kind: output, shape index: {}]  }
   0x1   :  { %13 = vsyncpa [#allocation5], 0 }
   0x2   :  { %14 = vsyncpa [#allocation8], 0 }
   0x3   :  { %15 = vsyncpa [#allocation11], 0  ;;  %s10751_s24 = smov [#allocation4]   ;;  %s10752_s26 = smov [#allocation7]  }
   0x4   :  { %s36_s25 = sshll.u32 %s10751_s24, 4  ;;  %s55_s27 = sshll.u32 %s10752_s26, 4  ;;  %s37_s25 = int_to_ptr.vmem [resolvable:$true] %s36_s25  ;;  %s56_s27 = int_to_ptr.vmem [resolvable:$true] %s55_s27 }
   0x5   :  { %s10631_s28 = scalar_lea.vmem %s37_s25, 64  ;;  %p10636_p1 = scmp.lt.s32.totalorder %s37_s25, %s37_s25 }
   0x6   :  { %p10632_p0 = scmp.ne.s32.totalorder %s37_s25, %s10631_s28  ;;  %p10637_p2 = scmp.lt.s32.totalorder %s10631_s28, %s10631_s28 }
   0x8   :  { %p10638_p3 = por %p10637_p2, %p10636_p1 }
   0xa   :  { %p10639_p4 = pnand %p10638_p3, %p10632_p0 }
   0xc   :  { %10642 = shalt.err (!%p10639_p4)
}
   0xd   :  { %39 = dma.hbm_to_vmem [thread:$0]  %s11159_s2, 64, %s37_s25, [#allocation5]  }
   0xe   :  { %s10651_s8 = scalar_lea.vmem %s56_s27, 24576  ;;  %p10656_p6 = scmp.lt.s32.totalorder %s56_s27, %s56_s27 }
   0xf   :  { %p10652_p5 = scmp.ne.s32.totalorder %s56_s27, %s10651_s8  ;;  %p10657_p7 = scmp.lt.s32.totalorder %s10651_s8, %s10651_s8 }
  0x11   :  { %p10658_p8 = por %p10657_p7, %p10656_p6 }
  0x13   :  { %p10659_p9 = pnand %p10658_p8, %p10652_p5 }
  0x15   :  { %10662 = shalt.err (!%p10659_p9)
}
  0x16   :  { %s10753_s9 = smov 384   ;;  %s10754_s10 = smov 24  }
  0x17   :  { %61 = dma.hbm_to_vmem [thread:$0]  %s11161_s4, 24576, %s56_s27, [#allocation8], %s10753_s9, %s10753_s9, %s10754_s10  }
  0x18   :  { %s10755_s13 = smov [#allocation2]  }
  0x19   :  { %s23_s14 = sshll.u32 %s10755_s13, 4  ;;  %s24_s14 = int_to_ptr.vmem [resolvable:$true] %s23_s14 }
  0x1a   :  { %s10671_s15 = scalar_lea.vmem %s24_s14, 100352  ;;  %p10676_p11 = scmp.lt.s32.totalorder %s24_s14, %s24_s14 }
  0x1b   :  { %p10672_p10 = scmp.ne.s32.totalorder %s24_s14, %s10671_s15  ;;  %p10677_p12 = scmp.lt.s32.totalorder %s10671_s15, %s10671_s15 }
  0x1d   :  { %p10678_p13 = por %p10677_p12, %p10676_p11 }
  0x1f   :  { %p10679_p0 = pnand %p10678_p13, %p10672_p10 }
  0x21   :  { %10682 = shalt.err (!%p10679_p0)
}
  0x22   :  { %s10756_s2 = smov 256   ;;  %s10757_s16 = smov 16  }
  0x23   :  { %29 = dma.hbm_to_vmem [thread:$0]  %s11158_s1, 100352, %s24_s14, [#allocation3], %s10756_s2, %s10756_s2, %s10757_s16  }
  0x24   :  { %s10758_s19 = smov [#allocation6]   ;;  %s10759_s4 = smov [#allocation9]  }
  0x25   :  { %s46_s20 = sshll.u32 %s10758_s19, 4  ;;  %s67_s21 = sshll.u32 %s10759_s4, 4  ;;  %s47_s20 = int_to_ptr.vmem [resolvable:$true] %s46_s20  ;;  %s68_s21 = int_to_ptr.vmem [resolvable:$true] %s67_s21 }
  0x26   :  { %s10691_s22 = scalar_lea.vmem %s47_s20, 64  ;;  %p10696_p2 = scmp.lt.s32.totalorder %s47_s20, %s47_s20 }
  0x27   :  { %p10692_p1 = scmp.ne.s32.totalorder %s47_s20, %s10691_s22  ;;  %p10697_p3 = scmp.lt.s32.totalorder %s10691_s22, %s10691_s22 }
  0x29   :  { %p10698_p4 = por %p10697_p3, %p10696_p2 }
  0x2b   :  { %p10699_p5 = pnand %p10698_p4, %p10692_p1 }
  0x2d   :  { %10702 = shalt.err (!%p10699_p5)
}
  0x2e   :  { %49 = dma.hbm_to_vmem [thread:$0]  %s11160_s3, 64, %s47_s20, [#allocation5]  }
  0x2f   :  { %s10711_s25 = scalar_lea.vmem %s68_s21, 6144  ;;  %p10716_p7 = scmp.lt.s32.totalorder %s68_s21, %s68_s21 }
  0x30   :  { %p10712_p6 = scmp.ne.s32.totalorder %s68_s21, %s10711_s25  ;;  %p10717_p8 = scmp.lt.s32.totalorder %s10711_s25, %s10711_s25 }
  0x32   :  { %p10718_p9 = por %p10717_p8, %p10716_p7 }
  0x34   :  { %p10719_p10 = pnand %p10718_p9, %p10712_p6 }
  0x36   :  { %10722 = shalt.err (!%p10719_p10)
}
  0x37   :  { %s10760_s1 = smov 64   ;;  %s10761_s26 = smov 4  }
  0x38   :  { %73 = dma.hbm_to_vmem [thread:$0]  %s11162_s5, 6144, %s68_s21, [#allocation8], %s10760_s1, %s10760_s1, %s10761_s26  }
  0x39   :  { %s10762_s29 = smov [#allocation10]  }
  0x3a   :  { %s80_s30 = sshll.u32 %s10762_s29, 4  ;;  %s81_s30 = int_to_ptr.vmem [resolvable:$true] %s80_s30 }
  0x3b   :  { %s10731_s8 = scalar_lea.vmem %s81_s30, 16  ;;  %s10735_s3 = scalar_lea.vmem %s81_s30, 32 }
  0x3c   :  { %p10732_p11 = scmp.ne.s32.totalorder %s81_s30, %s10731_s8  ;;  %p10736_p12 = scmp.lt.s32.totalorder %s81_s30, %s81_s30 }
  0x3d   :  { %p10737_p13 = scmp.lt.s32.totalorder %s10735_s3, %s10731_s8 }
  0x3f   :  { %p10738_p0 = por %p10737_p13, %p10736_p12 }
  0x41   :  { %p10739_p1 = pnand %p10738_p0, %p10732_p11 }
  0x43   :  { %10742 = shalt.err (!%p10739_p1)
}
  0x44   :  { %83 = dma.hbm_to_vmem [thread:$0]  %s11163_s6, 16, %s81_s30, [#allocation11]  }
  0x45   :  { %10743 = dma.done.wait [#allocation3], 100352  }
  0x46   :  { %10744 = vsyncadd [#allocation3], 4294866944 }
  0x47   :  { %10745 = dma.done.wait [#allocation5], 128  }
  0x48   :  { %10746 = vsyncadd [#allocation5], 4294967168 }
  0x49   :  { %10747 = dma.done.wait [#allocation8], 30720  }
  0x4a   :  { %10748 = vsyncadd [#allocation8], 4294936576 }
  0x4b   :  { %10749 = dma.done.wait [#allocation11], 16  }
  0x4c   :  { %10750 = vsyncadd [#allocation11], 4294967280  ;;  %v9111_v0 = vld [vmem:[#allocation2 + $0xe4] ss:$16 sps:$4 sm:$0xff]   ;;  %v9115_v2 = vld [vmem:[#allocation2 + $0xe0] ss:$16 sps:$4 sm:$0xff]  }
  0x4d   :  { %v9113_v1 = vld [vmem:[#allocation2 + $0x2e4] ss:$16 sps:$4 sm:$0xff]   ;;  %4924 = vmatprep.subr.bf16.mxu0 %v9111_v0  ;;  %v9116_v3 = vld [vmem:[#allocation2 + $0x2e0] ss:$16 sps:$4 sm:$0xff]   ;;  %v10763_v47 = vmov 0   ;;  %v104_v49 = vld [vmem:[%s11157_s0 + $0x8] sm:$0xff] }
  0x4e   :  { %4965 = vmatprep.subr.bf16.mxu1 %v9113_v1  ;;  %v9117_v4 = vld [vmem:[#allocation2 + $0xc4] ss:$16 sps:$4 sm:$0xff]   ;;  %4925 = vmatpush1.bf16.msra.mxu0 %v9115_v2  ;;  %v9121_v6 = vld [vmem:[#allocation2 + $0xc0] ss:$16 sps:$4 sm:$0xff]   ;;  %v117_v52 = vmax.bf16 %v10763_v47, %v104_v49  ;;  %vm4920_vm0 = vcmask 523264  }
  0x4f   :  { %4966 = vmatpush1.bf16.msra.mxu1 %v9116_v3  ;;  %v9119_v5 = vld [vmem:[#allocation2 + $0x2c4] ss:$16 sps:$4 sm:$0xff]   ;;  %4926 = vmatprep.subr.bf16.mxu0 %v9117_v4  ;;  %v9122_v7 = vld [vmem:[#allocation2 + $0x2c0] ss:$16 sps:$4 sm:$0xff]  }
  0x50   :  { %4967 = vmatprep.subr.bf16.mxu1 %v9119_v5  ;;  %v9123_v8 = vld [vmem:[#allocation2 + $0xa4] ss:$16 sps:$4 sm:$0xff]   ;;  %v9127_v10 = vld [vmem:[#allocation2 + $0xa0] ss:$16 sps:$4 sm:$0xff]   ;;  %v10832_v56 = vcombine.high %v117_v52, %v117_v52 }
  0x51   :  { %v9125_v9 = vld [vmem:[#allocation2 + $0x2a4] ss:$16 sps:$4 sm:$0xff]   ;;  %v9128_v11 = vld [vmem:[#allocation2 + $0x2a0] ss:$16 sps:$4 sm:$0xff]  }
  0x52   :  { %4927 = vmatpush1.bf16.msra.mxu0 %v9121_v6  ;;  %v9129_v12 = vld [vmem:[#allocation2 + $0x84] ss:$16 sps:$4 sm:$0xff]   ;;  %v9133_v14 = vld [vmem:[#allocation2 + $0x80] ss:$16 sps:$4 sm:$0xff]   ;;  %4997 = vmatprep.mubr.bf16.mxu1 %v10832_v56 }
  0x53   :  { %4968 = vmatpush1.bf16.msra.mxu1 %v9122_v7  ;;  %4928 = vmatprep.subr.bf16.mxu0 %v9123_v8  ;;  %v9131_v13 = vld [vmem:[#allocation2 + $0x284] ss:$16 sps:$4 sm:$0xff]   ;;  %v9134_v15 = vld [vmem:[#allocation2 + $0x280] ss:$16 sps:$4 sm:$0xff]  }
  0x54   :  { %4969 = vmatprep.subr.bf16.mxu1 %v9125_v9  ;;  %v9135_v16 = vld [vmem:[#allocation2 + $0x64] ss:$16 sps:$4 sm:$0xff]   ;;  %v9139_v18 = vld [vmem:[#allocation2 + $0x60] ss:$16 sps:$4 sm:$0xff]  }
  0x55   :  { %v9137_v17 = vld [vmem:[#allocation2 + $0x264] ss:$16 sps:$4 sm:$0xff]   ;;  %v9140_v19 = vld [vmem:[#allocation2 + $0x260] ss:$16 sps:$4 sm:$0xff]  }
  0x56   :  { %4929 = vmatpush1.bf16.msra.mxu0 %v9127_v10  ;;  %v9141_v20 = vld [vmem:[#allocation2 + $0x44] ss:$16 sps:$4 sm:$0xff]   ;;  %v9145_v22 = vld [vmem:[#allocation2 + $0x40] ss:$16 sps:$4 sm:$0xff]   ;;  %v10838_v10 = vcombine.low %v117_v52, %v117_v52 }
  0x57   :  { %4970 = vmatpush1.bf16.msra.mxu1 %v9128_v11  ;;  %4930 = vmatprep.subr.bf16.mxu0 %v9129_v12  ;;  %v9143_v21 = vld [vmem:[#allocation2 + $0x244] ss:$16 sps:$4 sm:$0xff]   ;;  %v9146_v23 = vld [vmem:[#allocation2 + $0x240] ss:$16 sps:$4 sm:$0xff]  }
  0x58   :  { %4971 = vmatprep.subr.bf16.mxu1 %v9131_v13  ;;  %v9147_v24 = vld [vmem:[#allocation2 + $0x24] ss:$16 sps:$4 sm:$0xff]   ;;  %v9151_v26 = vld [vmem:[#allocation2 + $0x20] ss:$16 sps:$4 sm:$0xff]  }
  0x59   :  { %v9149_v25 = vld [vmem:[#allocation2 + $0x224] ss:$16 sps:$4 sm:$0xff]   ;;  %v9152_v27 = vld [vmem:[#allocation2 + $0x220] ss:$16 sps:$4 sm:$0xff]  }
  0x5a   :  { %4931 = vmatpush1.bf16.msra.mxu0 %v9133_v14  ;;  %v9153_v28 = vld [vmem:[#allocation2 + $0x4] ss:$16 sps:$4 sm:$0xff]   ;;  %v9157_v30 = vld [vmem:[#allocation2] ss:$16 sps:$4 sm:$0xff]  }
  0x5b   :  { %4972 = vmatpush1.bf16.msra.mxu1 %v9134_v15  ;;  %4932 = vmatprep.subr.bf16.mxu0 %v9135_v16  ;;  %v9155_v29 = vld [vmem:[#allocation2 + $0x204] ss:$16 sps:$4 sm:$0xff]   ;;  %v9158_v31 = vld [vmem:[#allocation2 + $0x200] ss:$16 sps:$4 sm:$0xff]  }
  0x5c   :  { %4973 = vmatprep.subr.bf16.mxu1 %v9137_v17  ;;  %v9159_v32 = vld [vmem:[#allocation2 + $0x1e4] ss:$16 sps:$4 sm:$0xff]   ;;  %v9163_v34 = vld [vmem:[#allocation2 + $0x1e0] ss:$16 sps:$4 sm:$0xff]  }
  0x5d   :  { %v9161_v33 = vld [vmem:[#allocation2 + $0x3e4] ss:$16 sps:$4 sm:$0xff]   ;;  %v9164_v35 = vld [vmem:[#allocation2 + $0x3e0] ss:$16 sps:$4 sm:$0xff]  }
  0x5e   :  { %4933 = vmatpush1.bf16.msra.mxu0 %v9139_v18  ;;  %v9165_v36 = vld [vmem:[#allocation2 + $0x1c4] ss:$16 sps:$4 sm:$0xff]   ;;  %v9169_v38 = vld [vmem:[#allocation2 + $0x1c0] ss:$16 sps:$4 sm:$0xff]  }
  0x5f   :  { %4974 = vmatpush1.bf16.msra.mxu1 %v9140_v19  ;;  %4934 = vmatprep.subr.bf16.mxu0 %v9141_v20  ;;  %v9167_v37 = vld [vmem:[#allocation2 + $0x3c4] ss:$16 sps:$4 sm:$0xff]   ;;  %v9170_v39 = vld [vmem:[#allocation2 + $0x3c0] ss:$16 sps:$4 sm:$0xff]  }
  0x60   :  { %4975 = vmatprep.subr.bf16.mxu1 %v9143_v21  ;;  %v9171_v40 = vld [vmem:[#allocation2 + $0x1a4] ss:$16 sps:$4 sm:$0xff]   ;;  %v9175_v42 = vld [vmem:[#allocation2 + $0x1a0] ss:$16 sps:$4 sm:$0xff]  }
  0x61   :  { %v9173_v41 = vld [vmem:[#allocation2 + $0x3a4] ss:$16 sps:$4 sm:$0xff]   ;;  %v9176_v43 = vld [vmem:[#allocation2 + $0x3a0] ss:$16 sps:$4 sm:$0xff]  }
  0x62   :  { %4935 = vmatpush1.bf16.msra.mxu0 %v9145_v22  ;;  %v9177_v44 = vld [vmem:[#allocation2 + $0x184] ss:$16 sps:$4 sm:$0xff]   ;;  %v9181_v50 = vld [vmem:[#allocation2 + $0x180] ss:$16 sps:$4 sm:$0xff]  }
  0x63   :  { %4976 = vmatpush1.bf16.msra.mxu1 %v9146_v23  ;;  %4936 = vmatprep.subr.bf16.mxu0 %v9147_v24  ;;  %v9179_v45 = vld [vmem:[#allocation2 + $0x384] ss:$16 sps:$4 sm:$0xff]   ;;  %v9182_v51 = vld [vmem:[#allocation2 + $0x380] ss:$16 sps:$4 sm:$0xff]  }
  0x64   :  { %4977 = vmatprep.subr.bf16.mxu1 %v9149_v25  ;;  %v103_v46 = vld [vmem:[%s11157_s0] sm:$0xff] }
  0x65   :  { %v116_v48 = vmax.bf16 %v10763_v47, %v103_v46  ;;  %v9183_v53 = vld [vmem:[#allocation2 + $0x164] ss:$16 sps:$4 sm:$0xff]   ;;  %v9187_v57 = vld [vmem:[#allocation2 + $0x160] ss:$16 sps:$4 sm:$0xff]  }
  0x66   :  { %4937 = vmatpush1.bf16.msra.mxu0 %v9151_v26  ;;  %v9185_v54 = vld [vmem:[#allocation2 + $0x364] ss:$16 sps:$4 sm:$0xff]   ;;  %v9188_v58 = vld [vmem:[#allocation2 + $0x360] ss:$16 sps:$4 sm:$0xff]  }
  0x67   :  { %4978 = vmatpush1.bf16.msra.mxu1 %v9152_v27  ;;  %4938 = vmatprep.subr.bf16.mxu0 %v9153_v28  ;;  %v10830_v55 = vcombine.high %v116_v48, %v116_v48  ;;  %v9189_v59 = vld [vmem:[#allocation2 + $0x144] ss:$16 sps:$4 sm:$0xff]   ;;  %v9193_v61 = vld [vmem:[#allocation2 + $0x140] ss:$16 sps:$4 sm:$0xff]   ;;  %v10836_v9 = vcombine.low %v116_v48, %v116_v48 }
  0x68   :  { %4979 = vmatprep.subr.bf16.mxu1 %v9155_v29  ;;  %v9191_v60 = vld [vmem:[#allocation2 + $0x344] ss:$16 sps:$4 sm:$0xff]   ;;  %v9194_v62 = vld [vmem:[#allocation2 + $0x340] ss:$16 sps:$4 sm:$0xff]  }
  0x69   :  { %4956 = vmatprep.mubr.bf16.mxu0 %v10830_v55  ;;  %v9195_v63 = vld [vmem:[#allocation2 + $0x124] ss:$16 sps:$4 sm:$0xff]   ;;  %v9199_v1 = vld [vmem:[#allocation2 + $0x120] ss:$16 sps:$4 sm:$0xff]  }
  0x6a   :  { %4939 = vmatpush1.bf16.msra.mxu0 %v9157_v30  ;;  %v9197_v0 = vld [vmem:[#allocation2 + $0x324] ss:$16 sps:$4 sm:$0xff]   ;;  %v9200_v2 = vld [vmem:[#allocation2 + $0x320] ss:$16 sps:$4 sm:$0xff]  }
  0x6b   :  { %4980 = vmatpush1.bf16.msra.mxu1 %v9158_v31  ;;  %4940 = vmatprep.subr.bf16.mxu0 %v9159_v32  ;;  %v9201_v3 = vld [vmem:[#allocation2 + $0x104] ss:$16 sps:$4 sm:$0xff]   ;;  %v9205_v5 = vld [vmem:[#allocation2 + $0x100] ss:$16 sps:$4 sm:$0xff]  }
  0x6c   :  { %4981 = vmatprep.subr.bf16.mxu1 %v9161_v33  ;;  %v9203_v4 = vld [vmem:[#allocation2 + $0x304] ss:$16 sps:$4 sm:$0xff]   ;;  %v9206_v6 = vld [vmem:[#allocation2 + $0x300] ss:$16 sps:$4 sm:$0xff]  }
  0x6d   :  { %v9209_v7 = vld [vmem:[#allocation2 + $0x4e4] ss:$16 sps:$4 sm:$0xff]   ;;  %v9207_v11 = vld [vmem:[#allocation2 + $0x4e0] ss:$16 sps:$4 sm:$0xff]  }
  0x6e   :  { %4941 = vmatpush2.bf16.msra.mxu0 %v9163_v34  ;;  %v9212_v8 = vld [vmem:[#allocation2 + $0x6e4] ss:$16 sps:$4 sm:$0xff]   ;;  %v9210_v12 = vld [vmem:[#allocation2 + $0x6e0] ss:$16 sps:$4 sm:$0xff]  }
  0x6f   :  { %4982 = vmatpush2.bf16.msra.mxu1 %v9164_v35  ;;  %4942 = vmatprep.subr.bf16.mxu0 %v9165_v36  ;;  %v9215_v13 = vld [vmem:[#allocation2 + $0x4c4] ss:$16 sps:$4 sm:$0xff]   ;;  %v9213_v15 = vld [vmem:[#allocation2 + $0x4c0] ss:$16 sps:$4 sm:$0xff]   ;;  %v106_v36 = vld [vmem:[%s11157_s0 + $0x18] sm:$0xff] }
  0x70   :  { %4983 = vmatprep.subr.bf16.mxu1 %v9167_v37  ;;  %v9218_v14 = vld [vmem:[#allocation2 + $0x6c4] ss:$16 sps:$4 sm:$0xff]   ;;  %v9216_v16 = vld [vmem:[#allocation2 + $0x6c0] ss:$16 sps:$4 sm:$0xff]  }
  0x71   :  { %v9221_v17 = vld [vmem:[#allocation2 + $0x4a4] ss:$16 sps:$4 sm:$0xff]   ;;  %v9219_v19 = vld [vmem:[#allocation2 + $0x4a0] ss:$16 sps:$4 sm:$0xff]  }
  0x72   :  { %4943 = vmatpush2.bf16.msra.mxu0 %v9169_v38  ;;  %v9224_v18 = vld [vmem:[#allocation2 + $0x6a4] ss:$16 sps:$4 sm:$0xff]   ;;  %v9222_v20 = vld [vmem:[#allocation2 + $0x6a0] ss:$16 sps:$4 sm:$0xff]  }
  0x73   :  { %4984 = vmatpush2.bf16.msra.mxu1 %v9170_v39  ;;  %4944 = vmatprep.subr.bf16.mxu0 %v9171_v40  ;;  %v9227_v21 = vld [vmem:[#allocation2 + $0x484] ss:$16 sps:$4 sm:$0xff]   ;;  %v9225_v23 = vld [vmem:[#allocation2 + $0x480] ss:$16 sps:$4 sm:$0xff]   ;;  %v10852_v40 = vmax.bf16 %v10763_v47, %v106_v36 }
  0x74   :  { %4985 = vmatprep.subr.bf16.mxu1 %v9173_v41  ;;  %v9230_v22 = vld [vmem:[#allocation2 + $0x684] ss:$16 sps:$4 sm:$0xff]   ;;  %v9228_v24 = vld [vmem:[#allocation2 + $0x680] ss:$16 sps:$4 sm:$0xff]  }
  0x75   :  { %v9233_v25 = vld [vmem:[#allocation2 + $0x464] ss:$16 sps:$4 sm:$0xff]   ;;  %v9231_v27 = vld [vmem:[#allocation2 + $0x460] ss:$16 sps:$4 sm:$0xff]  }
  0x76   :  { %4945 = vmatpush2.bf16.msra.mxu0 %v9175_v42  ;;  %v9236_v26 = vld [vmem:[#allocation2 + $0x664] ss:$16 sps:$4 sm:$0xff]   ;;  %v9234_v28 = vld [vmem:[#allocation2 + $0x660] ss:$16 sps:$4 sm:$0xff]  }
  0x77   :  { %4986 = vmatpush2.bf16.msra.mxu1 %v9176_v43  ;;  %4946 = vmatprep.subr.bf16.mxu0 %v9177_v44  ;;  %v9239_v29 = vld [vmem:[#allocation2 + $0x444] ss:$16 sps:$4 sm:$0xff]   ;;  %v9237_v31 = vld [vmem:[#allocation2 + $0x440] ss:$16 sps:$4 sm:$0xff]   ;;  %v10860_v44 = vcombine.high %v10852_v40, %v10852_v40 }
  0x78   :  { %4987 = vmatprep.subr.bf16.mxu1 %v9179_v45  ;;  %v9242_v30 = vld [vmem:[#allocation2 + $0x644] ss:$16 sps:$4 sm:$0xff]   ;;  %v9240_v32 = vld [vmem:[#allocation2 + $0x640] ss:$16 sps:$4 sm:$0xff]  }
  0x79   :  { %v9245_v33 = vld [vmem:[#allocation2 + $0x424] ss:$16 sps:$4 sm:$0xff]   ;;  %v9243_v37 = vld [vmem:[#allocation2 + $0x420] ss:$16 sps:$4 sm:$0xff]  }
  0x7a   :  { %4947 = vmatpush2.bf16.msra.mxu0 %v9181_v50  ;;  %v9248_v34 = vld [vmem:[#allocation2 + $0x624] ss:$16 sps:$4 sm:$0xff]   ;;  %v9246_v38 = vld [vmem:[#allocation2 + $0x620] ss:$16 sps:$4 sm:$0xff]  }
  0x7b   :  { %4988 = vmatpush2.bf16.msra.mxu1 %v9182_v51  ;;  %4948 = vmatprep.subr.bf16.mxu0 %v9183_v53  ;;  %v105_v35 = vld [vmem:[%s11157_s0 + $0x10] sm:$0xff] }
  0x7c   :  { %4989 = vmatprep.subr.bf16.mxu1 %v9185_v54  ;;  %v10849_v39 = vmax.bf16 %v10763_v47, %v105_v35  ;;  %v9251_v41 = vld [vmem:[#allocation2 + $0x404] ss:$16 sps:$4 sm:$0xff]   ;;  %v9249_v45 = vld [vmem:[#allocation2 + $0x400] ss:$16 sps:$4 sm:$0xff]  }
  0x7d   :  { %v9254_v42 = vld [vmem:[#allocation2 + $0x604] ss:$16 sps:$4 sm:$0xff]   ;;  %v9252_v46 = vld [vmem:[#allocation2 + $0x600] ss:$16 sps:$4 sm:$0xff]  }
  0x7e   :  { %4949 = vmatpush2.bf16.msra.mxu0 %v9187_v57  ;;  %v10856_v43 = vcombine.high %v10849_v39, %v10849_v39  ;;  %v9257_v48 = vld [vmem:[#allocation2 + $0x5e4] ss:$16 sps:$4 sm:$0xff]   ;;  %v9255_v50 = vld [vmem:[#allocation2 + $0x5e0] ss:$16 sps:$4 sm:$0xff]  }
  0x7f   :  { %4990 = vmatpush2.bf16.msra.mxu1 %v9188_v58  ;;  %4950 = vmatprep.subr.bf16.mxu0 %v9189_v59  ;;  %v9260_v49 = vld [vmem:[#allocation2 + $0x7e4] ss:$16 sps:$4 sm:$0xff]   ;;  %v9258_v51 = vld [vmem:[#allocation2 + $0x7e0] ss:$16 sps:$4 sm:$0xff]  }
  0x80   :  { %4991 = vmatprep.subr.bf16.mxu1 %v9191_v60  ;;  %v9263_v52 = vld [vmem:[#allocation2 + $0x5c4] ss:$16 sps:$4 sm:$0xff]   ;;  %v9261_v54 = vld [vmem:[#allocation2 + $0x5c0] ss:$16 sps:$4 sm:$0xff]  }
  0x81   :  { %v9266_v53 = vld [vmem:[#allocation2 + $0x7c4] ss:$16 sps:$4 sm:$0xff]   ;;  %v9264_v57 = vld [vmem:[#allocation2 + $0x7c0] ss:$16 sps:$4 sm:$0xff]  }
  0x82   :  { %4951 = vmatpush2.bf16.msra.mxu0 %v9193_v61  ;;  %v9269_v58 = vld [vmem:[#allocation2 + $0x5a4] ss:$16 sps:$4 sm:$0xff]   ;;  %v9267_v60 = vld [vmem:[#allocation2 + $0x5a0] ss:$16 sps:$4 sm:$0xff]  }
  0x83   :  { %4992 = vmatpush2.bf16.msra.mxu1 %v9194_v62  ;;  %4952 = vmatprep.subr.bf16.mxu0 %v9195_v63  ;;  %v9272_v59 = vld [vmem:[#allocation2 + $0x7a4] ss:$16 sps:$4 sm:$0xff]   ;;  %v9270_v61 = vld [vmem:[#allocation2 + $0x7a0] ss:$16 sps:$4 sm:$0xff]  }
  0x84   :  { %4993 = vmatprep.subr.bf16.mxu1 %v9197_v0  ;;  %v9275_v62 = vld [vmem:[#allocation2 + $0x584] ss:$16 sps:$4 sm:$0xff]   ;;  %v9273_v0 = vld [vmem:[#allocation2 + $0x580] ss:$16 sps:$4 sm:$0xff]  }
  0x85   :  { %v9278_v63 = vld [vmem:[#allocation2 + $0x784] ss:$16 sps:$4 sm:$0xff]  }
  0x86   :  { %4953 = vmatpush2.bf16.msra.mxu0 %v9199_v1  ;;  %v9276_v1 = vld [vmem:[#allocation2 + $0x780] ss:$16 sps:$4 sm:$0xff]   ;;  %v9317_v36 = vld [vmem:[#allocation2 + $0x8a4] ss:$16 sps:$4 sm:$0xff]  }
  0x87   :  { %4994 = vmatpush2.bf16.msra.mxu1 %v9200_v2  ;;  %4954 = vmatprep.subr.bf16.mxu0 %v9201_v3  ;;  %v9281_v2 = vld [vmem:[#allocation2 + $0x564] ss:$16 sps:$4 sm:$0xff]  }
  0x88   :  { %4995 = vmatprep.subr.bf16.mxu1 %v9203_v4  ;;  %v9284_v3 = vld [vmem:[#allocation2 + $0x764] ss:$16 sps:$4 sm:$0xff]   ;;  %v9279_v4 = vld [vmem:[#allocation2 + $0x560] ss:$16 sps:$4 sm:$0xff]  }
  0x8a   :  { %4955 = vmatpush2.bf16.msra.mxu0 %v9205_v5  ;;  %v9282_v5 = vld [vmem:[#allocation2 + $0x760] ss:$16 sps:$4 sm:$0xff]  }
  0x8b   :  { %4996 = vmatpush2.bf16.msra.mxu1 %v9206_v6  ;;  %5006 = vmatprep.subr.bf16.mxu0 %v9209_v7  ;;  %v9287_v6 = vld [vmem:[#allocation2 + $0x544] ss:$16 sps:$4 sm:$0xff]  }
  0x8c   :  { %5047 = vmatprep.subr.bf16.mxu1 %v9212_v8  ;;  %v9290_v7 = vld [vmem:[#allocation2 + $0x744] ss:$16 sps:$4 sm:$0xff]   ;;  %v9285_v8 = vld [vmem:[#allocation2 + $0x540] ss:$16 sps:$4 sm:$0xff]  }
  0x8d   :  { %4957 = vmatmul.mubr.bf16.vlgmr.msra.gmra.mxu0 %v10836_v9 }
  0x8e   :  { %4998 = vmatmul.mubr.bf16.vlgmr.msra.gmra.mxu1 %v10838_v10  ;;  %5007 = vmatpush1.bf16.msra.mxu0 %v9207_v11  ;;  %v9288_v11 = vld [vmem:[#allocation2 + $0x740] ss:$16 sps:$4 sm:$0xff]  }
  0x8f   :  { %5048 = vmatpush1.bf16.msra.mxu1 %v9210_v12  ;;  %5008 = vmatprep.subr.bf16.mxu0 %v9215_v13  ;;  %v9293_v12 = vld [vmem:[#allocation2 + $0x524] ss:$16 sps:$4 sm:$0xff]  }
  0x90   :  { %5049 = vmatprep.subr.bf16.mxu1 %v9218_v14  ;;  %5038 = vmatprep.mubr.bf16.mxu0 %v10856_v43  ;;  %v9296_v13 = vld [vmem:[#allocation2 + $0x724] ss:$16 sps:$4 sm:$0xff]   ;;  %v9291_v14 = vld [vmem:[#allocation2 + $0x520] ss:$16 sps:$4 sm:$0xff]  }
  0x91   :  { %5079 = vmatprep.mubr.bf16.mxu1 %v10860_v44 }
  0x92   :  { %5009 = vmatpush1.bf16.msra.mxu0 %v9213_v15  ;;  %v9294_v15 = vld [vmem:[#allocation2 + $0x720] ss:$16 sps:$4 sm:$0xff]  }
  0x93   :  { %5050 = vmatpush1.bf16.msra.mxu1 %v9216_v16  ;;  %5010 = vmatprep.subr.bf16.mxu0 %v9221_v17  ;;  %v9299_v16 = vld [vmem:[#allocation2 + $0x504] ss:$16 sps:$4 sm:$0xff]  }
  0x94   :  { %5051 = vmatprep.subr.bf16.mxu1 %v9224_v18  ;;  %v9302_v17 = vld [vmem:[#allocation2 + $0x704] ss:$16 sps:$4 sm:$0xff]   ;;  %v9297_v18 = vld [vmem:[#allocation2 + $0x500] ss:$16 sps:$4 sm:$0xff]  }
  0x96   :  { %5011 = vmatpush1.bf16.msra.mxu0 %v9219_v19  ;;  %v9300_v19 = vld [vmem:[#allocation2 + $0x700] ss:$16 sps:$4 sm:$0xff]  }
  0x97   :  { %5052 = vmatpush1.bf16.msra.mxu1 %v9222_v20  ;;  %5012 = vmatprep.subr.bf16.mxu0 %v9227_v21  ;;  %v9305_v20 = vld [vmem:[#allocation2 + $0x8e4] ss:$16 sps:$4 sm:$0xff]  }
  0x98   :  { %5053 = vmatprep.subr.bf16.mxu1 %v9230_v22  ;;  %v9308_v21 = vld [vmem:[#allocation2 + $0xae4] ss:$16 sps:$4 sm:$0xff]   ;;  %v10866_v22 = vcombine.low %v10849_v39, %v10849_v39  ;;  %v9318_v39 = vld [vmem:[#allocation2 + $0xaa0] ss:$16 sps:$4 sm:$0xff]  }
  0x9a   :  { %5013 = vmatpush1.bf16.msra.mxu0 %v9225_v23  ;;  %v10870_v23 = vcombine.low %v10852_v40, %v10852_v40  ;;  %v9323_v40 = vld [vmem:[#allocation2 + $0x884] ss:$16 sps:$4 sm:$0xff]  }
  0x9b   :  { %5054 = vmatpush1.bf16.msra.mxu1 %v9228_v24  ;;  %5014 = vmatprep.subr.bf16.mxu0 %v9233_v25  ;;  %v9303_v24 = vld [vmem:[#allocation2 + $0x8e0] ss:$16 sps:$4 sm:$0xff]  }
  0x9c   :  { %5055 = vmatprep.subr.bf16.mxu1 %v9236_v26  ;;  %v9306_v25 = vld [vmem:[#allocation2 + $0xae0] ss:$16 sps:$4 sm:$0xff]   ;;  %v9311_v26 = vld [vmem:[#allocation2 + $0x8c4] ss:$16 sps:$4 sm:$0xff]  }
  0x9e   :  { %5015 = vmatpush1.bf16.msra.mxu0 %v9231_v27  ;;  %v9314_v27 = vld [vmem:[#allocation2 + $0xac4] ss:$16 sps:$4 sm:$0xff]  }
  0x9f   :  { %5056 = vmatpush1.bf16.msra.mxu1 %v9234_v28  ;;  %5016 = vmatprep.subr.bf16.mxu0 %v9239_v29  ;;  %v107_v28 = vld [vmem:[%s11157_s0 + $0x20] sm:$0xff]  ;;  %v108_v29 = vld [vmem:[%s11157_s0 + $0x28] sm:$0xff] }
  0xa0   :  { %5057 = vmatprep.subr.bf16.mxu1 %v9242_v30  ;;  %v10879_v30 = vmax.bf16 %v10763_v47, %v107_v28  ;;  %v9384_v28 = vld [vmem:[#allocation2 + $0xb40] ss:$16 sps:$4 sm:$0xff]  }
  0xa2   :  { %5017 = vmatpush1.bf16.msra.mxu0 %v9237_v31  ;;  %v10882_v31 = vmax.bf16 %v10763_v47, %v108_v29  ;;  %v9389_v29 = vld [vmem:[#allocation2 + $0x924] ss:$16 sps:$4 sm:$0xff]  }
  0xa3   :  { %5058 = vmatpush1.bf16.msra.mxu1 %v9240_v32  ;;  %5018 = vmatprep.subr.bf16.mxu0 %v9245_v33  ;;  %v9309_v32 = vld [vmem:[#allocation2 + $0x8c0] ss:$16 sps:$4 sm:$0xff]  }
  0xa4   :  { %5059 = vmatprep.subr.bf16.mxu1 %v9248_v34  ;;  %v9312_v33 = vld [vmem:[#allocation2 + $0xac0] ss:$16 sps:$4 sm:$0xff]   ;;  %v10888_v34 = vcombine.high %v10879_v30, %v10879_v30  ;;  %v10892_v35 = vcombine.high %v10882_v31, %v10882_v31 }
  0xa6   :  { %5019 = vmatpush1.bf16.msra.mxu0 %v9243_v37  ;;  %v9320_v37 = vld [vmem:[#allocation2 + $0xaa4] ss:$16 sps:$4 sm:$0xff]  }
  0xa7   :  { %5060 = vmatpush1.bf16.msra.mxu1 %v9246_v38  ;;  %5020 = vmatprep.subr.bf16.mxu0 %v9251_v41  ;;  %v9315_v38 = vld [vmem:[#allocation2 + $0x8a0] ss:$16 sps:$4 sm:$0xff]   ;;  %v9326_v41 = vld [vmem:[#allocation2 + $0xa84] ss:$16 sps:$4 sm:$0xff]  }
  0xa8   :  { %5061 = vmatprep.subr.bf16.mxu1 %v9254_v42  ;;  %v9321_v42 = vld [vmem:[#allocation2 + $0x880] ss:$16 sps:$4 sm:$0xff]  }
  0xaa   :  { %5021 = vmatpush1.bf16.msra.mxu0 %v9249_v45  ;;  %v9324_v45 = vld [vmem:[#allocation2 + $0xa80] ss:$16 sps:$4 sm:$0xff]  }
  0xab   :  { %5062 = vmatpush1.bf16.msra.mxu1 %v9252_v46  ;;  %5022 = vmatprep.subr.bf16.mxu0 %v9257_v48  ;;  %v9329_v46 = vld [vmem:[#allocation2 + $0x864] ss:$16 sps:$4 sm:$0xff]  }
  0xac   :  { %5063 = vmatprep.subr.bf16.mxu1 %v9260_v49  ;;  %v9332_v48 = vld [vmem:[#allocation2 + $0xa64] ss:$16 sps:$4 sm:$0xff]   ;;  %v9327_v49 = vld [vmem:[#allocation2 + $0x860] ss:$16 sps:$4 sm:$0xff]  }
  0xae   :  { %5023 = vmatpush2.bf16.msra.mxu0 %v9255_v50  ;;  %v9330_v50 = vld [vmem:[#allocation2 + $0xa60] ss:$16 sps:$4 sm:$0xff]  }
  0xaf   :  { %5064 = vmatpush2.bf16.msra.mxu1 %v9258_v51  ;;  %5024 = vmatprep.subr.bf16.mxu0 %v9263_v52  ;;  %v9335_v51 = vld [vmem:[#allocation2 + $0x844] ss:$16 sps:$4 sm:$0xff]  }
  0xb0   :  { %5065 = vmatprep.subr.bf16.mxu1 %v9266_v53  ;;  %v9338_v52 = vld [vmem:[#allocation2 + $0xa44] ss:$16 sps:$4 sm:$0xff]   ;;  %v9333_v53 = vld [vmem:[#allocation2 + $0x840] ss:$16 sps:$4 sm:$0xff]  }
  0xb2   :  { %5025 = vmatpush2.bf16.msra.mxu0 %v9261_v54  ;;  %v9336_v54 = vld [vmem:[#allocation2 + $0xa40] ss:$16 sps:$4 sm:$0xff]  }
  0xb3   :  { %5066 = vmatpush2.bf16.msra.mxu1 %v9264_v57  ;;  %5026 = vmatprep.subr.bf16.mxu0 %v9269_v58  ;;  %v9341_v57 = vld [vmem:[#allocation2 + $0x824] ss:$16 sps:$4 sm:$0xff]  }
  0xb4   :  { %5067 = vmatprep.subr.bf16.mxu1 %v9272_v59  ;;  %v9344_v58 = vld [vmem:[#allocation2 + $0xa24] ss:$16 sps:$4 sm:$0xff]   ;;  %v9339_v59 = vld [vmem:[#allocation2 + $0x820] ss:$16 sps:$4 sm:$0xff]  }
  0xb6   :  { %5027 = vmatpush2.bf16.msra.mxu0 %v9267_v60  ;;  %v9342_v60 = vld [vmem:[#allocation2 + $0xa20] ss:$16 sps:$4 sm:$0xff]  }
  0xb7   :  { %5068 = vmatpush2.bf16.msra.mxu1 %v9270_v61  ;;  %5028 = vmatprep.subr.bf16.mxu0 %v9275_v62  ;;  %v9347_v61 = vld [vmem:[#allocation2 + $0x804] ss:$16 sps:$4 sm:$0xff]  }
  0xb8   :  { %5069 = vmatprep.subr.bf16.mxu1 %v9278_v63  ;;  %v9350_v62 = vld [vmem:[#allocation2 + $0xa04] ss:$16 sps:$4 sm:$0xff]   ;;  %v9345_v63 = vld [vmem:[#allocation2 + $0x800] ss:$16 sps:$4 sm:$0xff]  }
  0xba   :  { %5029 = vmatpush2.bf16.msra.mxu0 %v9273_v0  ;;  %v9348_v0 = vld [vmem:[#allocation2 + $0xa00] ss:$16 sps:$4 sm:$0xff]  }
  0xbb   :  { %5070 = vmatpush2.bf16.msra.mxu1 %v9276_v1  ;;  %5030 = vmatprep.subr.bf16.mxu0 %v9281_v2  ;;  %v9353_v1 = vld [vmem:[#allocation2 + $0x9e4] ss:$16 sps:$4 sm:$0xff]  }
  0xbc   :  { %5071 = vmatprep.subr.bf16.mxu1 %v9284_v3  ;;  %v9356_v2 = vld [vmem:[#allocation2 + $0xbe4] ss:$16 sps:$4 sm:$0xff]   ;;  %v9351_v3 = vld [vmem:[#allocation2 + $0x9e0] ss:$16 sps:$4 sm:$0xff]  }
  0xbe   :  { %5031 = vmatpush2.bf16.msra.mxu0 %v9279_v4  ;;  %v9354_v4 = vld [vmem:[#allocation2 + $0xbe0] ss:$16 sps:$4 sm:$0xff]  }
  0xbf   :  { %5072 = vmatpush2.bf16.msra.mxu1 %v9282_v5  ;;  %5032 = vmatprep.subr.bf16.mxu0 %v9287_v6  ;;  %v9359_v5 = vld [vmem:[#allocation2 + $0x9c4] ss:$16 sps:$4 sm:$0xff]  }
  0xc0   :  { %5073 = vmatprep.subr.bf16.mxu1 %v9290_v7  ;;  %v9362_v6 = vld [vmem:[#allocation2 + $0xbc4] ss:$16 sps:$4 sm:$0xff]   ;;  %v9357_v7 = vld [vmem:[#allocation2 + $0x9c0] ss:$16 sps:$4 sm:$0xff]  }
  0xc2   :  { %5033 = vmatpush2.bf16.msra.mxu0 %v9285_v8  ;;  %v9360_v8 = vld [vmem:[#allocation2 + $0xbc0] ss:$16 sps:$4 sm:$0xff]  }
  0xc3   :  { %5074 = vmatpush2.bf16.msra.mxu1 %v9288_v11  ;;  %5034 = vmatprep.subr.bf16.mxu0 %v9293_v12  ;;  %v9365_v11 = vld [vmem:[#allocation2 + $0x9a4] ss:$16 sps:$4 sm:$0xff]  }
  0xc4   :  { %5075 = vmatprep.subr.bf16.mxu1 %v9296_v13  ;;  %v9368_v12 = vld [vmem:[#allocation2 + $0xba4] ss:$16 sps:$4 sm:$0xff]   ;;  %v9363_v13 = vld [vmem:[#allocation2 + $0x9a0] ss:$16 sps:$4 sm:$0xff]  }
  0xc6   :  { %5035 = vmatpush2.bf16.msra.mxu0 %v9291_v14  ;;  %v9366_v14 = vld [vmem:[#allocation2 + $0xba0] ss:$16 sps:$4 sm:$0xff]  }
  0xc7   :  { %5076 = vmatpush2.bf16.msra.mxu1 %v9294_v15  ;;  %5036 = vmatprep.subr.bf16.mxu0 %v9299_v16  ;;  %v9371_v15 = vld [vmem:[#allocation2 + $0x984] ss:$16 sps:$4 sm:$0xff]  }
  0xc8   :  { %5077 = vmatprep.subr.bf16.mxu1 %v9302_v17  ;;  %v9374_v16 = vld [vmem:[#allocation2 + $0xb84] ss:$16 sps:$4 sm:$0xff]   ;;  %v9369_v17 = vld [vmem:[#allocation2 + $0x980] ss:$16 sps:$4 sm:$0xff]  }
  0xca   :  { %5037 = vmatpush2.bf16.msra.mxu0 %v9297_v18  ;;  %v9372_v18 = vld [vmem:[#allocation2 + $0xb80] ss:$16 sps:$4 sm:$0xff]  }
  0xcb   :  { %5078 = vmatpush2.bf16.msra.mxu1 %v9300_v19  ;;  %5088 = vmatprep.subr.bf16.mxu0 %v9305_v20  ;;  %v9377_v19 = vld [vmem:[#allocation2 + $0x964] ss:$16 sps:$4 sm:$0xff]  }
  0xcc   :  { %5129 = vmatprep.subr.bf16.mxu1 %v9308_v21  ;;  %v9380_v20 = vld [vmem:[#allocation2 + $0xb64] ss:$16 sps:$4 sm:$0xff]   ;;  %v9375_v21 = vld [vmem:[#allocation2 + $0x960] ss:$16 sps:$4 sm:$0xff]  }
  0xcd   :  { %5039 = vmatmul.mubr.bf16.vlgmr.msra.gmra.mxu0 %v10866_v22 }
  0xce   :  { %5080 = vmatmul.mubr.bf16.vlgmr.msra.gmra.mxu1 %v10870_v23  ;;  %5089 = vmatpush1.bf16.msra.mxu0 %v9303_v24  ;;  %v9378_v24 = vld [vmem:[#allocation2 + $0xb60] ss:$16 sps:$4 sm:$0xff]  }
  0xcf   :  { %5130 = vmatpush1.bf16.msra.mxu1 %v9306_v25  ;;  %5090 = vmatprep.subr.bf16.mxu0 %v9311_v26  ;;  %v9383_v25 = vld [vmem:[#allocation2 + $0x944] ss:$16 sps:$4 sm:$0xff]  }
  0xd0   :  { %5131 = vmatprep.subr.bf16.mxu1 %v9314_v27  ;;  %5120 = vmatprep.mubr.bf16.mxu0 %v10888_v34  ;;  %v9386_v26 = vld [vmem:[#allocation2 + $0xb44] ss:$16 sps:$4 sm:$0xff]   ;;  %v9381_v27 = vld [vmem:[#allocation2 + $0x940] ss:$16 sps:$4 sm:$0xff]  }
  0xd1   :  { %5161 = vmatprep.mubr.bf16.mxu1 %v10892_v35 }
  0xd2   :  { %5091 = vmatpush1.bf16.msra.mxu0 %v9309_v32  ;;  %v9392_v32 = vld [vmem:[#allocation2 + $0xb24] ss:$16 sps:$4 sm:$0xff]  }
  0xd3   :  { %5132 = vmatpush1.bf16.msra.mxu1 %v9312_v33  ;;  %5092 = vmatprep.subr.bf16.mxu0 %v9317_v36  ;;  %v9387_v33 = vld [vmem:[#allocation2 + $0x920] ss:$16 sps:$4 sm:$0xff]  }
  0xd4   :  { %5133 = vmatprep.subr.bf16.mxu1 %v9320_v37  ;;  %v9390_v36 = vld [vmem:[#allocation2 + $0xb20] ss:$16 sps:$4 sm:$0xff]   ;;  %v9395_v37 = vld [vmem:[#allocation2 + $0x904] ss:$16 sps:$4 sm:$0xff]  }
  0xd6   :  { %5093 = vmatpush1.bf16.msra.mxu0 %v9315_v38  ;;  %v9398_v38 = vld [vmem:[#allocation2 + $0xb04] ss:$16 sps:$4 sm:$0xff]  }
  0xd7   :  { %5134 = vmatpush1.bf16.msra.mxu1 %v9318_v39  ;;  %5094 = vmatprep.subr.bf16.mxu0 %v9323_v40  ;;  %v9393_v39 = vld [vmem:[#allocation2 + $0x900] ss:$16 sps:$4 sm:$0xff]  }
  0xd8   :  { %5135 = vmatprep.subr.bf16.mxu1 %v9326_v41  ;;  %v9396_v40 = vld [vmem:[#allocation2 + $0xb00] ss:$16 sps:$4 sm:$0xff]  }
  0xd9   :  { %v109_v41 = vld [vmem:[%s11157_s0 + $0x30] sm:$0xff] }
  0xda   :  { %5095 = vmatpush1.bf16.msra.mxu0 %v9321_v42  ;;  %v110_v42 = vld [vmem:[%s11157_s0 + $0x38] sm:$0xff] }
  0xdb   :  { %5136 = vmatpush1.bf16.msra.mxu1 %v9324_v45  ;;  %5096 = vmatprep.subr.bf16.mxu0 %v9329_v46  ;;  %v9401_v45 = vld [vmem:[#allocation2 + $0xce4] ss:$16 sps:$4 sm:$0xff]  }
  0xdc   :  { %5137 = vmatprep.subr.bf16.mxu1 %v9332_v48  ;;  %v9404_v46 = vld [vmem:[#allocation2 + $0xee4] ss:$16 sps:$4 sm:$0xff]   ;;  %v10903_v48 = vmax.bf16 %v10763_v47, %v109_v41 }
  0xdd   :  { %v9470_v41 = vld [vmem:[#allocation2 + $0xf84] ss:$16 sps:$4 sm:$0xff]  }
  0xde   :  { %5097 = vmatpush1.bf16.msra.mxu0 %v9327_v49  ;;  %v10906_v49 = vmax.bf16 %v10763_v47, %v110_v42  ;;  %v9465_v42 = vld [vmem:[#allocation2 + $0xd80] ss:$16 sps:$4 sm:$0xff]  }
  0xdf   :  { %5138 = vmatpush1.bf16.msra.mxu1 %v9330_v50  ;;  %5098 = vmatprep.subr.bf16.mxu0 %v9335_v51  ;;  %v10910_v50 = vcombine.low %v10879_v30, %v10879_v30  ;;  %v10914_v51 = vcombine.low %v10882_v31, %v10882_v31  ;;  %v9405_v31 = vld [vmem:[#allocation2 + $0xcc0] ss:$16 sps:$4 sm:$0xff]  }
  0xe0   :  { %5139 = vmatprep.subr.bf16.mxu1 %v9338_v52  ;;  %v9399_v52 = vld [vmem:[#allocation2 + $0xce0] ss:$16 sps:$4 sm:$0xff]   ;;  %v10922_v30 = vcombine.high %v10906_v49, %v10906_v49 }
  0xe2   :  { %5099 = vmatpush1.bf16.msra.mxu0 %v9333_v53  ;;  %v9402_v53 = vld [vmem:[#allocation2 + $0xee0] ss:$16 sps:$4 sm:$0xff]  }
  0xe3   :  { %5140 = vmatpush1.bf16.msra.mxu1 %v9336_v54  ;;  %5100 = vmatprep.subr.bf16.mxu0 %v9341_v57  ;;  %v9407_v54 = vld [vmem:[#allocation2 + $0xcc4] ss:$16 sps:$4 sm:$0xff]  }
  0xe4   :  { %5141 = vmatprep.subr.bf16.mxu1 %v9344_v58  ;;  %v9410_v57 = vld [vmem:[#allocation2 + $0xec4] ss:$16 sps:$4 sm:$0xff]   ;;  %v10918_v58 = vcombine.high %v10903_v48, %v10903_v48 }
  0xe6   :  { %5101 = vmatpush1.bf16.msra.mxu0 %v9339_v59  ;;  %v9408_v59 = vld [vmem:[#allocation2 + $0xec0] ss:$16 sps:$4 sm:$0xff]  }
  0xe7   :  { %5142 = vmatpush1.bf16.msra.mxu1 %v9342_v60  ;;  %5102 = vmatprep.subr.bf16.mxu0 %v9347_v61  ;;  %v9413_v60 = vld [vmem:[#allocation2 + $0xca4] ss:$16 sps:$4 sm:$0xff]  }
  0xe8   :  { %5143 = vmatprep.subr.bf16.mxu1 %v9350_v62  ;;  %v9416_v61 = vld [vmem:[#allocation2 + $0xea4] ss:$16 sps:$4 sm:$0xff]   ;;  %v9411_v62 = vld [vmem:[#allocation2 + $0xca0] ss:$16 sps:$4 sm:$0xff]  }
  0xea   :  { %5103 = vmatpush1.bf16.msra.mxu0 %v9345_v63  ;;  %v9414_v63 = vld [vmem:[#allocation2 + $0xea0] ss:$16 sps:$4 sm:$0xff]  }
  0xeb   :  { %5144 = vmatpush1.bf16.msra.mxu1 %v9348_v0  ;;  %5104 = vmatprep.subr.bf16.mxu0 %v9353_v1  ;;  %v9419_v0 = vld [vmem:[#allocation2 + $0xc84] ss:$16 sps:$4 sm:$0xff]  }
  0xec   :  { %5145 = vmatprep.subr.bf16.mxu1 %v9356_v2  ;;  %v9422_v1 = vld [vmem:[#allocation2 + $0xe84] ss:$16 sps:$4 sm:$0xff]   ;;  %v9417_v2 = vld [vmem:[#allocation2 + $0xc80] ss:$16 sps:$4 sm:$0xff]  }
  0xee   :  { %5105 = vmatpush2.bf16.msra.mxu0 %v9351_v3  ;;  %v9420_v3 = vld [vmem:[#allocation2 + $0xe80] ss:$16 sps:$4 sm:$0xff]  }
  0xef   :  { %5146 = vmatpush2.bf16.msra.mxu1 %v9354_v4  ;;  %5106 = vmatprep.subr.bf16.mxu0 %v9359_v5  ;;  %v9425_v4 = vld [vmem:[#allocation2 + $0xc64] ss:$16 sps:$4 sm:$0xff]  }
  0xf0   :  { %5147 = vmatprep.subr.bf16.mxu1 %v9362_v6  ;;  %v9428_v5 = vld [vmem:[#allocation2 + $0xe64] ss:$16 sps:$4 sm:$0xff]   ;;  %v9423_v6 = vld [vmem:[#allocation2 + $0xc60] ss:$16 sps:$4 sm:$0xff]  }
  0xf2   :  { %5107 = vmatpush2.bf16.msra.mxu0 %v9357_v7  ;;  %v9426_v7 = vld [vmem:[#allocation2 + $0xe60] ss:$16 sps:$4 sm:$0xff]  }
  0xf3   :  { %5148 = vmatpush2.bf16.msra.mxu1 %v9360_v8  ;;  %5108 = vmatprep.subr.bf16.mxu0 %v9365_v11  ;;  %v9431_v8 = vld [vmem:[#allocation2 + $0xc44] ss:$16 sps:$4 sm:$0xff]  }
  0xf4   :  { %5149 = vmatprep.subr.bf16.mxu1 %v9368_v12  ;;  %v9434_v11 = vld [vmem:[#allocation2 + $0xe44] ss:$16 sps:$4 sm:$0xff]   ;;  %v9429_v12 = vld [vmem:[#allocation2 + $0xc40] ss:$16 sps:$4 sm:$0xff]  }
  0xf6   :  { %5109 = vmatpush2.bf16.msra.mxu0 %v9363_v13  ;;  %v9432_v13 = vld [vmem:[#allocation2 + $0xe40] ss:$16 sps:$4 sm:$0xff]  }
  0xf7   :  { %5150 = vmatpush2.bf16.msra.mxu1 %v9366_v14  ;;  %5110 = vmatprep.subr.bf16.mxu0 %v9371_v15  ;;  %v9437_v14 = vld [vmem:[#allocation2 + $0xc24] ss:$16 sps:$4 sm:$0xff]  }
  0xf8   :  { %5151 = vmatprep.subr.bf16.mxu1 %v9374_v16  ;;  %v9440_v15 = vld [vmem:[#allocation2 + $0xe24] ss:$16 sps:$4 sm:$0xff]   ;;  %v9435_v16 = vld [vmem:[#allocation2 + $0xc20] ss:$16 sps:$4 sm:$0xff]  }
  0xfa   :  { %5111 = vmatpush2.bf16.msra.mxu0 %v9369_v17  ;;  %v9438_v17 = vld [vmem:[#allocation2 + $0xe20] ss:$16 sps:$4 sm:$0xff]  }
  0xfb   :  { %5152 = vmatpush2.bf16.msra.mxu1 %v9372_v18  ;;  %5112 = vmatprep.subr.bf16.mxu0 %v9377_v19  ;;  %v9443_v18 = vld [vmem:[#allocation2 + $0xc04] ss:$16 sps:$4 sm:$0xff]  }
  0xfc   :  { %5153 = vmatprep.subr.bf16.mxu1 %v9380_v20  ;;  %v9446_v19 = vld [vmem:[#allocation2 + $0xe04] ss:$16 sps:$4 sm:$0xff]   ;;  %v9441_v20 = vld [vmem:[#allocation2 + $0xc00] ss:$16 sps:$4 sm:$0xff]  }
  0xfe   :  { %5113 = vmatpush2.bf16.msra.mxu0 %v9375_v21  ;;  %v9444_v21 = vld [vmem:[#allocation2 + $0xe00] ss:$16 sps:$4 sm:$0xff]  }
  0xff   :  { %5154 = vmatpush2.bf16.msra.mxu1 %v9378_v24  ;;  %5114 = vmatprep.subr.bf16.mxu0 %v9383_v25  ;;  %v9449_v24 = vld [vmem:[#allocation2 + $0xde4] ss:$16 sps:$4 sm:$0xff]  }
 0x100   :  { %5155 = vmatprep.subr.bf16.mxu1 %v9386_v26  ;;  %v9452_v25 = vld [vmem:[#allocation2 + $0xfe4] ss:$16 sps:$4 sm:$0xff]   ;;  %v9447_v26 = vld [vmem:[#allocation2 + $0xde0] ss:$16 sps:$4 sm:$0xff]  }
 0x102   :  { %5115 = vmatpush2.bf16.msra.mxu0 %v9381_v27  ;;  %v9450_v27 = vld [vmem:[#allocation2 + $0xfe0] ss:$16 sps:$4 sm:$0xff]  }
 0x103   :  { %5156 = vmatpush2.bf16.msra.mxu1 %v9384_v28  ;;  %5116 = vmatprep.subr.bf16.mxu0 %v9389_v29  ;;  %v9455_v28 = vld [vmem:[#allocation2 + $0xdc4] ss:$16 sps:$4 sm:$0xff]  }
 0x104   :  { %5157 = vmatprep.subr.bf16.mxu1 %v9392_v32  ;;  %v9458_v29 = vld [vmem:[#allocation2 + $0xfc4] ss:$16 sps:$4 sm:$0xff]   ;;  %v9453_v32 = vld [vmem:[#allocation2 + $0xdc0] ss:$16 sps:$4 sm:$0xff]  }
 0x106   :  { %5117 = vmatpush2.bf16.msra.mxu0 %v9387_v33  ;;  %v9456_v33 = vld [vmem:[#allocation2 + $0xfc0] ss:$16 sps:$4 sm:$0xff]  }
 0x107   :  { %5158 = vmatpush2.bf16.msra.mxu1 %v9390_v36  ;;  %5118 = vmatprep.subr.bf16.mxu0 %v9395_v37  ;;  %v9461_v36 = vld [vmem:[#allocation2 + $0xda4] ss:$16 sps:$4 sm:$0xff]  }
 0x108   :  { %5159 = vmatprep.subr.bf16.mxu1 %v9398_v38  ;;  %v9464_v37 = vld [vmem:[#allocation2 + $0xfa4] ss:$16 sps:$4 sm:$0xff]   ;;  %v9459_v38 = vld [vmem:[#allocation2 + $0xda0] ss:$16 sps:$4 sm:$0xff]  }
 0x10a   :  { %5119 = vmatpush2.bf16.msra.mxu0 %v9393_v39  ;;  %v9462_v39 = vld [vmem:[#allocation2 + $0xfa0] ss:$16 sps:$4 sm:$0xff]  }
 0x10b   :  { %5160 = vmatpush2.bf16.msra.mxu1 %v9396_v40  ;;  %5170 = vmatprep.subr.bf16.mxu0 %v9401_v45  ;;  %v9467_v40 = vld [vmem:[#allocation2 + $0xd84] ss:$16 sps:$4 sm:$0xff]   ;;  %v9468_v45 = vld [vmem:[#allocation2 + $0xf80] ss:$16 sps:$4 sm:$0xff]  }
 0x10c   :  { %5211 = vmatprep.subr.bf16.mxu1 %v9404_v46  ;;  %v9473_v46 = vld [vmem:[#allocation2 + $0xd64] ss:$16 sps:$4 sm:$0xff]  }
 0x10d   :  { %5121 = vmatmul.mubr.bf16.vlgmr.msra.gmra.mxu0 %v10910_v50 }
 0x10e   :  { %5162 = vmatmul.mubr.bf16.vlgmr.msra.gmra.mxu1 %v10914_v51  ;;  %5171 = vmatpush1.bf16.msra.mxu0 %v9399_v52  ;;  %v9476_v52 = vld [vmem:[#allocation2 + $0xf64] ss:$16 sps:$4 sm:$0xff]  }
 0x10f   :  { %5212 = vmatpush1.bf16.msra.mxu1 %v9402_v53  ;;  %5172 = vmatprep.subr.bf16.mxu0 %v9407_v54  ;;  %v9471_v53 = vld [vmem:[#allocation2 + $0xd60] ss:$16 sps:$4 sm:$0xff]  }
 0x110   :  { %5213 = vmatprep.subr.bf16.mxu1 %v9410_v57  ;;  %5202 = vmatprep.mubr.bf16.mxu0 %v10918_v58  ;;  %v9474_v54 = vld [vmem:[#allocation2 + $0xf60] ss:$16 sps:$4 sm:$0xff]   ;;  %v9479_v57 = vld [vmem:[#allocation2 + $0xd44] ss:$16 sps:$4 sm:$0xff]  }
 0x111   :  { %5243 = vmatprep.mubr.bf16.mxu1 %v10922_v30 }
 0x112   :  { %5173 = vmatpush1.bf16.msra.mxu0 %v9405_v31  ;;  %v9482_v31 = vld [vmem:[#allocation2 + $0xf44] ss:$16 sps:$4 sm:$0xff]  }
 0x113   :  { %5214 = vmatpush1.bf16.msra.mxu1 %v9408_v59  ;;  %5174 = vmatprep.subr.bf16.mxu0 %v9413_v60  ;;  %v9477_v59 = vld [vmem:[#allocation2 + $0xd40] ss:$16 sps:$4 sm:$0xff]  }
 0x114   :  { %5215 = vmatprep.subr.bf16.mxu1 %v9416_v61  ;;  %v9480_v60 = vld [vmem:[#allocation2 + $0xf40] ss:$16 sps:$4 sm:$0xff]   ;;  %v9485_v61 = vld [vmem:[#allocation2 + $0xd24] ss:$16 sps:$4 sm:$0xff]  }
 0x116   :  { %5175 = vmatpush1.bf16.msra.mxu0 %v9411_v62  ;;  %v9488_v62 = vld [vmem:[#allocation2 + $0xf24] ss:$16 sps:$4 sm:$0xff]  }
 0x117   :  { %5216 = vmatpush1.bf16.msra.mxu1 %v9414_v63  ;;  %5176 = vmatprep.subr.bf16.mxu0 %v9419_v0  ;;  %v9483_v63 = vld [vmem:[#allocation2 + $0xd20] ss:$16 sps:$4 sm:$0xff]  }
 0x118   :  { %5217 = vmatprep.subr.bf16.mxu1 %v9422_v1  ;;  %v9486_v0 = vld [vmem:[#allocation2 + $0xf20] ss:$16 sps:$4 sm:$0xff]   ;;  %v9491_v1 = vld [vmem:[#allocation2 + $0xd04] ss:$16 sps:$4 sm:$0xff]  }
 0x11a   :  { %5177 = vmatpush1.bf16.msra.mxu0 %v9417_v2  ;;  %v9494_v2 = vld [vmem:[#allocation2 + $0xf04] ss:$16 sps:$4 sm:$0xff]  }
 0x11b   :  { %5218 = vmatpush1.bf16.msra.mxu1 %v9420_v3  ;;  %5178 = vmatprep.subr.bf16.mxu0 %v9425_v4  ;;  %v111_v3 = vld [vmem:[%s11157_s0 + $0x40] sm:$0xff]  ;;  %v112_v4 = vld [vmem:[%s11157_s0 + $0x48] sm:$0xff] }
 0x11c   :  { %5219 = vmatprep.subr.bf16.mxu1 %v9428_v5  ;;  %v9489_v5 = vld [vmem:[#allocation2 + $0xd00] ss:$16 sps:$4 sm:$0xff]  }
 0x11e   :  { %5179 = vmatpush1.bf16.msra.mxu0 %v9423_v6  ;;  %v9492_v6 = vld [vmem:[#allocation2 + $0xf00] ss:$16 sps:$4 sm:$0xff]  }
 0x11f   :  { %5220 = vmatpush1.bf16.msra.mxu1 %v9426_v7  ;;  %5180 = vmatprep.subr.bf16.mxu0 %v9431_v8  ;;  %v9497_v7 = vld [vmem:[#allocation2 + $0x10e4] ss:$16 sps:$4 sm:$0xff]  }
 0x120   :  { %5221 = vmatprep.subr.bf16.mxu1 %v9434_v11  ;;  %v9500_v8 = vld [vmem:[#allocation2 + $0x12e4] ss:$16 sps:$4 sm:$0xff]   ;;  %v10935_v11 = vmax.bf16 %v10763_v47, %v111_v3 }
 0x121   :  { %v9542_v3 = vld [vmem:[#allocation2 + $0x1204] ss:$16 sps:$4 sm:$0xff]  }
 0x122   :  { %5181 = vmatpush1.bf16.msra.mxu0 %v9429_v12  ;;  %v10938_v12 = vmax.bf16 %v10763_v47, %v112_v4  ;;  %v9537_v4 = vld [vmem:[#allocation2 + $0x1000] ss:$16 sps:$4 sm:$0xff]  }
 0x123   :  { %5222 = vmatpush1.bf16.msra.mxu1 %v9432_v13  ;;  %5182 = vmatprep.subr.bf16.mxu0 %v9437_v14  ;;  %v10942_v13 = vcombine.low %v10903_v48, %v10903_v48  ;;  %v10946_v14 = vcombine.low %v10906_v49, %v10906_v49  ;;  %v9501_v49 = vld [vmem:[#allocation2 + $0x10c0] ss:$16 sps:$4 sm:$0xff]  }
 0x124   :  { %5223 = vmatprep.subr.bf16.mxu1 %v9440_v15  ;;  %v9495_v15 = vld [vmem:[#allocation2 + $0x10e0] ss:$16 sps:$4 sm:$0xff]   ;;  %v10954_v48 = vcombine.high %v10938_v12, %v10938_v12 }
 0x126   :  { %5183 = vmatpush1.bf16.msra.mxu0 %v9435_v16  ;;  %v9498_v16 = vld [vmem:[#allocation2 + $0x12e0] ss:$16 sps:$4 sm:$0xff]  }
 0x127   :  { %5224 = vmatpush1.bf16.msra.mxu1 %v9438_v17  ;;  %5184 = vmatprep.subr.bf16.mxu0 %v9443_v18  ;;  %v9503_v17 = vld [vmem:[#allocation2 + $0x10c4] ss:$16 sps:$4 sm:$0xff]  }
 0x128   :  { %5225 = vmatprep.subr.bf16.mxu1 %v9446_v19  ;;  %v9506_v18 = vld [vmem:[#allocation2 + $0x12c4] ss:$16 sps:$4 sm:$0xff]   ;;  %v10950_v19 = vcombine.high %v10935_v11, %v10935_v11 }
 0x12a   :  { %5185 = vmatpush1.bf16.msra.mxu0 %v9441_v20 }
 0x12b   :  { %5226 = vmatpush1.bf16.msra.mxu1 %v9444_v21  ;;  %5186 = vmatprep.subr.bf16.mxu0 %v9449_v24  ;;  %v9504_v24 = vld [vmem:[#allocation2 + $0x12c0] ss:$16 sps:$4 sm:$0xff]  }
 0x12c   :  { %5227 = vmatprep.subr.bf16.mxu1 %v9452_v25 }
 0x12e   :  { %5187 = vmatpush2.bf16.msra.mxu0 %v9447_v26  ;;  %v9509_v26 = vld [vmem:[#allocation2 + $0x10a4] ss:$16 sps:$4 sm:$0xff]  }
 0x12f   :  { %5228 = vmatpush2.bf16.msra.mxu1 %v9450_v27  ;;  %5188 = vmatprep.subr.bf16.mxu0 %v9455_v28 }
 0x130   :  { %5229 = vmatprep.subr.bf16.mxu1 %v9458_v29  ;;  %v9512_v29 = vld [vmem:[#allocation2 + $0x12a4] ss:$16 sps:$4 sm:$0xff]  }
 0x132   :  { %5189 = vmatpush2.bf16.msra.mxu0 %v9453_v32 }
 0x133   :  { %5230 = vmatpush2.bf16.msra.mxu1 %v9456_v33  ;;  %5190 = vmatprep.subr.bf16.mxu0 %v9461_v36  ;;  %v9507_v36 = vld [vmem:[#allocation2 + $0x10a0] ss:$16 sps:$4 sm:$0xff]  }
 0x134   :  { %5231 = vmatprep.subr.bf16.mxu1 %v9464_v37  ;;  %v9510_v37 = vld [vmem:[#allocation2 + $0x12a0] ss:$16 sps:$4 sm:$0xff]  }
 0x136   :  { %5191 = vmatpush2.bf16.msra.mxu0 %v9459_v38 }
 0x137   :  { %5232 = vmatpush2.bf16.msra.mxu1 %v9462_v39  ;;  %5192 = vmatprep.subr.bf16.mxu0 %v9467_v40  ;;  %v9515_v39 = vld [vmem:[#allocation2 + $0x1084] ss:$16 sps:$4 sm:$0xff]  }
 0x138   :  { %5233 = vmatprep.subr.bf16.mxu1 %v9470_v41  ;;  %v9518_v41 = vld [vmem:[#allocation2 + $0x1284] ss:$16 sps:$4 sm:$0xff]  }
 0x13a   :  { %5193 = vmatpush2.bf16.msra.mxu0 %v9465_v42 }
 0x13b   :  { %5234 = vmatpush2.bf16.msra.mxu1 %v9468_v45  ;;  %5194 = vmatprep.subr.bf16.mxu0 %v9473_v46  ;;  %v9513_v45 = vld [vmem:[#allocation2 + $0x1080] ss:$16 sps:$4 sm:$0xff]  }
 0x13c   :  { %5235 = vmatprep.subr.bf16.mxu1 %v9476_v52  ;;  %v9516_v46 = vld [vmem:[#allocation2 + $0x1280] ss:$16 sps:$4 sm:$0xff]   ;;  %v9521_v52 = vld [vmem:[#allocation2 + $0x1064] ss:$16 sps:$4 sm:$0xff]  }
 0x13e   :  { %5195 = vmatpush2.bf16.msra.mxu0 %v9471_v53  ;;  %v9524_v53 = vld [vmem:[#allocation2 + $0x1264] ss:$16 sps:$4 sm:$0xff]  }
 0x13f   :  { %5236 = vmatpush2.bf16.msra.mxu1 %v9474_v54  ;;  %5196 = vmatprep.subr.bf16.mxu0 %v9479_v57  ;;  %v9519_v54 = vld [vmem:[#allocation2 + $0x1060] ss:$16 sps:$4 sm:$0xff]  }
 0x140   :  { %5237 = vmatprep.subr.bf16.mxu1 %v9482_v31  ;;  %v9522_v57 = vld [vmem:[#allocation2 + $0x1260] ss:$16 sps:$4 sm:$0xff]   ;;  %v9527_v31 = vld [vmem:[#allocation2 + $0x1044] ss:$16 sps:$4 sm:$0xff]  }
 0x142   :  { %5197 = vmatpush2.bf16.msra.mxu0 %v9477_v59  ;;  %v9530_v59 = vld [vmem:[#allocation2 + $0x1244] ss:$16 sps:$4 sm:$0xff]  }
 0x143   :  { %5238 = vmatpush2.bf16.msra.mxu1 %v9480_v60  ;;  %5198 = vmatprep.subr.bf16.mxu0 %v9485_v61  ;;  %v9525_v60 = vld [vmem:[#allocation2 + $0x1040] ss:$16 sps:$4 sm:$0xff]  }
 0x144   :  { %5239 = vmatprep.subr.bf16.mxu1 %v9488_v62  ;;  %v9528_v61 = vld [vmem:[#allocation2 + $0x1240] ss:$16 sps:$4 sm:$0xff]   ;;  %v9533_v62 = vld [vmem:[#allocation2 + $0x1024] ss:$16 sps:$4 sm:$0xff]  }
 0x146   :  { %5199 = vmatpush2.bf16.msra.mxu0 %v9483_v63  ;;  %v9536_v63 = vld [vmem:[#allocation2 + $0x1224] ss:$16 sps:$4 sm:$0xff]  }
 0x147   :  { %5240 = vmatpush2.bf16.msra.mxu1 %v9486_v0  ;;  %5200 = vmatprep.subr.bf16.mxu0 %v9491_v1  ;;  %v9531_v0 = vld [vmem:[#allocation2 + $0x1020] ss:$16 sps:$4 sm:$0xff]  }
 0x148   :  { %5241 = vmatprep.subr.bf16.mxu1 %v9494_v2  ;;  %v9534_v1 = vld [vmem:[#allocation2 + $0x1220] ss:$16 sps:$4 sm:$0xff]   ;;  %v9539_v2 = vld [vmem:[#allocation2 + $0x1004] ss:$16 sps:$4 sm:$0xff]  }
 0x14a   :  { %5201 = vmatpush2.bf16.msra.mxu0 %v9489_v5  ;;  %v9540_v5 = vld [vmem:[#allocation2 + $0x1200] ss:$16 sps:$4 sm:$0xff]  }
 0x14b   :  { %5242 = vmatpush2.bf16.msra.mxu1 %v9492_v6  ;;  %5252 = vmatprep.subr.bf16.mxu0 %v9497_v7  ;;  %v9545_v6 = vld [vmem:[#allocation2 + $0x11e4] ss:$16 sps:$4 sm:$0xff]  }
 0x14c   :  { %5293 = vmatprep.subr.bf16.mxu1 %v9500_v8  ;;  %v9548_v7 = vld [vmem:[#allocation2 + $0x13e4] ss:$16 sps:$4 sm:$0xff]   ;;  %v9543_v8 = vld [vmem:[#allocation2 + $0x11e0] ss:$16 sps:$4 sm:$0xff]  }
 0x14d   :  { %v4958_v20 = vpop.f32.mrf.mxu0  ;;  %5203 = vmatmul.mubr.bf16.vlgmr.msra.gmra.mxu0 %v10942_v13 }
 0x14e   :  { %v4999_v21 = vpop.f32.mrf.mxu1  ;;  %5244 = vmatmul.mubr.bf16.vlgmr.msra.gmra.mxu1 %v10946_v14  ;;  %5253 = vmatpush1.bf16.msra.mxu0 %v9495_v15  ;;  %v9546_v15 = vld [vmem:[#allocation2 + $0x13e0] ss:$16 sps:$4 sm:$0xff]  }
 0x14f   :  { %v10958_v25 = vadd.f32 %v4999_v21, %v4958_v20  ;;  %5294 = vmatpush1.bf16.msra.mxu1 %v9498_v16  ;;  %v4960_v27 = vpop.f32.mrf.mxu0  ;;  %5254 = vmatprep.subr.bf16.mxu0 %v9503_v17  ;;  %v9551_v16 = vld [vmem:[#allocation2 + $0x11c4] ss:$16 sps:$4 sm:$0xff]   ;;  %v9552_v20 = vld [vmem:[#allocation2 + $0x13c0] ss:$16 sps:$4 sm:$0xff]  }
 0x150   :  { %v5001_v28 = vpop.f32.mrf.mxu1  ;;  %5295 = vmatprep.subr.bf16.mxu1 %v9506_v18  ;;  %5284 = vmatprep.mubr.bf16.mxu0 %v10950_v19  ;;  %v9554_v17 = vld [vmem:[#allocation2 + $0x13c4] ss:$16 sps:$4 sm:$0xff]   ;;  %v9549_v18 = vld [vmem:[#allocation2 + $0x11c0] ss:$16 sps:$4 sm:$0xff]  }
 0x151   :  { %v10960_v32 = vadd.f32 %v5001_v28, %v4960_v27  ;;  %5325 = vmatprep.mubr.bf16.mxu1 %v10954_v48  ;;  %v4962_v38 = vpop.f32.mrf.mxu0  ;;  %v9557_v21 = vld [vmem:[#allocation2 + $0x11a4] ss:$16 sps:$4 sm:$0xff]  }
 0x152   :  { %v5003_v33 = vpop.f32.mrf.mxu1  ;;  %5255 = vmatpush1.bf16.msra.mxu0 %v9501_v49  ;;  %v9560_v49 = vld [vmem:[#allocation2 + $0x13a4] ss:$16 sps:$4 sm:$0xff]   ;;  %v9567_v38 = vld [vmem:[#allocation2 + $0x1160] ss:$16 sps:$4 sm:$0xff]  }
 0x153   :  { %5296 = vmatpush1.bf16.msra.mxu1 %v9504_v24  ;;  %5256 = vmatprep.subr.bf16.mxu0 %v9509_v26  ;;  %v4963_v42 = vpop.f32.mrf.mxu0  ;;  %v9555_v24 = vld [vmem:[#allocation2 + $0x11a0] ss:$16 sps:$4 sm:$0xff]   ;;  %v9563_v27 = vld [vmem:[#allocation2 + $0x1184] ss:$16 sps:$4 sm:$0xff]  }
 0x154   :  { %v5004_v40 = vpop.f32.mrf.mxu1  ;;  %5297 = vmatprep.subr.bf16.mxu1 %v9512_v29  ;;  %v9558_v26 = vld [vmem:[#allocation2 + $0x13a0] ss:$16 sps:$4 sm:$0xff]   ;;  %v9566_v28 = vld [vmem:[#allocation2 + $0x1384] ss:$16 sps:$4 sm:$0xff]  }
 0x155   :  { %v9561_v29 = vld [vmem:[#allocation2 + $0x1180] ss:$16 sps:$4 sm:$0xff]   ;;  %v9575_v40 = vld [vmem:[#allocation2 + $0x1144] ss:$16 sps:$4 sm:$0xff]  }
 0x156   :  { %5257 = vmatpush1.bf16.msra.mxu0 %v9507_v36  ;;  %v9564_v33 = vld [vmem:[#allocation2 + $0x1380] ss:$16 sps:$4 sm:$0xff]   ;;  %v9569_v36 = vld [vmem:[#allocation2 + $0x1164] ss:$16 sps:$4 sm:$0xff]  }
 0x157   :  { %5298 = vmatpush1.bf16.msra.mxu1 %v9510_v37  ;;  %5258 = vmatprep.subr.bf16.mxu0 %v9515_v39  ;;  %v9572_v37 = vld [vmem:[#allocation2 + $0x1364] ss:$16 sps:$4 sm:$0xff]   ;;  %v9570_v39 = vld [vmem:[#allocation2 + $0x1360] ss:$16 sps:$4 sm:$0xff]  }
 0x158   :  { %5299 = vmatprep.subr.bf16.mxu1 %v9518_v41  ;;  %v9578_v41 = vld [vmem:[#allocation2 + $0x1344] ss:$16 sps:$4 sm:$0xff]   ;;  %v9573_v42 = vld [vmem:[#allocation2 + $0x1140] ss:$16 sps:$4 sm:$0xff]  }
 0x15a   :  { %5259 = vmatpush1.bf16.msra.mxu0 %v9513_v45  ;;  %v9576_v45 = vld [vmem:[#allocation2 + $0x1340] ss:$16 sps:$4 sm:$0xff]  }
 0x15b   :  { %5300 = vmatpush1.bf16.msra.mxu1 %v9516_v46  ;;  %5260 = vmatprep.subr.bf16.mxu0 %v9521_v52  ;;  %v9581_v46 = vld [vmem:[#allocation2 + $0x1124] ss:$16 sps:$4 sm:$0xff]  }
 0x15c   :  { %5301 = vmatprep.subr.bf16.mxu1 %v9524_v53  ;;  %v9584_v52 = vld [vmem:[#allocation2 + $0x1324] ss:$16 sps:$4 sm:$0xff]   ;;  %v9579_v53 = vld [vmem:[#allocation2 + $0x1120] ss:$16 sps:$4 sm:$0xff]  }
 0x15e   :  { %5261 = vmatpush1.bf16.msra.mxu0 %v9519_v54  ;;  %v9582_v54 = vld [vmem:[#allocation2 + $0x1320] ss:$16 sps:$4 sm:$0xff]  }
 0x15f   :  { %5302 = vmatpush1.bf16.msra.mxu1 %v9522_v57  ;;  %5262 = vmatprep.subr.bf16.mxu0 %v9527_v31  ;;  %v9587_v57 = vld [vmem:[#allocation2 + $0x1104] ss:$16 sps:$4 sm:$0xff]  }
 0x160   :  { %5303 = vmatprep.subr.bf16.mxu1 %v9530_v59  ;;  %v9590_v31 = vld [vmem:[#allocation2 + $0x1304] ss:$16 sps:$4 sm:$0xff]  }
 0x161   :  { %v113_v59 = vld [vmem:[%s11157_s0 + $0x50] sm:$0xff] }
 0x162   :  { %5263 = vmatpush1.bf16.msra.mxu0 %v9525_v60  ;;  %v114_v60 = vld [vmem:[%s11157_s0 + $0x58] sm:$0xff] }
 0x163   :  { %5304 = vmatpush1.bf16.msra.mxu1 %v9528_v61  ;;  %5264 = vmatprep.subr.bf16.mxu0 %v9533_v62  ;;  %v9585_v61 = vld [vmem:[#allocation2 + $0x1100] ss:$16 sps:$4 sm:$0xff]  }
 0x164   :  { %5305 = vmatprep.subr.bf16.mxu1 %v9536_v63  ;;  %v9588_v62 = vld [vmem:[#allocation2 + $0x1300] ss:$16 sps:$4 sm:$0xff]   ;;  %v9593_v63 = vld [vmem:[#allocation2 + $0x14e4] ss:$16 sps:$4 sm:$0xff]  }
 0x166   :  { %5265 = vmatpush1.bf16.msra.mxu0 %v9531_v0  ;;  %v9596_v0 = vld [vmem:[#allocation2 + $0x16e4] ss:$16 sps:$4 sm:$0xff]  }
 0x167   :  { %5306 = vmatpush1.bf16.msra.mxu1 %v9534_v1  ;;  %5266 = vmatprep.subr.bf16.mxu0 %v9539_v2  ;;  %v9591_v1 = vld [vmem:[#allocation2 + $0x14e0] ss:$16 sps:$4 sm:$0xff]  }
 0x168   :  { %5307 = vmatprep.subr.bf16.mxu1 %v9542_v3  ;;  %v9594_v2 = vld [vmem:[#allocation2 + $0x16e0] ss:$16 sps:$4 sm:$0xff]   ;;  %v10971_v3 = vmax.bf16 %v10763_v47, %v113_v59 }
 0x169   :  { %v9624_v59 = vld [vmem:[#allocation2 + $0x1640] ss:$16 sps:$4 sm:$0xff]  }
 0x16a   :  { %5267 = vmatpush1.bf16.msra.mxu0 %v9537_v4  ;;  %v10974_v4 = vmax.bf16 %v10763_v47, %v114_v60  ;;  %v9629_v60 = vld [vmem:[#allocation2 + $0x1424] ss:$16 sps:$4 sm:$0xff]  }
 0x16b   :  { %5308 = vmatpush1.bf16.msra.mxu1 %v9540_v5  ;;  %5268 = vmatprep.subr.bf16.mxu0 %v9545_v6  ;;  %v10978_v5 = vcombine.low %v10935_v11, %v10935_v11  ;;  %v10982_v6 = vcombine.low %v10938_v12, %v10938_v12 }
 0x16c   :  { %5309 = vmatprep.subr.bf16.mxu1 %v9548_v7  ;;  %v9599_v7 = vld [vmem:[#allocation2 + $0x14c4] ss:$16 sps:$4 sm:$0xff]   ;;  %v10990_v11 = vcombine.high %v10974_v4, %v10974_v4 }
 0x16e   :  { %5269 = vmatpush2.bf16.msra.mxu0 %v9543_v8  ;;  %v9602_v8 = vld [vmem:[#allocation2 + $0x16c4] ss:$16 sps:$4 sm:$0xff]  }
 0x16f   :  { %5310 = vmatpush2.bf16.msra.mxu1 %v9546_v15  ;;  %5270 = vmatprep.subr.bf16.mxu0 %v9551_v16  ;;  %v9597_v15 = vld [vmem:[#allocation2 + $0x14c0] ss:$16 sps:$4 sm:$0xff]  }
 0x170   :  { %5311 = vmatprep.subr.bf16.mxu1 %v9554_v17  ;;  %v9600_v16 = vld [vmem:[#allocation2 + $0x16c0] ss:$16 sps:$4 sm:$0xff]   ;;  %v10986_v17 = vcombine.high %v10971_v3, %v10971_v3 }
 0x172   :  { %5271 = vmatpush2.bf16.msra.mxu0 %v9549_v18 }
 0x173   :  { %5312 = vmatpush2.bf16.msra.mxu1 %v9552_v20  ;;  %5272 = vmatprep.subr.bf16.mxu0 %v9557_v21 }
 0x174   :  { %5313 = vmatprep.subr.bf16.mxu1 %v9560_v49 }
 0x176   :  { %5273 = vmatpush2.bf16.msra.mxu0 %v9555_v24  ;;  %v9605_v24 = vld [vmem:[#allocation2 + $0x14a4] ss:$16 sps:$4 sm:$0xff]  }
 0x177   :  { %5314 = vmatpush2.bf16.msra.mxu1 %v9558_v26  ;;  %5274 = vmatprep.subr.bf16.mxu0 %v9563_v27  ;;  %v9608_v26 = vld [vmem:[#allocation2 + $0x16a4] ss:$16 sps:$4 sm:$0xff]  }
 0x178   :  { %5315 = vmatprep.subr.bf16.mxu1 %v9566_v28 }
 0x17a   :  { %5275 = vmatpush2.bf16.msra.mxu0 %v9561_v29  ;;  %v9603_v29 = vld [vmem:[#allocation2 + $0x14a0] ss:$16 sps:$4 sm:$0xff]  }
 0x17b   :  { %5316 = vmatpush2.bf16.msra.mxu1 %v9564_v33  ;;  %5276 = vmatprep.subr.bf16.mxu0 %v9569_v36  ;;  %v9606_v33 = vld [vmem:[#allocation2 + $0x16a0] ss:$16 sps:$4 sm:$0xff]  }
 0x17c   :  { %5317 = vmatprep.subr.bf16.mxu1 %v9572_v37 }
 0x17e   :  { %5277 = vmatpush2.bf16.msra.mxu0 %v9567_v38 }
 0x17f   :  { %5318 = vmatpush2.bf16.msra.mxu1 %v9570_v39  ;;  %5278 = vmatprep.subr.bf16.mxu0 %v9575_v40  ;;  %v9611_v39 = vld [vmem:[#allocation2 + $0x1484] ss:$16 sps:$4 sm:$0xff]  }
 0x180   :  { %5319 = vmatprep.subr.bf16.mxu1 %v9578_v41  ;;  %v9614_v40 = vld [vmem:[#allocation2 + $0x1684] ss:$16 sps:$4 sm:$0xff]  }
 0x182   :  { %5279 = vmatpush2.bf16.msra.mxu0 %v9573_v42  ;;  %v9612_v42 = vld [vmem:[#allocation2 + $0x1680] ss:$16 sps:$4 sm:$0xff]  }
 0x183   :  { %5320 = vmatpush2.bf16.msra.mxu1 %v9576_v45  ;;  %5280 = vmatprep.subr.bf16.mxu0 %v9581_v46  ;;  %v9617_v45 = vld [vmem:[#allocation2 + $0x1464] ss:$16 sps:$4 sm:$0xff]  }
 0x184   :  { %5321 = vmatprep.subr.bf16.mxu1 %v9584_v52  ;;  %v9620_v46 = vld [vmem:[#allocation2 + $0x1664] ss:$16 sps:$4 sm:$0xff]   ;;  %v9615_v52 = vld [vmem:[#allocation2 + $0x1460] ss:$16 sps:$4 sm:$0xff]  }
 0x186   :  { %5281 = vmatpush2.bf16.msra.mxu0 %v9579_v53  ;;  %v9618_v53 = vld [vmem:[#allocation2 + $0x1660] ss:$16 sps:$4 sm:$0xff]  }
 0x187   :  { %5322 = vmatpush2.bf16.msra.mxu1 %v9582_v54  ;;  %5282 = vmatprep.subr.bf16.mxu0 %v9587_v57  ;;  %v9623_v54 = vld [vmem:[#allocation2 + $0x1444] ss:$16 sps:$4 sm:$0xff]  }
 0x188   :  { %5323 = vmatprep.subr.bf16.mxu1 %v9590_v31  ;;  %v9626_v57 = vld [vmem:[#allocation2 + $0x1644] ss:$16 sps:$4 sm:$0xff]   ;;  %v9621_v31 = vld [vmem:[#allocation2 + $0x1440] ss:$16 sps:$4 sm:$0xff]  }
 0x18a   :  { %5283 = vmatpush2.bf16.msra.mxu0 %v9585_v61  ;;  %v9632_v61 = vld [vmem:[#allocation2 + $0x1624] ss:$16 sps:$4 sm:$0xff]  }
 0x18b   :  { %5324 = vmatpush2.bf16.msra.mxu1 %v9588_v62  ;;  %5334 = vmatprep.subr.bf16.mxu0 %v9593_v63  ;;  %v9627_v62 = vld [vmem:[#allocation2 + $0x1420] ss:$16 sps:$4 sm:$0xff]  }
 0x18c   :  { %5375 = vmatprep.subr.bf16.mxu1 %v9596_v0  ;;  %v9630_v63 = vld [vmem:[#allocation2 + $0x1620] ss:$16 sps:$4 sm:$0xff]   ;;  %v9635_v0 = vld [vmem:[#allocation2 + $0x1404] ss:$16 sps:$4 sm:$0xff]  }
 0x18d   :  { %v5040_v18 = vpop.f32.mrf.mxu0  ;;  %5285 = vmatmul.mubr.bf16.vlgmr.msra.gmra.mxu0 %v10978_v5 }
 0x18e   :  { %v5081_v20 = vpop.f32.mrf.mxu1  ;;  %5326 = vmatmul.mubr.bf16.vlgmr.msra.gmra.mxu1 %v10982_v6  ;;  %v5041_v12 = vadd.f32 %v5040_v18, %v10958_v25  ;;  %5335 = vmatpush1.bf16.msra.mxu0 %v9591_v1  ;;  %v9638_v1 = vld [vmem:[#allocation2 + $0x1604] ss:$16 sps:$4 sm:$0xff]   ;;  %v9642_v18 = vld [vmem:[#allocation2 + $0x17e0] ss:$16 sps:$4 sm:$0xff]  }
 0x18f   :  { %5376 = vmatpush1.bf16.msra.mxu1 %v9594_v2  ;;  %v5042_v21 = vpop.f32.mrf.mxu0  ;;  %5336 = vmatprep.subr.bf16.mxu0 %v9599_v7  ;;  %v9633_v2 = vld [vmem:[#allocation2 + $0x1400] ss:$16 sps:$4 sm:$0xff]  }
 0x190   :  { %v5083_v49 = vpop.f32.mrf.mxu1  ;;  %5377 = vmatprep.subr.bf16.mxu1 %v9602_v8  ;;  %v10995_v27 = vadd.f32 %v5081_v20, %v5041_v12  ;;  %v5043_v28 = vadd.f32 %v5042_v21, %v10960_v32  ;;  %5366 = vmatprep.mubr.bf16.mxu0 %v10986_v17  ;;  %v9609_v32 = vld [vmem:[#allocation2 + $0x1480] ss:$16 sps:$4 sm:$0xff]   ;;  %v9641_v8 = vld [vmem:[#allocation2 + $0x15e4] ss:$16 sps:$4 sm:$0xff]  }
 0x191   :  { %5407 = vmatprep.mubr.bf16.mxu1 %v10990_v11  ;;  %v5044_v25 = vpop.f32.mrf.mxu0  ;;  %v9636_v7 = vld [vmem:[#allocation2 + $0x1600] ss:$16 sps:$4 sm:$0xff]   ;;  %v9647_v20 = vld [vmem:[#allocation2 + $0x15c4] ss:$16 sps:$4 sm:$0xff]  }
 0x192   :  { %v5085_v36 = vpop.f32.mrf.mxu1  ;;  %v11000_v37 = vadd.f32 %v5083_v49, %v5043_v28  ;;  %5337 = vmatpush1.bf16.msra.mxu0 %v9597_v15  ;;  %v9644_v15 = vld [vmem:[#allocation2 + $0x17e4] ss:$16 sps:$4 sm:$0xff]   ;;  %v9645_v21 = vld [vmem:[#allocation2 + $0x15c0] ss:$16 sps:$4 sm:$0xff]  }
 0x193   :  { %5378 = vmatpush1.bf16.msra.mxu1 %v9600_v16  ;;  %5338 = vmatprep.subr.bf16.mxu0 %v9605_v24  ;;  %v5045_v41 = vpop.f32.mrf.mxu0  ;;  %v9639_v16 = vld [vmem:[#allocation2 + $0x15e0] ss:$16 sps:$4 sm:$0xff]   ;;  %v9650_v12 = vld [vmem:[#allocation2 + $0x17c4] ss:$16 sps:$4 sm:$0xff]  }
 0x194   :  { %v5086_v38 = vpop.f32.mrf.mxu1  ;;  %5379 = vmatprep.subr.bf16.mxu1 %v9608_v26  ;;  %v9648_v49 = vld [vmem:[#allocation2 + $0x17c0] ss:$16 sps:$4 sm:$0xff]   ;;  %v9653_v24 = vld [vmem:[#allocation2 + $0x15a4] ss:$16 sps:$4 sm:$0xff]  }
 0x195   :  { %v9656_v26 = vld [vmem:[#allocation2 + $0x17a4] ss:$16 sps:$4 sm:$0xff]   ;;  %v9651_v28 = vld [vmem:[#allocation2 + $0x15a0] ss:$16 sps:$4 sm:$0xff]  }
 0x196   :  { %5339 = vmatpush1.bf16.msra.mxu0 %v9603_v29  ;;  %v9654_v29 = vld [vmem:[#allocation2 + $0x17a0] ss:$16 sps:$4 sm:$0xff]   ;;  %v9662_v36 = vld [vmem:[#allocation2 + $0x1784] ss:$16 sps:$4 sm:$0xff]  }
 0x197   :  { %5380 = vmatpush1.bf16.msra.mxu1 %v9606_v33  ;;  %5340 = vmatprep.subr.bf16.mxu0 %v9611_v39  ;;  %v9659_v33 = vld [vmem:[#allocation2 + $0x1584] ss:$16 sps:$4 sm:$0xff]   ;;  %v9657_v25 = vld [vmem:[#allocation2 + $0x1580] ss:$16 sps:$4 sm:$0xff]  }
 0x198   :  { %5381 = vmatprep.subr.bf16.mxu1 %v9614_v40  ;;  %v9660_v38 = vld [vmem:[#allocation2 + $0x1780] ss:$16 sps:$4 sm:$0xff]   ;;  %v9665_v39 = vld [vmem:[#allocation2 + $0x1564] ss:$16 sps:$4 sm:$0xff]  }
 0x199   :  { %v9668_v40 = vld [vmem:[#allocation2 + $0x1764] ss:$16 sps:$4 sm:$0xff]   ;;  %v9663_v41 = vld [vmem:[#allocation2 + $0x1560] ss:$16 sps:$4 sm:$0xff]  }
 0x19a   :  { %5341 = vmatpush1.bf16.msra.mxu0 %v9609_v32  ;;  %v9666_v32 = vld [vmem:[#allocation2 + $0x1760] ss:$16 sps:$4 sm:$0xff]  }
 0x19b   :  { %5382 = vmatpush1.bf16.msra.mxu1 %v9612_v42  ;;  %5342 = vmatprep.subr.bf16.mxu0 %v9617_v45  ;;  %v9671_v42 = vld [vmem:[#allocation2 + $0x1544] ss:$16 sps:$4 sm:$0xff]  }
 0x19c   :  { %5383 = vmatprep.subr.bf16.mxu1 %v9620_v46  ;;  %v9674_v45 = vld [vmem:[#allocation2 + $0x1744] ss:$16 sps:$4 sm:$0xff]   ;;  %v9669_v46 = vld [vmem:[#allocation2 + $0x1540] ss:$16 sps:$4 sm:$0xff]  }
 0x19e   :  { %5343 = vmatpush1.bf16.msra.mxu0 %v9615_v52  ;;  %v9672_v52 = vld [vmem:[#allocation2 + $0x1740] ss:$16 sps:$4 sm:$0xff]  }
 0x19f   :  { %5384 = vmatpush1.bf16.msra.mxu1 %v9618_v53  ;;  %5344 = vmatprep.subr.bf16.mxu0 %v9623_v54  ;;  %v9677_v53 = vld [vmem:[#allocation2 + $0x1524] ss:$16 sps:$4 sm:$0xff]  }
 0x1a0   :  { %5385 = vmatprep.subr.bf16.mxu1 %v9626_v57  ;;  %v9680_v54 = vld [vmem:[#allocation2 + $0x1724] ss:$16 sps:$4 sm:$0xff]   ;;  %v9675_v57 = vld [vmem:[#allocation2 + $0x1520] ss:$16 sps:$4 sm:$0xff]  }
 0x1a2   :  { %5345 = vmatpush1.bf16.msra.mxu0 %v9621_v31  ;;  %v9678_v31 = vld [vmem:[#allocation2 + $0x1720] ss:$16 sps:$4 sm:$0xff]  }
 0x1a3   :  { %5386 = vmatpush1.bf16.msra.mxu1 %v9624_v59  ;;  %5346 = vmatprep.subr.bf16.mxu0 %v9629_v60  ;;  %v9683_v59 = vld [vmem:[#allocation2 + $0x1504] ss:$16 sps:$4 sm:$0xff]  }
 0x1a4   :  { %5387 = vmatprep.subr.bf16.mxu1 %v9632_v61  ;;  %v9686_v60 = vld [vmem:[#allocation2 + $0x1704] ss:$16 sps:$4 sm:$0xff]   ;;  %v9681_v61 = vld [vmem:[#allocation2 + $0x1500] ss:$16 sps:$4 sm:$0xff]  }
 0x1a6   :  { %5347 = vmatpush1.bf16.msra.mxu0 %v9627_v62  ;;  %v9684_v62 = vld [vmem:[#allocation2 + $0x1700] ss:$16 sps:$4 sm:$0xff]  }
 0x1a7   :  { %5388 = vmatpush1.bf16.msra.mxu1 %v9630_v63  ;;  %5348 = vmatprep.subr.bf16.mxu0 %v9635_v0  ;;  %v9689_v63 = vld [vmem:[#allocation2 + $0x1864] ss:$16 sps:$4 sm:$0xff]   ;;  %v9692_v0 = vld [vmem:[#allocation2 + $0x2ec] ss:$16 sps:$4 sm:$0xff]  }
 0x1a8   :  { %5389 = vmatprep.subr.bf16.mxu1 %v9638_v1  ;;  %v9687_v1 = vld [vmem:[#allocation2 + $0x1860] ss:$16 sps:$4 sm:$0xff]  }
 0x1aa   :  { %5349 = vmatpush1.bf16.msra.mxu0 %v9633_v2  ;;  %v9690_v2 = vld [vmem:[#allocation2 + $0x2e8] ss:$16 sps:$4 sm:$0xff]  }
 0x1ab   :  { %5390 = vmatpush1.bf16.msra.mxu1 %v9636_v7  ;;  %5350 = vmatprep.subr.bf16.mxu0 %v9641_v8  ;;  %v11004_v7 = vcombine.low %v10971_v3, %v10971_v3  ;;  %v11008_v8 = vcombine.low %v10974_v4, %v10974_v4 }
 0x1ac   :  { %5391 = vmatprep.subr.bf16.mxu1 %v9644_v15  ;;  %v9695_v15 = vld [vmem:[#allocation2 + $0x1844] ss:$16 sps:$4 sm:$0xff]  }
 0x1ae   :  { %5351 = vmatpush2.bf16.msra.mxu0 %v9639_v16  ;;  %v9698_v16 = vld [vmem:[#allocation2 + $0x2cc] ss:$16 sps:$4 sm:$0xff]  }
 0x1af   :  { %5392 = vmatpush2.bf16.msra.mxu1 %v9642_v18  ;;  %5352 = vmatprep.subr.bf16.mxu0 %v9647_v20  ;;  %v9693_v18 = vld [vmem:[#allocation2 + $0x1840] ss:$16 sps:$4 sm:$0xff]   ;;  %v9696_v20 = vld [vmem:[#allocation2 + $0x2c8] ss:$16 sps:$4 sm:$0xff]  }
 0x1b0   :  { %5393 = vmatprep.subr.bf16.mxu1 %v9650_v12 }
 0x1b2   :  { %5353 = vmatpush2.bf16.msra.mxu0 %v9645_v21 }
 0x1b3   :  { %5394 = vmatpush2.bf16.msra.mxu1 %v9648_v49  ;;  %5354 = vmatprep.subr.bf16.mxu0 %v9653_v24  ;;  %v9701_v24 = vld [vmem:[#allocation2 + $0x1824] ss:$16 sps:$4 sm:$0xff]  }
 0x1b4   :  { %5395 = vmatprep.subr.bf16.mxu1 %v9656_v26  ;;  %v9704_v26 = vld [vmem:[#allocation2 + $0x2ac] ss:$16 sps:$4 sm:$0xff]  }
 0x1b6   :  { %5355 = vmatpush2.bf16.msra.mxu0 %v9651_v28 }
 0x1b7   :  { %5396 = vmatpush2.bf16.msra.mxu1 %v9654_v29  ;;  %5356 = vmatprep.subr.bf16.mxu0 %v9659_v33  ;;  %v9699_v33 = vld [vmem:[#allocation2 + $0x1820] ss:$16 sps:$4 sm:$0xff]  }
 0x1b8   :  { %5397 = vmatprep.subr.bf16.mxu1 %v9662_v36  ;;  %v9702_v36 = vld [vmem:[#allocation2 + $0x2a8] ss:$16 sps:$4 sm:$0xff]  }
 0x1ba   :  { %5357 = vmatpush2.bf16.msra.mxu0 %v9657_v25 }
 0x1bb   :  { %5398 = vmatpush2.bf16.msra.mxu1 %v9660_v38  ;;  %5358 = vmatprep.subr.bf16.mxu0 %v9665_v39 }
 0x1bc   :  { %5399 = vmatprep.subr.bf16.mxu1 %v9668_v40 }
 0x1be   :  { %5359 = vmatpush2.bf16.msra.mxu0 %v9663_v41  ;;  %v9710_v41 = vld [vmem:[#allocation2 + $0x28c] ss:$16 sps:$4 sm:$0xff]  }
 0x1bf   :  { %5400 = vmatpush2.bf16.msra.mxu1 %v9666_v32  ;;  %5360 = vmatprep.subr.bf16.mxu0 %v9671_v42 }
 0x1c0   :  { %5401 = vmatprep.subr.bf16.mxu1 %v9674_v45  ;;  %v9705_v45 = vld [vmem:[#allocation2 + $0x1800] ss:$16 sps:$4 sm:$0xff]  }
 0x1c2   :  { %5361 = vmatpush2.bf16.msra.mxu0 %v9669_v46  ;;  %v9708_v46 = vld [vmem:[#allocation2 + $0x288] ss:$16 sps:$4 sm:$0xff]  }
 0x1c3   :  { %5402 = vmatpush2.bf16.msra.mxu1 %v9672_v52  ;;  %5362 = vmatprep.subr.bf16.mxu0 %v9677_v53  ;;  %v9716_v52 = vld [vmem:[#allocation2 + $0x26c] ss:$16 sps:$4 sm:$0xff]   ;;  %v9711_v53 = vld [vmem:[#allocation2 + $0xe8] ss:$16 sps:$4 sm:$0xff]  }
 0x1c4   :  { %5403 = vmatprep.subr.bf16.mxu1 %v9680_v54  ;;  %v9714_v54 = vld [vmem:[#allocation2 + $0x268] ss:$16 sps:$4 sm:$0xff]  }
 0x1c6   :  { %5363 = vmatpush2.bf16.msra.mxu0 %v9675_v57 }
 0x1c7   :  { %5404 = vmatpush2.bf16.msra.mxu1 %v9678_v31  ;;  %5364 = vmatprep.subr.bf16.mxu0 %v9683_v59  ;;  %v9719_v31 = vld [vmem:[#allocation2 + $0xcc] ss:$16 sps:$4 sm:$0xff]  }
 0x1c8   :  { %5405 = vmatprep.subr.bf16.mxu1 %v9686_v60  ;;  %v9722_v59 = vld [vmem:[#allocation2 + $0x24c] ss:$16 sps:$4 sm:$0xff]   ;;  %v9717_v60 = vld [vmem:[#allocation2 + $0xc8] ss:$16 sps:$4 sm:$0xff]  }
 0x1ca   :  { %5365 = vmatpush2.bf16.msra.mxu0 %v9681_v61  ;;  %v9720_v61 = vld [vmem:[#allocation2 + $0x248] ss:$16 sps:$4 sm:$0xff]  }
 0x1cb   :  { %5406 = vmatpush2.bf16.msra.mxu1 %v9684_v62  ;;  %5498 = vmatprep.subr.bf16.mxu0 %v9692_v0  ;;  %v9725_v62 = vld [vmem:[#allocation2 + $0xac] ss:$16 sps:$4 sm:$0xff]   ;;  %v9723_v0 = vld [vmem:[#allocation2 + $0xa8] ss:$16 sps:$4 sm:$0xff]  }
 0x1cc   :  { %5424 = vmatprep.subr.bf16.mxu1 %v9689_v63  ;;  %v9728_v63 = vld [vmem:[#allocation2 + $0x22c] ss:$16 sps:$4 sm:$0xff]  }
 0x1cd   :  { %v5122_v12 = vpop.f32.mrf.mxu0  ;;  %5367 = vmatmul.mubr.bf16.vlgmr.msra.gmra.mxu0 %v11004_v7 }
 0x1ce   :  { %v5163_v21 = vpop.f32.mrf.mxu1  ;;  %5408 = vmatmul.mubr.bf16.vlgmr.msra.gmra.mxu1 %v11008_v8  ;;  %v5123_v3 = vadd.f32 %v5122_v12, %v10995_v27  ;;  %5499 = vmatpush1.bf16.msra.mxu0 %v9690_v2  ;;  %v115_v27 = vld [vmem:[%s11157_s0 + $0x60] sm:$0xf]  ;;  %v9731_v2 = vld [vmem:[#allocation2 + $0x8c] ss:$16 sps:$4 sm:$0xff]  }
 0x1cf   :  { %5425 = vmatpush1.bf16.msra.mxu1 %v9687_v1  ;;  %v5124_v4 = vpop.f32.mrf.mxu0  ;;  %5500 = vmatprep.subr.bf16.mxu0 %v9698_v16  ;;  %v128_v42 = vmax.bf16 %v10763_v47, %v115_v27  ;;  %v9726_v1 = vld [vmem:[#allocation2 + $0x228] ss:$16 sps:$4 sm:$0xff]   ;;  %v9740_v12 = vld [vmem:[#allocation2 + $0x3ec] ss:$16 sps:$4 sm:$0xff]  }
 0x1d0   :  { %v5165_v49 = vpop.f32.mrf.mxu1  ;;  %5426 = vmatprep.subr.bf16.mxu1 %v9695_v15  ;;  %v11013_v28 = vadd.f32 %v5163_v21, %v5123_v3  ;;  %v5125_v29 = vadd.f32 %v5124_v4, %v11000_v37  ;;  %5448 = vmatprep.mubr.bf16.mxu1 %v10763_v47  ;;  %v9707_v37 = vld [vmem:[#allocation2 + $0x1804] ss:$16 sps:$4 sm:$0xff]   ;;  %v9734_v15 = vld [vmem:[#allocation2 + $0x20c] ss:$16 sps:$4 sm:$0xff]   ;;  %v9729_v16 = vld [vmem:[#allocation2 + $0x88] ss:$16 sps:$4 sm:$0xff]  }
 0x1d1   :  { %5530 = vmatprep.mubr.bf16.mxu0 %v10832_v56  ;;  %v5126_v38 = vpop.f32.mrf.mxu0  ;;  %v9713_v56 = vld [vmem:[#allocation2 + $0xec] ss:$16 sps:$4 sm:$0xff]   ;;  %v11024_v57 = vcombine.low %v128_v42, %v128_v42  ;;  %v9735_v21 = vld [vmem:[#allocation2 + $0x68] ss:$16 sps:$4 sm:$0xff]  }
 0x1d2   :  { %v5167_v25 = vpop.f32.mrf.mxu1  ;;  %v11021_v39 = vadd.f32 %v5165_v49, %v5125_v29  ;;  %5501 = vmatpush1.bf16.msra.mxu0 %v9696_v20  ;;  %v9737_v20 = vld [vmem:[#allocation2 + $0x6c] ss:$16 sps:$4 sm:$0xff]   ;;  %v9741_v49 = vld [vmem:[#allocation2 + $0x48] ss:$16 sps:$4 sm:$0xff]  }
 0x1d3   :  { %5427 = vmatpush1.bf16.msra.mxu1 %v9693_v18  ;;  %5502 = vmatprep.subr.bf16.mxu0 %v9704_v26  ;;  %v5127_v32 = vpop.f32.mrf.mxu0  ;;  %v9732_v18 = vld [vmem:[#allocation2 + $0x208] ss:$16 sps:$4 sm:$0xff]   ;;  %v9743_v3 = vld [vmem:[#allocation2 + $0x4c] ss:$16 sps:$4 sm:$0xff]  }
 0x1d4   :  { %v5168_v40 = vpop.f32.mrf.mxu1  ;;  %5428 = vmatprep.subr.bf16.mxu1 %v9701_v24  ;;  %v9746_v4 = vld [vmem:[#allocation2 + $0x3cc] ss:$16 sps:$4 sm:$0xff]   ;;  %v9744_v24 = vld [vmem:[#allocation2 + $0x3c8] ss:$16 sps:$4 sm:$0xff]  }
 0x1d5   :  { %v9749_v26 = vld [vmem:[#allocation2 + $0x2c] ss:$16 sps:$4 sm:$0xff]   ;;  %v9753_v38 = vld [vmem:[#allocation2 + $0x8] ss:$16 sps:$4 sm:$0xff]  }
 0x1d6   :  { %5503 = vmatpush1.bf16.msra.mxu0 %v9702_v36  ;;  %v9752_v29 = vld [vmem:[#allocation2 + $0x3ac] ss:$16 sps:$4 sm:$0xff]   ;;  %v9750_v36 = vld [vmem:[#allocation2 + $0x3a8] ss:$16 sps:$4 sm:$0xff]  }
 0x1d7   :  { %5429 = vmatpush1.bf16.msra.mxu1 %v9699_v33  ;;  %5504 = vmatprep.subr.bf16.mxu0 %v9710_v41  ;;  %v9747_v33 = vld [vmem:[#allocation2 + $0x28] ss:$16 sps:$4 sm:$0xff]   ;;  %v9755_v27 = vld [vmem:[#allocation2 + $0xc] ss:$16 sps:$4 sm:$0xff]  }
 0x1d8   :  { %5430 = vmatprep.subr.bf16.mxu1 %v9707_v37  ;;  %v9758_v25 = vld [vmem:[#allocation2 + $0x38c] ss:$16 sps:$4 sm:$0xff]   ;;  %v9756_v40 = vld [vmem:[#allocation2 + $0x388] ss:$16 sps:$4 sm:$0xff]  }
 0x1d9   :  { %v9761_v37 = vld [vmem:[#allocation2 + $0x1ec] ss:$16 sps:$4 sm:$0xff]   ;;  %v9759_v32 = vld [vmem:[#allocation2 + $0x1e8] ss:$16 sps:$4 sm:$0xff]  }
 0x1da   :  { %5505 = vmatpush1.bf16.msra.mxu0 %v9708_v46  ;;  %v9764_v41 = vld [vmem:[#allocation2 + $0x36c] ss:$16 sps:$4 sm:$0xff]   ;;  %v9762_v42 = vld [vmem:[#allocation2 + $0x368] ss:$16 sps:$4 sm:$0xff]  }
 0x1db   :  { %5431 = vmatpush1.bf16.msra.mxu1 %v9705_v45  ;;  %5506 = vmatprep.subr.bf16.mxu0 %v9716_v52  ;;  %v9767_v45 = vld [vmem:[#allocation2 + $0x1cc] ss:$16 sps:$4 sm:$0xff]   ;;  %v9768_v52 = vld [vmem:[#allocation2 + $0x348] ss:$16 sps:$4 sm:$0xff]  }
 0x1dc   :  { %5457 = vmatprep.subr.bf16.mxu1 %v9713_v56  ;;  %v9770_v46 = vld [vmem:[#allocation2 + $0x34c] ss:$16 sps:$4 sm:$0xff]   ;;  %v9765_v56 = vld [vmem:[#allocation2 + $0x1c8] ss:$16 sps:$4 sm:$0xff]  }
 0x1de   :  { %8789 = vmatmul.mubr.msk.bf16.vlgmr.msra.gmra.mxu1 %vm4920_vm0, %v11024_v57  ;;  %5507 = vmatpush1.bf16.msra.mxu0 %v9714_v54  ;;  %v9776_v54 = vld [vmem:[#allocation2 + $0x32c] ss:$16 sps:$4 sm:$0xff]  }
 0x1df   :  { %5458 = vmatpush1.bf16.msra.mxu1 %v9711_v53  ;;  %5508 = vmatprep.subr.bf16.mxu0 %v9722_v59  ;;  %v9773_v53 = vld [vmem:[#allocation2 + $0x1ac] ss:$16 sps:$4 sm:$0xff]   ;;  %v9774_v59 = vld [vmem:[#allocation2 + $0x328] ss:$16 sps:$4 sm:$0xff]  }
 0x1e0   :  { %5459 = vmatprep.subr.bf16.mxu1 %v9719_v31  ;;  %5489 = vmatprep.mubr.bf16.mxu1 %v10830_v55  ;;  %v9738_v55 = vld [vmem:[#allocation2 + $0x3e8] ss:$16 sps:$4 sm:$0xff]  }
 0x1e1   :  { %v9771_v31 = vld [vmem:[#allocation2 + $0x1a8] ss:$16 sps:$4 sm:$0xff]  }
 0x1e2   :  { %5509 = vmatpush1.bf16.msra.mxu0 %v9720_v61  ;;  %v9782_v61 = vld [vmem:[#allocation2 + $0x30c] ss:$16 sps:$4 sm:$0xff]  }
 0x1e3   :  { %5460 = vmatpush1.bf16.msra.mxu1 %v9717_v60  ;;  %5510 = vmatprep.subr.bf16.mxu0 %v9728_v63  ;;  %v9779_v60 = vld [vmem:[#allocation2 + $0x18c] ss:$16 sps:$4 sm:$0xff]   ;;  %v9780_v63 = vld [vmem:[#allocation2 + $0x308] ss:$16 sps:$4 sm:$0xff]  }
 0x1e4   :  { %5461 = vmatprep.subr.bf16.mxu1 %v9725_v62  ;;  %v9777_v62 = vld [vmem:[#allocation2 + $0x188] ss:$16 sps:$4 sm:$0xff]  }
 0x1e6   :  { %5511 = vmatpush1.bf16.msra.mxu0 %v9726_v1  ;;  %v9788_v1 = vld [vmem:[#allocation2 + $0x6ec] ss:$16 sps:$4 sm:$0xff]  }
 0x1e7   :  { %5462 = vmatpush1.bf16.msra.mxu1 %v9723_v0  ;;  %5512 = vmatprep.subr.bf16.mxu0 %v9734_v15  ;;  %v9785_v0 = vld [vmem:[#allocation2 + $0x16c] ss:$16 sps:$4 sm:$0xff]   ;;  %v9786_v15 = vld [vmem:[#allocation2 + $0x6e8] ss:$16 sps:$4 sm:$0xff]  }
 0x1e8   :  { %5463 = vmatprep.subr.bf16.mxu1 %v9731_v2  ;;  %v9783_v2 = vld [vmem:[#allocation2 + $0x168] ss:$16 sps:$4 sm:$0xff]  }
 0x1ea   :  { %5513 = vmatpush1.bf16.msra.mxu0 %v9732_v18  ;;  %v9794_v18 = vld [vmem:[#allocation2 + $0x6cc] ss:$16 sps:$4 sm:$0xff]  }
 0x1eb   :  { %5464 = vmatpush1.bf16.msra.mxu1 %v9729_v16  ;;  %5514 = vmatprep.subr.bf16.mxu0 %v9740_v12  ;;  %v9791_v16 = vld [vmem:[#allocation2 + $0x14c] ss:$16 sps:$4 sm:$0xff]   ;;  %v9792_v12 = vld [vmem:[#allocation2 + $0x6c8] ss:$16 sps:$4 sm:$0xff]  }
 0x1ec   :  { %5465 = vmatprep.subr.bf16.mxu1 %v9737_v20  ;;  %v9789_v20 = vld [vmem:[#allocation2 + $0x148] ss:$16 sps:$4 sm:$0xff]  }
 0x1ee   :  { %5515 = vmatpush2.bf16.msra.mxu0 %v9738_v55 }
 0x1ef   :  { %5466 = vmatpush1.bf16.msra.mxu1 %v9735_v21  ;;  %5516 = vmatprep.subr.bf16.mxu0 %v9746_v4 }
 0x1f0   :  { %5467 = vmatprep.subr.bf16.mxu1 %v9743_v3 }
 0x1f2   :  { %5517 = vmatpush2.bf16.msra.mxu0 %v9744_v24  ;;  %v9797_v24 = vld [vmem:[#allocation2 + $0x12c] ss:$16 sps:$4 sm:$0xff]  }
 0x1f3   :  { %5468 = vmatpush1.bf16.msra.mxu1 %v9741_v49  ;;  %5518 = vmatprep.subr.bf16.mxu0 %v9752_v29 }
 0x1f4   :  { %5469 = vmatprep.subr.bf16.mxu1 %v9749_v26  ;;  %v9800_v26 = vld [vmem:[#allocation2 + $0x6ac] ss:$16 sps:$4 sm:$0xff]  }
 0x1f6   :  { %5519 = vmatpush2.bf16.msra.mxu0 %v9750_v36  ;;  %v9795_v36 = vld [vmem:[#allocation2 + $0x128] ss:$16 sps:$4 sm:$0xff]  }
 0x1f7   :  { %5470 = vmatpush1.bf16.msra.mxu1 %v9747_v33  ;;  %5520 = vmatprep.subr.bf16.mxu0 %v9758_v25 }
 0x1f8   :  { %5471 = vmatprep.subr.bf16.mxu1 %v9755_v27  ;;  %v9798_v27 = vld [vmem:[#allocation2 + $0x6a8] ss:$16 sps:$4 sm:$0xff]  }
 0x1fa   :  { %5521 = vmatpush2.bf16.msra.mxu0 %v9756_v40  ;;  %v9803_v40 = vld [vmem:[#allocation2 + $0x10c] ss:$16 sps:$4 sm:$0xff]  }
 0x1fb   :  { %5472 = vmatpush1.bf16.msra.mxu1 %v9753_v38  ;;  %5522 = vmatprep.subr.bf16.mxu0 %v9764_v41 }
 0x1fc   :  { %5473 = vmatprep.subr.bf16.mxu1 %v9761_v37  ;;  %v9806_v37 = vld [vmem:[#allocation2 + $0x68c] ss:$16 sps:$4 sm:$0xff]  }
 0x1fe   :  { %5523 = vmatpush2.bf16.msra.mxu0 %v9762_v42  ;;  %v9809_v42 = vld [vmem:[#allocation2 + $0x4ec] ss:$16 sps:$4 sm:$0xff]  }
 0x1ff   :  { %5474 = vmatpush2.bf16.msra.mxu1 %v9759_v32  ;;  %5524 = vmatprep.subr.bf16.mxu0 %v9770_v46  ;;  %v9801_v32 = vld [vmem:[#allocation2 + $0x108] ss:$16 sps:$4 sm:$0xff]  }
 0x200   :  { %5475 = vmatprep.subr.bf16.mxu1 %v9767_v45  ;;  %v9807_v45 = vld [vmem:[#allocation2 + $0x4e8] ss:$16 sps:$4 sm:$0xff]  }
 0x201   :  { %v9810_v46 = vld [vmem:[#allocation2 + $0x668] ss:$16 sps:$4 sm:$0xff]  }
 0x202   :  { %5525 = vmatpush2.bf16.msra.mxu0 %v9768_v52  ;;  %v9818_v52 = vld [vmem:[#allocation2 + $0x64c] ss:$16 sps:$4 sm:$0xff]  }
 0x203   :  { %5476 = vmatpush2.bf16.msra.mxu1 %v9765_v56  ;;  %5526 = vmatprep.subr.bf16.mxu0 %v9776_v54  ;;  %v9815_v56 = vld [vmem:[#allocation2 + $0x4cc] ss:$16 sps:$4 sm:$0xff]   ;;  %v9816_v54 = vld [vmem:[#allocation2 + $0x648] ss:$16 sps:$4 sm:$0xff]  }
 0x204   :  { %5477 = vmatprep.subr.bf16.mxu1 %v9773_v53  ;;  %v9813_v53 = vld [vmem:[#allocation2 + $0x4c8] ss:$16 sps:$4 sm:$0xff]  }
 0x206   :  { %5527 = vmatpush2.bf16.msra.mxu0 %v9774_v59  ;;  %v9824_v59 = vld [vmem:[#allocation2 + $0x62c] ss:$16 sps:$4 sm:$0xff]  }
 0x207   :  { %5478 = vmatpush2.bf16.msra.mxu1 %v9771_v31  ;;  %5528 = vmatprep.subr.bf16.mxu0 %v9782_v61  ;;  %v9821_v31 = vld [vmem:[#allocation2 + $0x4ac] ss:$16 sps:$4 sm:$0xff]   ;;  %v9822_v61 = vld [vmem:[#allocation2 + $0x628] ss:$16 sps:$4 sm:$0xff]  }
 0x208   :  { %5479 = vmatprep.subr.bf16.mxu1 %v9779_v60  ;;  %v9819_v60 = vld [vmem:[#allocation2 + $0x4a8] ss:$16 sps:$4 sm:$0xff]  }
 0x20a   :  { %5529 = vmatpush2.bf16.msra.mxu0 %v9780_v63  ;;  %v9830_v63 = vld [vmem:[#allocation2 + $0x60c] ss:$16 sps:$4 sm:$0xff]  }
 0x20b   :  { %5480 = vmatpush2.bf16.msra.mxu1 %v9777_v62  ;;  %5580 = vmatprep.subr.bf16.mxu0 %v9788_v1  ;;  %v9827_v62 = vld [vmem:[#allocation2 + $0x48c] ss:$16 sps:$4 sm:$0xff]  }
 0x20c   :  { %5481 = vmatprep.subr.bf16.mxu1 %v9785_v0  ;;  %v9828_v0 = vld [vmem:[#allocation2 + $0x608] ss:$16 sps:$4 sm:$0xff]   ;;  %v9833_v1 = vld [vmem:[#allocation2 + $0x46c] ss:$16 sps:$4 sm:$0xff]  }
 0x20d   :  { %v5204_v21 = vpop.f32.mrf.mxu0  ;;  %5531 = vmatmul.mubr.bf16.vlgmr.msra.gmra.mxu0 %v10838_v10 }
 0x20e   :  { %v5245_v55 = vpop.f32.mrf.mxu1  ;;  %v5205_v3 = vadd.f32 %v5204_v21, %v11013_v28  ;;  %5581 = vmatpush1.bf16.msra.mxu0 %v9786_v15  ;;  %5612 = vmatprep.mubr.bf16.mxu0 %v10860_v44  ;;  %v9812_v44 = vld [vmem:[#allocation2 + $0x66c] ss:$16 sps:$4 sm:$0xff]   ;;  %v9831_v15 = vld [vmem:[#allocation2 + $0x468] ss:$16 sps:$4 sm:$0xff]  }
 0x20f   :  { %5482 = vmatpush2.bf16.msra.mxu1 %v9783_v2  ;;  %v5206_v4 = vpop.f32.mrf.mxu0  ;;  %5582 = vmatprep.subr.bf16.mxu0 %v9794_v18  ;;  %v9836_v2 = vld [vmem:[#allocation2 + $0x7ec] ss:$16 sps:$4 sm:$0xff]  }
 0x210   :  { %v5247_v49 = vpop.f32.mrf.mxu1  ;;  %5483 = vmatprep.subr.bf16.mxu1 %v9791_v16  ;;  %v11031_v29 = vadd.f32 %v5245_v55, %v5205_v3  ;;  %v5207_v33 = vadd.f32 %v5206_v4, %v11021_v39  ;;  %v9804_v39 = vld [vmem:[#allocation2 + $0x688] ss:$16 sps:$4 sm:$0xff]   ;;  %v9842_v18 = vld [vmem:[#allocation2 + $0x7cc] ss:$16 sps:$4 sm:$0xff]  }
 0x211   :  { %v5208_v10 = vpop.f32.mrf.mxu0  ;;  %v9834_v16 = vld [vmem:[#allocation2 + $0x7e8] ss:$16 sps:$4 sm:$0xff]   ;;  %v9845_v21 = vld [vmem:[#allocation2 + $0x42c] ss:$16 sps:$4 sm:$0xff]  }
 0x212   :  { %v5249_v25 = vpop.f32.mrf.mxu1  ;;  %v11035_v38 = vadd.f32 %v5247_v49, %v5207_v33  ;;  %5583 = vmatpush1.bf16.msra.mxu0 %v9792_v12  ;;  %v9840_v12 = vld [vmem:[#allocation2 + $0x7c8] ss:$16 sps:$4 sm:$0xff]   ;;  %v9848_v55 = vld [vmem:[#allocation2 + $0x7ac] ss:$16 sps:$4 sm:$0xff]  }
 0x213   :  { %5484 = vmatpush2.bf16.msra.mxu1 %v9789_v20  ;;  %5584 = vmatprep.subr.bf16.mxu0 %v9800_v26  ;;  %v5209_v41 = vpop.f32.mrf.mxu0  ;;  %v9837_v20 = vld [vmem:[#allocation2 + $0x448] ss:$16 sps:$4 sm:$0xff]   ;;  %v9851_v49 = vld [vmem:[#allocation2 + $0x40c] ss:$16 sps:$4 sm:$0xff]  }
 0x214   :  { %v5250_v28 = vpop.f32.mrf.mxu1  ;;  %5485 = vmatprep.subr.bf16.mxu1 %v9797_v24  ;;  %v9843_v3 = vld [vmem:[#allocation2 + $0x428] ss:$16 sps:$4 sm:$0xff]   ;;  %v9854_v24 = vld [vmem:[#allocation2 + $0x78c] ss:$16 sps:$4 sm:$0xff]  }
 0x215   :  { %v9846_v4 = vld [vmem:[#allocation2 + $0x7a8] ss:$16 sps:$4 sm:$0xff]   ;;  %v9863_v28 = vld [vmem:[#allocation2 + $0x5cc] ss:$16 sps:$4 sm:$0xff]  }
 0x216   :  { %5585 = vmatpush1.bf16.msra.mxu0 %v9798_v27  ;;  %v9849_v26 = vld [vmem:[#allocation2 + $0x408] ss:$16 sps:$4 sm:$0xff]   ;;  %v9860_v27 = vld [vmem:[#allocation2 + $0x76c] ss:$16 sps:$4 sm:$0xff]  }
 0x217   :  { %5486 = vmatpush2.bf16.msra.mxu1 %v9795_v36  ;;  %5586 = vmatprep.subr.bf16.mxu0 %v9806_v37  ;;  %v9852_v33 = vld [vmem:[#allocation2 + $0x788] ss:$16 sps:$4 sm:$0xff]   ;;  %v9857_v36 = vld [vmem:[#allocation2 + $0x5ec] ss:$16 sps:$4 sm:$0xff]  }
 0x218   :  { %5487 = vmatprep.subr.bf16.mxu1 %v9803_v40  ;;  %v9855_v25 = vld [vmem:[#allocation2 + $0x5e8] ss:$16 sps:$4 sm:$0xff]   ;;  %v9866_v40 = vld [vmem:[#allocation2 + $0x74c] ss:$16 sps:$4 sm:$0xff]  }
 0x219   :  { %v9858_v10 = vld [vmem:[#allocation2 + $0x768] ss:$16 sps:$4 sm:$0xff]  }
 0x21a   :  { %5587 = vmatpush1.bf16.msra.mxu0 %v9804_v39  ;;  %v9861_v37 = vld [vmem:[#allocation2 + $0x5c8] ss:$16 sps:$4 sm:$0xff]   ;;  %v9872_v39 = vld [vmem:[#allocation2 + $0x72c] ss:$16 sps:$4 sm:$0xff]  }
 0x21b   :  { %5488 = vmatpush2.bf16.msra.mxu1 %v9801_v32  ;;  %5588 = vmatprep.subr.bf16.mxu0 %v9812_v44  ;;  %v9864_v41 = vld [vmem:[#allocation2 + $0x748] ss:$16 sps:$4 sm:$0xff]   ;;  %v9869_v32 = vld [vmem:[#allocation2 + $0x5ac] ss:$16 sps:$4 sm:$0xff]  }
 0x21c   :  { %5539 = vmatprep.subr.bf16.mxu1 %v9809_v42  ;;  %v9867_v42 = vld [vmem:[#allocation2 + $0x5a8] ss:$16 sps:$4 sm:$0xff]  }
 0x21d   :  { %v9870_v44 = vld [vmem:[#allocation2 + $0x728] ss:$16 sps:$4 sm:$0xff]  }
 0x21e   :  { %5490 = vmatmul.mubr.bf16.vlgmr.msra.gmra.mxu1 %v10836_v9  ;;  %5589 = vmatpush1.bf16.msra.mxu0 %v9810_v46  ;;  %v9825_v9 = vld [vmem:[#allocation2 + $0x488] ss:$16 sps:$4 sm:$0xff]   ;;  %v9878_v46 = vld [vmem:[#allocation2 + $0x70c] ss:$16 sps:$4 sm:$0xff]  }
 0x21f   :  { %5540 = vmatpush1.bf16.msra.mxu1 %v9807_v45  ;;  %5590 = vmatprep.subr.bf16.mxu0 %v9818_v52  ;;  %v9875_v45 = vld [vmem:[#allocation2 + $0x58c] ss:$16 sps:$4 sm:$0xff]   ;;  %v9876_v52 = vld [vmem:[#allocation2 + $0x708] ss:$16 sps:$4 sm:$0xff]  }
 0x220   :  { %5541 = vmatprep.subr.bf16.mxu1 %v9815_v56  ;;  %5571 = vmatprep.mubr.bf16.mxu1 %v10856_v43  ;;  %v9839_v43 = vld [vmem:[#allocation2 + $0x44c] ss:$16 sps:$4 sm:$0xff]   ;;  %v9873_v56 = vld [vmem:[#allocation2 + $0x588] ss:$16 sps:$4 sm:$0xff]  }
 0x222   :  { %5591 = vmatpush1.bf16.msra.mxu0 %v9816_v54  ;;  %v9884_v54 = vld [vmem:[#allocation2 + $0xaec] ss:$16 sps:$4 sm:$0xff]  }
 0x223   :  { %5542 = vmatpush1.bf16.msra.mxu1 %v9813_v53  ;;  %5592 = vmatprep.subr.bf16.mxu0 %v9824_v59  ;;  %v9881_v53 = vld [vmem:[#allocation2 + $0x56c] ss:$16 sps:$4 sm:$0xff]   ;;  %v9882_v59 = vld [vmem:[#allocation2 + $0xae8] ss:$16 sps:$4 sm:$0xff]  }
 0x224   :  { %5543 = vmatprep.subr.bf16.mxu1 %v9821_v31  ;;  %v9879_v31 = vld [vmem:[#allocation2 + $0x568] ss:$16 sps:$4 sm:$0xff]  }
 0x226   :  { %5593 = vmatpush1.bf16.msra.mxu0 %v9822_v61  ;;  %v9890_v61 = vld [vmem:[#allocation2 + $0xacc] ss:$16 sps:$4 sm:$0xff]  }
 0x227   :  { %5544 = vmatpush1.bf16.msra.mxu1 %v9819_v60  ;;  %5594 = vmatprep.subr.bf16.mxu0 %v9830_v63  ;;  %v9887_v60 = vld [vmem:[#allocation2 + $0x54c] ss:$16 sps:$4 sm:$0xff]  }
 0x228   :  { %5545 = vmatprep.subr.bf16.mxu1 %v9827_v62 }
 0x22a   :  { %5595 = vmatpush1.bf16.msra.mxu0 %v9828_v0  ;;  %v9885_v0 = vld [vmem:[#allocation2 + $0x548] ss:$16 sps:$4 sm:$0xff]  }
 0x22b   :  { %5546 = vmatpush1.bf16.msra.mxu1 %v9825_v9  ;;  %5596 = vmatprep.subr.bf16.mxu0 %v9836_v2 }
 0x22c   :  { %5547 = vmatprep.subr.bf16.mxu1 %v9833_v1  ;;  %v9888_v1 = vld [vmem:[#allocation2 + $0xac8] ss:$16 sps:$4 sm:$0xff]  }
 0x22e   :  { %5597 = vmatpush2.bf16.msra.mxu0 %v9834_v16  ;;  %v9893_v16 = vld [vmem:[#allocation2 + $0x52c] ss:$16 sps:$4 sm:$0xff]  }
 0x22f   :  { %5548 = vmatpush1.bf16.msra.mxu1 %v9831_v15  ;;  %5598 = vmatprep.subr.bf16.mxu0 %v9842_v18 }
 0x230   :  { %5549 = vmatprep.subr.bf16.mxu1 %v9839_v43  ;;  %v9896_v43 = vld [vmem:[#allocation2 + $0xaac] ss:$16 sps:$4 sm:$0xff]  }
 0x232   :  { %5599 = vmatpush2.bf16.msra.mxu0 %v9840_v12 }
 0x233   :  { %5550 = vmatpush1.bf16.msra.mxu1 %v9837_v20  ;;  %5600 = vmatprep.subr.bf16.mxu0 %v9848_v55  ;;  %v9894_v55 = vld [vmem:[#allocation2 + $0xaa8] ss:$16 sps:$4 sm:$0xff]  }
 0x234   :  { %5551 = vmatprep.subr.bf16.mxu1 %v9845_v21 }
 0x236   :  { %5601 = vmatpush2.bf16.msra.mxu0 %v9846_v4  ;;  %v9899_v4 = vld [vmem:[#allocation2 + $0x50c] ss:$16 sps:$4 sm:$0xff]  }
 0x237   :  { %5552 = vmatpush1.bf16.msra.mxu1 %v9843_v3  ;;  %5602 = vmatprep.subr.bf16.mxu0 %v9854_v24 }
 0x238   :  { %5553 = vmatprep.subr.bf16.mxu1 %v9851_v49  ;;  %v9902_v49 = vld [vmem:[#allocation2 + $0xa8c] ss:$16 sps:$4 sm:$0xff]  }
 0x23a   :  { %5603 = vmatpush2.bf16.msra.mxu0 %v9852_v33  ;;  %v9908_v33 = vld [vmem:[#allocation2 + $0xa6c] ss:$16 sps:$4 sm:$0xff]  }
 0x23b   :  { %5554 = vmatpush1.bf16.msra.mxu1 %v9849_v26  ;;  %5604 = vmatprep.subr.bf16.mxu0 %v9860_v27  ;;  %v9897_v26 = vld [vmem:[#allocation2 + $0x508] ss:$16 sps:$4 sm:$0xff]  }
 0x23c   :  { %5555 = vmatprep.subr.bf16.mxu1 %v9857_v36  ;;  %v9903_v36 = vld [vmem:[#allocation2 + $0x8e8] ss:$16 sps:$4 sm:$0xff]  }
 0x23d   :  { %v9906_v27 = vld [vmem:[#allocation2 + $0xa68] ss:$16 sps:$4 sm:$0xff]  }
 0x23e   :  { %5605 = vmatpush2.bf16.msra.mxu0 %v9858_v10  ;;  %v9914_v10 = vld [vmem:[#allocation2 + $0xa4c] ss:$16 sps:$4 sm:$0xff]  }
 0x23f   :  { %5556 = vmatpush2.bf16.msra.mxu1 %v9855_v25  ;;  %5606 = vmatprep.subr.bf16.mxu0 %v9866_v40  ;;  %v9911_v25 = vld [vmem:[#allocation2 + $0x8cc] ss:$16 sps:$4 sm:$0xff]   ;;  %v9912_v40 = vld [vmem:[#allocation2 + $0xa48] ss:$16 sps:$4 sm:$0xff]  }
 0x240   :  { %5557 = vmatprep.subr.bf16.mxu1 %v9863_v28  ;;  %v9909_v28 = vld [vmem:[#allocation2 + $0x8c8] ss:$16 sps:$4 sm:$0xff]  }
 0x242   :  { %5607 = vmatpush2.bf16.msra.mxu0 %v9864_v41  ;;  %v9920_v41 = vld [vmem:[#allocation2 + $0xa2c] ss:$16 sps:$4 sm:$0xff]  }
 0x243   :  { %5558 = vmatpush2.bf16.msra.mxu1 %v9861_v37  ;;  %5608 = vmatprep.subr.bf16.mxu0 %v9872_v39  ;;  %v9917_v37 = vld [vmem:[#allocation2 + $0x8ac] ss:$16 sps:$4 sm:$0xff]   ;;  %v9918_v39 = vld [vmem:[#allocation2 + $0xa28] ss:$16 sps:$4 sm:$0xff]  }
 0x244   :  { %5559 = vmatprep.subr.bf16.mxu1 %v9869_v32  ;;  %v9915_v32 = vld [vmem:[#allocation2 + $0x8a8] ss:$16 sps:$4 sm:$0xff]  }
 0x246   :  { %5609 = vmatpush2.bf16.msra.mxu0 %v9870_v44  ;;  %v9926_v44 = vld [vmem:[#allocation2 + $0xa0c] ss:$16 sps:$4 sm:$0xff]  }
 0x247   :  { %5560 = vmatpush2.bf16.msra.mxu1 %v9867_v42  ;;  %5610 = vmatprep.subr.bf16.mxu0 %v9878_v46  ;;  %v9923_v42 = vld [vmem:[#allocation2 + $0x88c] ss:$16 sps:$4 sm:$0xff]  }
 0x248   :  { %5561 = vmatprep.subr.bf16.mxu1 %v9875_v45  ;;  %v9921_v45 = vld [vmem:[#allocation2 + $0x888] ss:$16 sps:$4 sm:$0xff]   ;;  %v9929_v46 = vld [vmem:[#allocation2 + $0x86c] ss:$16 sps:$4 sm:$0xff]  }
 0x24a   :  { %5611 = vmatpush2.bf16.msra.mxu0 %v9876_v52  ;;  %v9927_v52 = vld [vmem:[#allocation2 + $0x868] ss:$16 sps:$4 sm:$0xff]  }
 0x24b   :  { %5562 = vmatpush2.bf16.msra.mxu1 %v9873_v56  ;;  %5662 = vmatprep.subr.bf16.mxu0 %v9884_v54  ;;  %v9932_v56 = vld [vmem:[#allocation2 + $0xbec] ss:$16 sps:$4 sm:$0xff]  }
 0x24c   :  { %5563 = vmatprep.subr.bf16.mxu1 %v9881_v53  ;;  %v9930_v53 = vld [vmem:[#allocation2 + $0xbe8] ss:$16 sps:$4 sm:$0xff]   ;;  %v9938_v54 = vld [vmem:[#allocation2 + $0xbcc] ss:$16 sps:$4 sm:$0xff]  }
 0x24d   :  { %v5286_v62 = vpop.f32.mrf.mxu0  ;;  %5613 = vmatmul.mubr.bf16.vlgmr.msra.gmra.mxu0 %v10870_v23 }
 0x24e   :  { %v5327_v63 = vpop.f32.mrf.mxu1  ;;  %v5287_v9 = vadd.f32 %v5286_v62, %v11031_v29  ;;  %5663 = vmatpush1.bf16.msra.mxu0 %v9882_v59  ;;  %5694 = vmatprep.mubr.bf16.mxu0 %v10892_v35  ;;  %v9891_v29 = vld [vmem:[#allocation2 + $0x528] ss:$16 sps:$4 sm:$0xff]   ;;  %v9905_v35 = vld [vmem:[#allocation2 + $0x8ec] ss:$16 sps:$4 sm:$0xff]  }
 0x24f   :  { %5564 = vmatpush2.bf16.msra.mxu1 %v9879_v31  ;;  %v5288_v2 = vpop.f32.mrf.mxu0  ;;  %5664 = vmatprep.subr.bf16.mxu0 %v9890_v61  ;;  %v9933_v31 = vld [vmem:[#allocation2 + $0x848] ss:$16 sps:$4 sm:$0xff]   ;;  %v9944_v61 = vld [vmem:[#allocation2 + $0xbac] ss:$16 sps:$4 sm:$0xff]  }
 0x250   :  { %v5329_v15 = vpop.f32.mrf.mxu1  ;;  %5565 = vmatprep.subr.bf16.mxu1 %v9887_v60  ;;  %v11041_v18 = vadd.f32 %v5327_v63, %v5287_v9  ;;  %v5289_v20 = vadd.f32 %v5288_v2, %v11035_v38  ;;  %v9900_v38 = vld [vmem:[#allocation2 + $0xa88] ss:$16 sps:$4 sm:$0xff]   ;;  %v9941_v60 = vld [vmem:[#allocation2 + $0x82c] ss:$16 sps:$4 sm:$0xff]  }
 0x251   :  { %v5290_v23 = vpop.f32.mrf.mxu0  ;;  %v9936_v59 = vld [vmem:[#allocation2 + $0xbc8] ss:$16 sps:$4 sm:$0xff]   ;;  %v9947_v9 = vld [vmem:[#allocation2 + $0x80c] ss:$16 sps:$4 sm:$0xff]  }
 0x252   :  { %v5331_v12 = vpop.f32.mrf.mxu1  ;;  %v11045_v21 = vadd.f32 %v5329_v15, %v5289_v20  ;;  %5665 = vmatpush1.bf16.msra.mxu0 %v9888_v1  ;;  %v9939_v62 = vld [vmem:[#allocation2 + $0x828] ss:$16 sps:$4 sm:$0xff]   ;;  %v9953_v15 = vld [vmem:[#allocation2 + $0x9ec] ss:$16 sps:$4 sm:$0xff]  }
 0x253   :  { %5566 = vmatpush2.bf16.msra.mxu1 %v9885_v0  ;;  %5666 = vmatprep.subr.bf16.mxu0 %v9896_v43  ;;  %v5291_v24 = vpop.f32.mrf.mxu0  ;;  %v9942_v63 = vld [vmem:[#allocation2 + $0xba8] ss:$16 sps:$4 sm:$0xff]   ;;  %v9950_v0 = vld [vmem:[#allocation2 + $0xb8c] ss:$16 sps:$4 sm:$0xff]  }
 0x254   :  { %v5332_v3 = vpop.f32.mrf.mxu1  ;;  %5567 = vmatprep.subr.bf16.mxu1 %v9893_v16  ;;  %v9945_v1 = vld [vmem:[#allocation2 + $0x808] ss:$16 sps:$4 sm:$0xff]   ;;  %v9956_v16 = vld [vmem:[#allocation2 + $0xb6c] ss:$16 sps:$4 sm:$0xff]  }
 0x255   :  { %v9948_v2 = vld [vmem:[#allocation2 + $0xb88] ss:$16 sps:$4 sm:$0xff]   ;;  %v9959_v12 = vld [vmem:[#allocation2 + $0x9cc] ss:$16 sps:$4 sm:$0xff]  }
 0x256   :  { %5667 = vmatpush1.bf16.msra.mxu0 %v9894_v55  ;;  %v9951_v43 = vld [vmem:[#allocation2 + $0x9e8] ss:$16 sps:$4 sm:$0xff]   ;;  %v9962_v23 = vld [vmem:[#allocation2 + $0xb4c] ss:$16 sps:$4 sm:$0xff]  }
 0x257   :  { %5568 = vmatpush2.bf16.msra.mxu1 %v9891_v29  ;;  %5668 = vmatprep.subr.bf16.mxu0 %v9902_v49  ;;  %v9954_v20 = vld [vmem:[#allocation2 + $0xb68] ss:$16 sps:$4 sm:$0xff]   ;;  %v9965_v3 = vld [vmem:[#allocation2 + $0x9ac] ss:$16 sps:$4 sm:$0xff]  }
 0x258   :  { %5569 = vmatprep.subr.bf16.mxu1 %v9899_v4  ;;  %v9957_v29 = vld [vmem:[#allocation2 + $0x9c8] ss:$16 sps:$4 sm:$0xff]   ;;  %v9968_v4 = vld [vmem:[#allocation2 + $0xb2c] ss:$16 sps:$4 sm:$0xff]  }
 0x259   :  { %v9960_v55 = vld [vmem:[#allocation2 + $0xb48] ss:$16 sps:$4 sm:$0xff]  }
 0x25a   :  { %5669 = vmatpush1.bf16.msra.mxu0 %v9900_v38  ;;  %v9963_v49 = vld [vmem:[#allocation2 + $0x9a8] ss:$16 sps:$4 sm:$0xff]   ;;  %v9974_v38 = vld [vmem:[#allocation2 + $0xb0c] ss:$16 sps:$4 sm:$0xff]  }
 0x25b   :  { %5570 = vmatpush2.bf16.msra.mxu1 %v9897_v26  ;;  %5670 = vmatprep.subr.bf16.mxu0 %v9908_v33  ;;  %v9966_v24 = vld [vmem:[#allocation2 + $0xb28] ss:$16 sps:$4 sm:$0xff]   ;;  %v9971_v26 = vld [vmem:[#allocation2 + $0x98c] ss:$16 sps:$4 sm:$0xff]  }
 0x25c   :  { %5621 = vmatprep.subr.bf16.mxu1 %v9905_v35  ;;  %v9969_v35 = vld [vmem:[#allocation2 + $0x988] ss:$16 sps:$4 sm:$0xff]  }
 0x25d   :  { %v9972_v33 = vld [vmem:[#allocation2 + $0xb08] ss:$16 sps:$4 sm:$0xff]  }
 0x25e   :  { %5572 = vmatmul.mubr.bf16.vlgmr.msra.gmra.mxu1 %v10866_v22  ;;  %5671 = vmatpush1.bf16.msra.mxu0 %v9906_v27  ;;  %v9924_v22 = vld [vmem:[#allocation2 + $0xa08] ss:$16 sps:$4 sm:$0xff]   ;;  %v9980_v27 = vld [vmem:[#allocation2 + $0xeec] ss:$16 sps:$4 sm:$0xff]  }
 0x25f   :  { %5622 = vmatpush1.bf16.msra.mxu1 %v9903_v36  ;;  %5672 = vmatprep.subr.bf16.mxu0 %v9914_v10  ;;  %v9977_v36 = vld [vmem:[#allocation2 + $0x96c] ss:$16 sps:$4 sm:$0xff]   ;;  %v9978_v10 = vld [vmem:[#allocation2 + $0xee8] ss:$16 sps:$4 sm:$0xff]  }
 0x260   :  { %5623 = vmatprep.subr.bf16.mxu1 %v9911_v25  ;;  %5653 = vmatprep.mubr.bf16.mxu1 %v10888_v34  ;;  %v9935_v34 = vld [vmem:[#allocation2 + $0x84c] ss:$16 sps:$4 sm:$0xff]   ;;  %v9975_v25 = vld [vmem:[#allocation2 + $0x968] ss:$16 sps:$4 sm:$0xff]  }
 0x262   :  { %5673 = vmatpush1.bf16.msra.mxu0 %v9912_v40  ;;  %v9986_v40 = vld [vmem:[#allocation2 + $0xecc] ss:$16 sps:$4 sm:$0xff]  }
 0x263   :  { %5624 = vmatpush1.bf16.msra.mxu1 %v9909_v28  ;;  %5674 = vmatprep.subr.bf16.mxu0 %v9920_v41  ;;  %v9983_v28 = vld [vmem:[#allocation2 + $0x94c] ss:$16 sps:$4 sm:$0xff]  }
 0x264   :  { %5625 = vmatprep.subr.bf16.mxu1 %v9917_v37 }
 0x266   :  { %5675 = vmatpush1.bf16.msra.mxu0 %v9918_v39  ;;  %v9981_v39 = vld [vmem:[#allocation2 + $0x948] ss:$16 sps:$4 sm:$0xff]  }
 0x267   :  { %5626 = vmatpush1.bf16.msra.mxu1 %v9915_v32  ;;  %5676 = vmatprep.subr.bf16.mxu0 %v9926_v44 }
 0x268   :  { %5627 = vmatprep.subr.bf16.mxu1 %v9923_v42  ;;  %v9984_v42 = vld [vmem:[#allocation2 + $0xec8] ss:$16 sps:$4 sm:$0xff]  }
 0x26a   :  { %5677 = vmatpush1.bf16.msra.mxu0 %v9924_v22  ;;  %v9989_v22 = vld [vmem:[#allocation2 + $0x92c] ss:$16 sps:$4 sm:$0xff]  }
 0x26b   :  { %5628 = vmatpush1.bf16.msra.mxu1 %v9921_v45  ;;  %5678 = vmatprep.subr.bf16.mxu0 %v9932_v56 }
 0x26c   :  { %5629 = vmatprep.subr.bf16.mxu1 %v9929_v46  ;;  %v9992_v46 = vld [vmem:[#allocation2 + $0xeac] ss:$16 sps:$4 sm:$0xff]  }
 0x26e   :  { %5679 = vmatpush2.bf16.msra.mxu0 %v9930_v53 }
 0x26f   :  { %5630 = vmatpush1.bf16.msra.mxu1 %v9927_v52  ;;  %5680 = vmatprep.subr.bf16.mxu0 %v9938_v54  ;;  %v9990_v54 = vld [vmem:[#allocation2 + $0xea8] ss:$16 sps:$4 sm:$0xff]  }
 0x270   :  { %5631 = vmatprep.subr.bf16.mxu1 %v9935_v34 }
 0x272   :  { %5681 = vmatpush2.bf16.msra.mxu0 %v9936_v59  ;;  %v9995_v59 = vld [vmem:[#allocation2 + $0x90c] ss:$16 sps:$4 sm:$0xff]  }
 0x273   :  { %5632 = vmatpush1.bf16.msra.mxu1 %v9933_v31  ;;  %5682 = vmatprep.subr.bf16.mxu0 %v9944_v61 }
 0x274   :  { %5633 = vmatprep.subr.bf16.mxu1 %v9941_v60  ;;  %v9998_v60 = vld [vmem:[#allocation2 + $0xe8c] ss:$16 sps:$4 sm:$0xff]  }
 0x276   :  { %5683 = vmatpush2.bf16.msra.mxu0 %v9942_v63  ;;  %v9996_v63 = vld [vmem:[#allocation2 + $0xe88] ss:$16 sps:$4 sm:$0xff]  }
 0x277   :  { %5634 = vmatpush1.bf16.msra.mxu1 %v9939_v62  ;;  %5684 = vmatprep.subr.bf16.mxu0 %v9950_v0  ;;  %v9993_v62 = vld [vmem:[#allocation2 + $0x908] ss:$16 sps:$4 sm:$0xff]  }
 0x278   :  { %5635 = vmatprep.subr.bf16.mxu1 %v9947_v9  ;;  %v9999_v9 = vld [vmem:[#allocation2 + $0xce8] ss:$16 sps:$4 sm:$0xff]  }
 0x279   :  { %v10002_v0 = vld [vmem:[#allocation2 + $0xe68] ss:$16 sps:$4 sm:$0xff]  }
 0x27a   :  { %5685 = vmatpush2.bf16.msra.mxu0 %v9948_v2  ;;  %v10010_v2 = vld [vmem:[#allocation2 + $0xe4c] ss:$16 sps:$4 sm:$0xff]  }
 0x27b   :  { %5636 = vmatpush1.bf16.msra.mxu1 %v9945_v1  ;;  %5686 = vmatprep.subr.bf16.mxu0 %v9956_v16  ;;  %v10007_v1 = vld [vmem:[#allocation2 + $0xccc] ss:$16 sps:$4 sm:$0xff]   ;;  %v10008_v16 = vld [vmem:[#allocation2 + $0xe48] ss:$16 sps:$4 sm:$0xff]  }
 0x27c   :  { %5637 = vmatprep.subr.bf16.mxu1 %v9953_v15  ;;  %v10005_v15 = vld [vmem:[#allocation2 + $0xcc8] ss:$16 sps:$4 sm:$0xff]  }
 0x27e   :  { %5687 = vmatpush2.bf16.msra.mxu0 %v9954_v20 }
 0x27f   :  { %5638 = vmatpush2.bf16.msra.mxu1 %v9951_v43  ;;  %5688 = vmatprep.subr.bf16.mxu0 %v9962_v23  ;;  %v10013_v23 = vld [vmem:[#allocation2 + $0xcac] ss:$16 sps:$4 sm:$0xff]  }
 0x280   :  { %5639 = vmatprep.subr.bf16.mxu1 %v9959_v12 }
 0x282   :  { %5689 = vmatpush2.bf16.msra.mxu0 %v9960_v55 }
 0x283   :  { %5640 = vmatpush2.bf16.msra.mxu1 %v9957_v29  ;;  %5690 = vmatprep.subr.bf16.mxu0 %v9968_v4  ;;  %v10016_v29 = vld [vmem:[#allocation2 + $0xe2c] ss:$16 sps:$4 sm:$0xff]   ;;  %v10014_v4 = vld [vmem:[#allocation2 + $0xe28] ss:$16 sps:$4 sm:$0xff]  }
 0x284   :  { %5641 = vmatprep.subr.bf16.mxu1 %v9965_v3  ;;  %v10011_v3 = vld [vmem:[#allocation2 + $0xca8] ss:$16 sps:$4 sm:$0xff]  }
 0x286   :  { %5691 = vmatpush2.bf16.msra.mxu0 %v9966_v24 }
 0x287   :  { %5642 = vmatpush2.bf16.msra.mxu1 %v9963_v49  ;;  %5692 = vmatprep.subr.bf16.mxu0 %v9974_v38  ;;  %v10017_v38 = vld [vmem:[#allocation2 + $0xc88] ss:$16 sps:$4 sm:$0xff]  }
 0x288   :  { %5643 = vmatprep.subr.bf16.mxu1 %v9971_v26  ;;  %v10022_v26 = vld [vmem:[#allocation2 + $0xe0c] ss:$16 sps:$4 sm:$0xff]  }
 0x28a   :  { %5693 = vmatpush2.bf16.msra.mxu0 %v9972_v33  ;;  %v10025_v33 = vld [vmem:[#allocation2 + $0xc6c] ss:$16 sps:$4 sm:$0xff]  }
 0x28b   :  { %5644 = vmatpush2.bf16.msra.mxu1 %v9969_v35  ;;  %5744 = vmatprep.subr.bf16.mxu0 %v9980_v27  ;;  %v10020_v35 = vld [vmem:[#allocation2 + $0xe08] ss:$16 sps:$4 sm:$0xff]  }
 0x28c   :  { %5645 = vmatprep.subr.bf16.mxu1 %v9977_v36  ;;  %v10028_v36 = vld [vmem:[#allocation2 + $0xfec] ss:$16 sps:$4 sm:$0xff]   ;;  %v10023_v27 = vld [vmem:[#allocation2 + $0xc68] ss:$16 sps:$4 sm:$0xff]  }
 0x28d   :  { %v5368_v37 = vpop.f32.mrf.mxu0  ;;  %5695 = vmatmul.mubr.bf16.vlgmr.msra.gmra.mxu0 %v10914_v51 }
 0x28e   :  { %v5409_v41 = vpop.f32.mrf.mxu1  ;;  %v5369_v32 = vadd.f32 %v5368_v37, %v11041_v18  ;;  %5745 = vmatpush1.bf16.msra.mxu0 %v9978_v10  ;;  %5776 = vmatprep.mubr.bf16.mxu0 %v10922_v30  ;;  %v9987_v18 = vld [vmem:[#allocation2 + $0x928] ss:$16 sps:$4 sm:$0xff]   ;;  %v10001_v30 = vld [vmem:[#allocation2 + $0xcec] ss:$16 sps:$4 sm:$0xff]  }
 0x28f   :  { %5646 = vmatpush2.bf16.msra.mxu1 %v9975_v25  ;;  %v5370_v44 = vpop.f32.mrf.mxu0  ;;  %5746 = vmatprep.subr.bf16.mxu0 %v9986_v40  ;;  %v10031_v25 = vld [vmem:[#allocation2 + $0xc4c] ss:$16 sps:$4 sm:$0xff]   ;;  %v10032_v40 = vld [vmem:[#allocation2 + $0xfc8] ss:$16 sps:$4 sm:$0xff]  }
 0x290   :  { %v5411_v45 = vpop.f32.mrf.mxu1  ;;  %5647 = vmatprep.subr.bf16.mxu1 %v9983_v28  ;;  %v5410_v56 = vadd.f32 %v5409_v41, %v5369_v32  ;;  %v5371_v52 = vadd.f32 %v5370_v44, %v11045_v21  ;;  %v10004_v21 = vld [vmem:[#allocation2 + $0xe6c] ss:$16 sps:$4 sm:$0xff]   ;;  %v10029_v28 = vld [vmem:[#allocation2 + $0xc48] ss:$16 sps:$4 sm:$0xff]  }
 0x291   :  { %v5372_v34 = vpop.f32.mrf.mxu0  ;;  %v10034_v10 = vld [vmem:[#allocation2 + $0xfcc] ss:$16 sps:$4 sm:$0xff]   ;;  %v10035_v32 = vld [vmem:[#allocation2 + $0xc28] ss:$16 sps:$4 sm:$0xff]  }
 0x292   :  { %v5413_v53 = vpop.f32.mrf.mxu1  ;;  %v5412_v51 = vadd.f32 %v5411_v45, %v5371_v52  ;;  %5747 = vmatpush1.bf16.msra.mxu0 %v9984_v42  ;;  %v10037_v37 = vld [vmem:[#allocation2 + $0xc2c] ss:$16 sps:$4 sm:$0xff]   ;;  %v10041_v45 = vld [vmem:[#allocation2 + $0xc08] ss:$16 sps:$4 sm:$0xff]  }
 0x293   :  { %5648 = vmatpush2.bf16.msra.mxu1 %v9981_v39  ;;  %5748 = vmatprep.subr.bf16.mxu0 %v9992_v46  ;;  %v5373_v61 = vpop.f32.mrf.mxu0  ;;  %v10040_v41 = vld [vmem:[#allocation2 + $0xfac] ss:$16 sps:$4 sm:$0xff]   ;;  %v10038_v39 = vld [vmem:[#allocation2 + $0xfa8] ss:$16 sps:$4 sm:$0xff]  }
 0x294   :  { %v5414_v31 = vpop.f32.mrf.mxu1  ;;  %5649 = vmatprep.subr.bf16.mxu1 %v9989_v22  ;;  %v10043_v42 = vld [vmem:[#allocation2 + $0xc0c] ss:$16 sps:$4 sm:$0xff]   ;;  %v10044_v22 = vld [vmem:[#allocation2 + $0xf88] ss:$16 sps:$4 sm:$0xff]  }
 0x295   :  { %v10046_v44 = vld [vmem:[#allocation2 + $0xf8c] ss:$16 sps:$4 sm:$0xff]   ;;  %v10047_v52 = vld [vmem:[#allocation2 + $0xde8] ss:$16 sps:$4 sm:$0xff]  }
 0x296   :  { %5749 = vmatpush1.bf16.msra.mxu0 %v9990_v54  ;;  %v10049_v46 = vld [vmem:[#allocation2 + $0xdec] ss:$16 sps:$4 sm:$0xff]   ;;  %v10050_v53 = vld [vmem:[#allocation2 + $0xf68] ss:$16 sps:$4 sm:$0xff]  }
 0x297   :  { %5650 = vmatpush2.bf16.msra.mxu1 %v9987_v18  ;;  %5750 = vmatprep.subr.bf16.mxu0 %v9998_v60  ;;  %v10055_v34 = vld [vmem:[#allocation2 + $0xdcc] ss:$16 sps:$4 sm:$0xff]   ;;  %v10053_v18 = vld [vmem:[#allocation2 + $0xdc8] ss:$16 sps:$4 sm:$0xff]  }
 0x298   :  { %5651 = vmatprep.subr.bf16.mxu1 %v9995_v59  ;;  %v10056_v54 = vld [vmem:[#allocation2 + $0xf48] ss:$16 sps:$4 sm:$0xff]   ;;  %v10061_v31 = vld [vmem:[#allocation2 + $0xdac] ss:$16 sps:$4 sm:$0xff]  }
 0x299   :  { %v10064_v59 = vld [vmem:[#allocation2 + $0xf2c] ss:$16 sps:$4 sm:$0xff]   ;;  %v10059_v60 = vld [vmem:[#allocation2 + $0xda8] ss:$16 sps:$4 sm:$0xff]  }
 0x29a   :  { %5751 = vmatpush1.bf16.msra.mxu0 %v9996_v63  ;;  %v10062_v61 = vld [vmem:[#allocation2 + $0xf28] ss:$16 sps:$4 sm:$0xff]   ;;  %v10070_v63 = vld [vmem:[#allocation2 + $0xf0c] ss:$16 sps:$4 sm:$0xff]  }
 0x29b   :  { %5652 = vmatpush2.bf16.msra.mxu1 %v9993_v62  ;;  %5752 = vmatprep.subr.bf16.mxu0 %v10004_v21  ;;  %v10067_v62 = vld [vmem:[#allocation2 + $0xd8c] ss:$16 sps:$4 sm:$0xff]   ;;  %v10068_v21 = vld [vmem:[#allocation2 + $0xf08] ss:$16 sps:$4 sm:$0xff]  }
 0x29c   :  { %5703 = vmatprep.subr.bf16.mxu1 %v10001_v30  ;;  %v10065_v30 = vld [vmem:[#allocation2 + $0xd88] ss:$16 sps:$4 sm:$0xff]  }
 0x29e   :  { %v5450_v43 = vpop.f32.mrf.mxu1  ;;  %5654 = vmatmul.mubr.bf16.vlgmr.msra.gmra.mxu1 %v10910_v50  ;;  %5753 = vmatpush1.bf16.msra.mxu0 %v10002_v0  ;;  %v10019_v50 = vld [vmem:[#allocation2 + $0xc8c] ss:$16 sps:$4 sm:$0xff]  }
 0x29f   :  { %v11054_v20 = vadd.f32 %v5450_v43, %v5410_v56  ;;  %5704 = vmatpush1.bf16.msra.mxu1 %v9999_v9  ;;  %5754 = vmatprep.subr.bf16.mxu0 %v10010_v2  ;;  %v10052_v56 = vld [vmem:[#allocation2 + $0xf6c] ss:$16 sps:$4 sm:$0xff]   ;;  %v10074_v2 = vld [vmem:[#allocation2 + $0x12e8] ss:$16 sps:$4 sm:$0xff]  }
 0x2a0   :  { %v5452_v12 = vpop.f32.mrf.mxu1  ;;  %5705 = vmatprep.subr.bf16.mxu1 %v10007_v1  ;;  %5735 = vmatprep.mubr.bf16.mxu1 %v10918_v58  ;;  %v10026_v58 = vld [vmem:[#allocation2 + $0xfe8] ss:$16 sps:$4 sm:$0xff]   ;;  %v10073_v9 = vld [vmem:[#allocation2 + $0xd6c] ss:$16 sps:$4 sm:$0xff]  }
 0x2a1   :  { %v11056_v55 = vadd.f32 %v5452_v12, %v5412_v51  ;;  %v10058_v51 = vld [vmem:[#allocation2 + $0xf4c] ss:$16 sps:$4 sm:$0xff]   ;;  %v10071_v1 = vld [vmem:[#allocation2 + $0xd68] ss:$16 sps:$4 sm:$0xff]  }
 0x2a2   :  { %v5454_v49 = vpop.f32.mrf.mxu1  ;;  %5755 = vmatpush1.bf16.msra.mxu0 %v10008_v16  ;;  %v10076_v0 = vld [vmem:[#allocation2 + $0x12ec] ss:$16 sps:$4 sm:$0xff]   ;;  %v10077_v12 = vld [vmem:[#allocation2 + $0xd48] ss:$16 sps:$4 sm:$0xff]  }
 0x2a3   :  { %5706 = vmatpush1.bf16.msra.mxu1 %v10005_v15  ;;  %5756 = vmatprep.subr.bf16.mxu0 %v10016_v29  ;;  %v10079_v15 = vld [vmem:[#allocation2 + $0xd4c] ss:$16 sps:$4 sm:$0xff]  }
 0x2a4   :  { %v5455_v24 = vpop.f32.mrf.mxu1  ;;  %5707 = vmatprep.subr.bf16.mxu1 %v10013_v23  ;;  %v10082_v16 = vld [vmem:[#allocation2 + $0x12cc] ss:$16 sps:$4 sm:$0xff]   ;;  %v10080_v23 = vld [vmem:[#allocation2 + $0x12c8] ss:$16 sps:$4 sm:$0xff]  }
 0x2a5   :  { %v10085_v29 = vld [vmem:[#allocation2 + $0xd2c] ss:$16 sps:$4 sm:$0xff]   ;;  %v10083_v24 = vld [vmem:[#allocation2 + $0xd28] ss:$16 sps:$4 sm:$0xff]  }
 0x2a6   :  { %5757 = vmatpush1.bf16.msra.mxu0 %v10014_v4 }
 0x2a7   :  { %5708 = vmatpush1.bf16.msra.mxu1 %v10011_v3  ;;  %5758 = vmatprep.subr.bf16.mxu0 %v10022_v26  ;;  %v10088_v3 = vld [vmem:[#allocation2 + $0x12ac] ss:$16 sps:$4 sm:$0xff]  }
 0x2a8   :  { %5709 = vmatprep.subr.bf16.mxu1 %v10019_v50  ;;  %v10086_v50 = vld [vmem:[#allocation2 + $0x12a8] ss:$16 sps:$4 sm:$0xff]   ;;  %v10094_v26 = vld [vmem:[#allocation2 + $0x128c] ss:$16 sps:$4 sm:$0xff]  }
 0x2aa   :  { %5759 = vmatpush1.bf16.msra.mxu0 %v10020_v35  ;;  %v10089_v35 = vld [vmem:[#allocation2 + $0xd08] ss:$16 sps:$4 sm:$0xff]  }
 0x2ab   :  { %5710 = vmatpush1.bf16.msra.mxu1 %v10017_v38  ;;  %5760 = vmatprep.subr.bf16.mxu0 %v10028_v36  ;;  %v10097_v36 = vld [vmem:[#allocation2 + $0x10ec] ss:$16 sps:$4 sm:$0xff]  }
 0x2ac   :  { %5711 = vmatprep.subr.bf16.mxu1 %v10025_v33  ;;  %v10092_v33 = vld [vmem:[#allocation2 + $0x1288] ss:$16 sps:$4 sm:$0xff]  }
 0x2ae   :  { %5761 = vmatpush2.bf16.msra.mxu0 %v10026_v58  ;;  %v10098_v58 = vld [vmem:[#allocation2 + $0x1268] ss:$16 sps:$4 sm:$0xff]  }
 0x2af   :  { %5712 = vmatpush1.bf16.msra.mxu1 %v10023_v27  ;;  %5762 = vmatprep.subr.bf16.mxu0 %v10034_v10  ;;  %v10100_v27 = vld [vmem:[#allocation2 + $0x126c] ss:$16 sps:$4 sm:$0xff]  }
 0x2b0   :  { %5713 = vmatprep.subr.bf16.mxu1 %v10031_v25  ;;  %v10103_v25 = vld [vmem:[#allocation2 + $0x10cc] ss:$16 sps:$4 sm:$0xff]  }
 0x2b1   :  { %v10106_v10 = vld [vmem:[#allocation2 + $0x124c] ss:$16 sps:$4 sm:$0xff]  }
 0x2b2   :  { %5763 = vmatpush2.bf16.msra.mxu0 %v10032_v40 }
 0x2b3   :  { %5714 = vmatpush1.bf16.msra.mxu1 %v10029_v28  ;;  %5764 = vmatprep.subr.bf16.mxu0 %v10040_v41  ;;  %v10104_v41 = vld [vmem:[#allocation2 + $0x1248] ss:$16 sps:$4 sm:$0xff]  }
 0x2b4   :  { %5715 = vmatprep.subr.bf16.mxu1 %v10037_v37  ;;  %v10101_v37 = vld [vmem:[#allocation2 + $0x10c8] ss:$16 sps:$4 sm:$0xff]  }
 0x2b6   :  { %5765 = vmatpush2.bf16.msra.mxu0 %v10038_v39  ;;  %v10109_v39 = vld [vmem:[#allocation2 + $0x10ac] ss:$16 sps:$4 sm:$0xff]  }
 0x2b7   :  { %5716 = vmatpush1.bf16.msra.mxu1 %v10035_v32  ;;  %5766 = vmatprep.subr.bf16.mxu0 %v10046_v44 }
 0x2b8   :  { %5717 = vmatprep.subr.bf16.mxu1 %v10043_v42  ;;  %v10112_v42 = vld [vmem:[#allocation2 + $0x122c] ss:$16 sps:$4 sm:$0xff]  }
 0x2ba   :  { %5767 = vmatpush2.bf16.msra.mxu0 %v10044_v22  ;;  %v10107_v22 = vld [vmem:[#allocation2 + $0x10a8] ss:$16 sps:$4 sm:$0xff]  }
 0x2bb   :  { %5718 = vmatpush1.bf16.msra.mxu1 %v10041_v45  ;;  %5768 = vmatprep.subr.bf16.mxu0 %v10052_v56  ;;  %v10115_v56 = vld [vmem:[#allocation2 + $0x108c] ss:$16 sps:$4 sm:$0xff]  }
 0x2bc   :  { %5719 = vmatprep.subr.bf16.mxu1 %v10049_v46 }
 0x2be   :  { %5769 = vmatpush2.bf16.msra.mxu0 %v10050_v53  ;;  %v10113_v53 = vld [vmem:[#allocation2 + $0x1088] ss:$16 sps:$4 sm:$0xff]  }
 0x2bf   :  { %5720 = vmatpush2.bf16.msra.mxu1 %v10047_v52  ;;  %5770 = vmatprep.subr.bf16.mxu0 %v10058_v51  ;;  %v10118_v52 = vld [vmem:[#allocation2 + $0x120c] ss:$16 sps:$4 sm:$0xff]  }
 0x2c0   :  { %5721 = vmatprep.subr.bf16.mxu1 %v10055_v34  ;;  %v10116_v34 = vld [vmem:[#allocation2 + $0x1208] ss:$16 sps:$4 sm:$0xff]   ;;  %v10121_v51 = vld [vmem:[#allocation2 + $0x106c] ss:$16 sps:$4 sm:$0xff]  }
 0x2c2   :  { %5771 = vmatpush2.bf16.msra.mxu0 %v10056_v54  ;;  %v10122_v54 = vld [vmem:[#allocation2 + $0x13e8] ss:$16 sps:$4 sm:$0xff]  }
 0x2c3   :  { %5722 = vmatpush2.bf16.msra.mxu1 %v10053_v18  ;;  %5772 = vmatprep.subr.bf16.mxu0 %v10064_v59  ;;  %v10124_v18 = vld [vmem:[#allocation2 + $0x13ec] ss:$16 sps:$4 sm:$0xff]  }
 0x2c4   :  { %5723 = vmatprep.subr.bf16.mxu1 %v10061_v31  ;;  %v10127_v31 = vld [vmem:[#allocation2 + $0x104c] ss:$16 sps:$4 sm:$0xff]  }
 0x2c5   :  { %v10130_v59 = vld [vmem:[#allocation2 + $0x13cc] ss:$16 sps:$4 sm:$0xff]  }
 0x2c6   :  { %5773 = vmatpush2.bf16.msra.mxu0 %v10062_v61  ;;  %v10128_v61 = vld [vmem:[#allocation2 + $0x13c8] ss:$16 sps:$4 sm:$0xff]  }
 0x2c7   :  { %5724 = vmatpush2.bf16.msra.mxu1 %v10059_v60  ;;  %5774 = vmatprep.subr.bf16.mxu0 %v10070_v63  ;;  %v10125_v60 = vld [vmem:[#allocation2 + $0x1048] ss:$16 sps:$4 sm:$0xff]   ;;  %v10136_v63 = vld [vmem:[#allocation2 + $0x13ac] ss:$16 sps:$4 sm:$0xff]  }
 0x2c8   :  { %5725 = vmatprep.subr.bf16.mxu1 %v10067_v62  ;;  %v10133_v62 = vld [vmem:[#allocation2 + $0x102c] ss:$16 sps:$4 sm:$0xff]  }
 0x2ca   :  { %5775 = vmatpush2.bf16.msra.mxu0 %v10068_v21  ;;  %v10134_v21 = vld [vmem:[#allocation2 + $0x13a8] ss:$16 sps:$4 sm:$0xff]  }
 0x2cb   :  { %5726 = vmatpush2.bf16.msra.mxu1 %v10065_v30  ;;  %5826 = vmatprep.subr.bf16.mxu0 %v10076_v0  ;;  %v10131_v30 = vld [vmem:[#allocation2 + $0x1028] ss:$16 sps:$4 sm:$0xff]   ;;  %v10142_v0 = vld [vmem:[#allocation2 + $0x138c] ss:$16 sps:$4 sm:$0xff]  }
 0x2cc   :  { %5727 = vmatprep.subr.bf16.mxu1 %v10073_v9  ;;  %v10139_v9 = vld [vmem:[#allocation2 + $0x100c] ss:$16 sps:$4 sm:$0xff]  }
 0x2cd   :  { %5777 = vmatmul.mubr.bf16.vlgmr.msra.gmra.mxu0 %v10946_v14  ;;  %v5532_v43 = vpop.f32.mrf.mxu0  ;;  %v10091_v14 = vld [vmem:[#allocation2 + $0xd0c] ss:$16 sps:$4 sm:$0xff]  }
 0x2ce   :  { %5827 = vmatpush1.bf16.msra.mxu0 %v10074_v2  ;;  %5858 = vmatprep.mubr.bf16.mxu0 %v10954_v48  ;;  %v10095_v48 = vld [vmem:[#allocation2 + $0x10e8] ss:$16 sps:$4 sm:$0xff]  }
 0x2cf   :  { %5728 = vmatpush2.bf16.msra.mxu1 %v10071_v1  ;;  %5828 = vmatprep.subr.bf16.mxu0 %v10082_v16  ;;  %v5534_v4 = vpop.f32.mrf.mxu0  ;;  %v10137_v1 = vld [vmem:[#allocation2 + $0x1008] ss:$16 sps:$4 sm:$0xff]   ;;  %v10148_v16 = vld [vmem:[#allocation2 + $0x136c] ss:$16 sps:$4 sm:$0xff]  }
 0x2d0   :  { %5729 = vmatprep.subr.bf16.mxu1 %v10079_v15  ;;  %v10140_v2 = vld [vmem:[#allocation2 + $0x1388] ss:$16 sps:$4 sm:$0xff]   ;;  %v10145_v15 = vld [vmem:[#allocation2 + $0x11ec] ss:$16 sps:$4 sm:$0xff]  }
 0x2d1   :  { %v5536_v49 = vpop.f32.mrf.mxu0 }
 0x2d2   :  { %5829 = vmatpush1.bf16.msra.mxu0 %v10080_v23  ;;  %v10151_v23 = vld [vmem:[#allocation2 + $0x11cc] ss:$16 sps:$4 sm:$0xff]  }
 0x2d3   :  { %5730 = vmatpush2.bf16.msra.mxu1 %v10077_v12  ;;  %5830 = vmatprep.subr.bf16.mxu0 %v10088_v3  ;;  %v5537_v38 = vpop.f32.mrf.mxu0  ;;  %v10146_v12 = vld [vmem:[#allocation2 + $0x1368] ss:$16 sps:$4 sm:$0xff]   ;;  %v10157_v49 = vld [vmem:[#allocation2 + $0x11ac] ss:$16 sps:$4 sm:$0xff]  }
 0x2d4   :  { %5731 = vmatprep.subr.bf16.mxu1 %v10085_v29  ;;  %v10154_v29 = vld [vmem:[#allocation2 + $0x134c] ss:$16 sps:$4 sm:$0xff]   ;;  %v10149_v3 = vld [vmem:[#allocation2 + $0x11c8] ss:$16 sps:$4 sm:$0xff]  }
 0x2d5   :  { %v10166_v38 = vld [vmem:[#allocation2 + $0x130c] ss:$16 sps:$4 sm:$0xff]  }
 0x2d6   :  { %5831 = vmatpush1.bf16.msra.mxu0 %v10086_v50  ;;  %v10155_v50 = vld [vmem:[#allocation2 + $0x11a8] ss:$16 sps:$4 sm:$0xff]  }
 0x2d7   :  { %5732 = vmatpush2.bf16.msra.mxu1 %v10083_v24  ;;  %5832 = vmatprep.subr.bf16.mxu0 %v10094_v26  ;;  %v10160_v24 = vld [vmem:[#allocation2 + $0x132c] ss:$16 sps:$4 sm:$0xff]  }
 0x2d8   :  { %5733 = vmatprep.subr.bf16.mxu1 %v10091_v14  ;;  %v10158_v14 = vld [vmem:[#allocation2 + $0x1328] ss:$16 sps:$4 sm:$0xff]   ;;  %v10163_v26 = vld [vmem:[#allocation2 + $0x118c] ss:$16 sps:$4 sm:$0xff]  }
 0x2da   :  { %5833 = vmatpush1.bf16.msra.mxu0 %v10092_v33  ;;  %v10164_v33 = vld [vmem:[#allocation2 + $0x1308] ss:$16 sps:$4 sm:$0xff]  }
 0x2db   :  { %5734 = vmatpush2.bf16.msra.mxu1 %v10089_v35  ;;  %5834 = vmatprep.subr.bf16.mxu0 %v10100_v27  ;;  %v10161_v35 = vld [vmem:[#allocation2 + $0x1188] ss:$16 sps:$4 sm:$0xff]   ;;  %v10172_v27 = vld [vmem:[#allocation2 + $0x16ec] ss:$16 sps:$4 sm:$0xff]  }
 0x2dc   :  { %5785 = vmatprep.subr.bf16.mxu1 %v10097_v36  ;;  %v10169_v36 = vld [vmem:[#allocation2 + $0x116c] ss:$16 sps:$4 sm:$0xff]  }
 0x2de   :  { %v5491_v28 = vpop.f32.mrf.mxu1  ;;  %5736 = vmatmul.mubr.bf16.vlgmr.msra.gmra.mxu1 %v10942_v13  ;;  %5835 = vmatpush1.bf16.msra.mxu0 %v10098_v58  ;;  %v10110_v13 = vld [vmem:[#allocation2 + $0x1228] ss:$16 sps:$4 sm:$0xff]  }
 0x2df   :  { %v11062_v40 = vadd.f32 %v5532_v43, %v5491_v28  ;;  %5786 = vmatpush1.bf16.msra.mxu1 %v10095_v48  ;;  %5836 = vmatprep.subr.bf16.mxu0 %v10106_v10  ;;  %v10143_v43 = vld [vmem:[#allocation2 + $0x11e8] ss:$16 sps:$4 sm:$0xff]   ;;  %v10178_v10 = vld [vmem:[#allocation2 + $0x16cc] ss:$16 sps:$4 sm:$0xff]  }
 0x2e0   :  { %v5493_v32 = vpop.f32.mrf.mxu1  ;;  %5787 = vmatprep.subr.bf16.mxu1 %v10103_v25  ;;  %5817 = vmatprep.mubr.bf16.mxu1 %v10950_v19  ;;  %v10119_v19 = vld [vmem:[#allocation2 + $0x1068] ss:$16 sps:$4 sm:$0xff]   ;;  %v10175_v25 = vld [vmem:[#allocation2 + $0x114c] ss:$16 sps:$4 sm:$0xff]  }
 0x2e1   :  { %v11064_v44 = vadd.f32 %v5534_v4, %v5493_v32  ;;  %v10152_v4 = vld [vmem:[#allocation2 + $0x1348] ss:$16 sps:$4 sm:$0xff]   ;;  %v10181_v32 = vld [vmem:[#allocation2 + $0x112c] ss:$16 sps:$4 sm:$0xff]  }
 0x2e2   :  { %v5495_v45 = vpop.f32.mrf.mxu1  ;;  %5837 = vmatpush1.bf16.msra.mxu0 %v10104_v41  ;;  %v10167_v48 = vld [vmem:[#allocation2 + $0x1168] ss:$16 sps:$4 sm:$0xff]  }
 0x2e3   :  { %5788 = vmatpush1.bf16.msra.mxu1 %v10101_v37  ;;  %5838 = vmatprep.subr.bf16.mxu0 %v10112_v42  ;;  %v10170_v58 = vld [vmem:[#allocation2 + $0x16e8] ss:$16 sps:$4 sm:$0xff]  }
 0x2e4   :  { %v5496_v46 = vpop.f32.mrf.mxu1  ;;  %5789 = vmatprep.subr.bf16.mxu1 %v10109_v39  ;;  %v10173_v37 = vld [vmem:[#allocation2 + $0x1148] ss:$16 sps:$4 sm:$0xff]   ;;  %v10184_v39 = vld [vmem:[#allocation2 + $0x16ac] ss:$16 sps:$4 sm:$0xff]  }
 0x2e5   :  { %v10176_v41 = vld [vmem:[#allocation2 + $0x16c8] ss:$16 sps:$4 sm:$0xff]   ;;  %v10190_v46 = vld [vmem:[#allocation2 + $0x168c] ss:$16 sps:$4 sm:$0xff]  }
 0x2e6   :  { %5839 = vmatpush1.bf16.msra.mxu0 %v10110_v13  ;;  %v10182_v13 = vld [vmem:[#allocation2 + $0x16a8] ss:$16 sps:$4 sm:$0xff]  }
 0x2e7   :  { %5790 = vmatpush1.bf16.msra.mxu1 %v10107_v22  ;;  %5840 = vmatprep.subr.bf16.mxu0 %v10118_v52  ;;  %v10179_v22 = vld [vmem:[#allocation2 + $0x1128] ss:$16 sps:$4 sm:$0xff]  }
 0x2e8   :  { %5791 = vmatprep.subr.bf16.mxu1 %v10115_v56  ;;  %v10185_v52 = vld [vmem:[#allocation2 + $0x1108] ss:$16 sps:$4 sm:$0xff]  }
 0x2ea   :  { %5841 = vmatpush1.bf16.msra.mxu0 %v10116_v34  ;;  %v10193_v34 = vld [vmem:[#allocation2 + $0x14ec] ss:$16 sps:$4 sm:$0xff]  }
 0x2eb   :  { %5792 = vmatpush1.bf16.msra.mxu1 %v10113_v53  ;;  %5842 = vmatprep.subr.bf16.mxu0 %v10124_v18  ;;  %v10188_v53 = vld [vmem:[#allocation2 + $0x1688] ss:$16 sps:$4 sm:$0xff]  }
 0x2ec   :  { %5793 = vmatprep.subr.bf16.mxu1 %v10121_v51  ;;  %v10196_v51 = vld [vmem:[#allocation2 + $0x166c] ss:$16 sps:$4 sm:$0xff]   ;;  %v10194_v18 = vld [vmem:[#allocation2 + $0x1668] ss:$16 sps:$4 sm:$0xff]  }
 0x2ee   :  { %5843 = vmatpush2.bf16.msra.mxu0 %v10122_v54  ;;  %v10202_v54 = vld [vmem:[#allocation2 + $0x164c] ss:$16 sps:$4 sm:$0xff]  }
 0x2ef   :  { %5794 = vmatpush1.bf16.msra.mxu1 %v10119_v19  ;;  %5844 = vmatprep.subr.bf16.mxu0 %v10130_v59  ;;  %v10199_v19 = vld [vmem:[#allocation2 + $0x14cc] ss:$16 sps:$4 sm:$0xff]  }
 0x2f0   :  { %5795 = vmatprep.subr.bf16.mxu1 %v10127_v31 }
 0x2f2   :  { %5845 = vmatpush2.bf16.msra.mxu0 %v10128_v61  ;;  %v10200_v61 = vld [vmem:[#allocation2 + $0x1648] ss:$16 sps:$4 sm:$0xff]  }
 0x2f3   :  { %5796 = vmatpush1.bf16.msra.mxu1 %v10125_v60  ;;  %5846 = vmatprep.subr.bf16.mxu0 %v10136_v63  ;;  %v10197_v60 = vld [vmem:[#allocation2 + $0x14c8] ss:$16 sps:$4 sm:$0xff]   ;;  %v10205_v63 = vld [vmem:[#allocation2 + $0x14ac] ss:$16 sps:$4 sm:$0xff]  }
 0x2f4   :  { %5797 = vmatprep.subr.bf16.mxu1 %v10133_v62 }
 0x2f6   :  { %5847 = vmatpush2.bf16.msra.mxu0 %v10134_v21 }
 0x2f7   :  { %5798 = vmatpush1.bf16.msra.mxu1 %v10131_v30  ;;  %5848 = vmatprep.subr.bf16.mxu0 %v10142_v0  ;;  %v10208_v30 = vld [vmem:[#allocation2 + $0x162c] ss:$16 sps:$4 sm:$0xff]  }
 0x2f8   :  { %5799 = vmatprep.subr.bf16.mxu1 %v10139_v9 }
 0x2fa   :  { %5849 = vmatpush2.bf16.msra.mxu0 %v10140_v2 }
 0x2fb   :  { %5800 = vmatpush1.bf16.msra.mxu1 %v10137_v1  ;;  %5850 = vmatprep.subr.bf16.mxu0 %v10148_v16  ;;  %v10214_v16 = vld [vmem:[#allocation2 + $0x160c] ss:$16 sps:$4 sm:$0xff]  }
 0x2fc   :  { %5801 = vmatprep.subr.bf16.mxu1 %v10145_v15  ;;  %v10211_v15 = vld [vmem:[#allocation2 + $0x148c] ss:$16 sps:$4 sm:$0xff]  }
 0x2fe   :  { %5851 = vmatpush2.bf16.msra.mxu0 %v10146_v12  ;;  %v10217_v12 = vld [vmem:[#allocation2 + $0x146c] ss:$16 sps:$4 sm:$0xff]  }
 0x2ff   :  { %5802 = vmatpush2.bf16.msra.mxu1 %v10143_v43  ;;  %5852 = vmatprep.subr.bf16.mxu0 %v10154_v29  ;;  %v10209_v43 = vld [vmem:[#allocation2 + $0x1488] ss:$16 sps:$4 sm:$0xff]  }
 0x300   :  { %5803 = vmatprep.subr.bf16.mxu1 %v10151_v23  ;;  %v10215_v23 = vld [vmem:[#allocation2 + $0x1468] ss:$16 sps:$4 sm:$0xff]  }
 0x301   :  { %v10218_v29 = vld [vmem:[#allocation2 + $0x17e8] ss:$16 sps:$4 sm:$0xff]  }
 0x302   :  { %5853 = vmatpush2.bf16.msra.mxu0 %v10152_v4  ;;  %v10226_v4 = vld [vmem:[#allocation2 + $0x17cc] ss:$16 sps:$4 sm:$0xff]  }
 0x303   :  { %5804 = vmatpush2.bf16.msra.mxu1 %v10149_v3  ;;  %5854 = vmatprep.subr.bf16.mxu0 %v10160_v24  ;;  %v10223_v3 = vld [vmem:[#allocation2 + $0x144c] ss:$16 sps:$4 sm:$0xff]   ;;  %v10224_v24 = vld [vmem:[#allocation2 + $0x17c8] ss:$16 sps:$4 sm:$0xff]  }
 0x304   :  { %5805 = vmatprep.subr.bf16.mxu1 %v10157_v49  ;;  %v10221_v49 = vld [vmem:[#allocation2 + $0x1448] ss:$16 sps:$4 sm:$0xff]  }
 0x306   :  { %5855 = vmatpush2.bf16.msra.mxu0 %v10158_v14  ;;  %v10232_v14 = vld [vmem:[#allocation2 + $0x17ac] ss:$16 sps:$4 sm:$0xff]  }
 0x307   :  { %5806 = vmatpush2.bf16.msra.mxu1 %v10155_v50  ;;  %5856 = vmatprep.subr.bf16.mxu0 %v10166_v38  ;;  %v10229_v50 = vld [vmem:[#allocation2 + $0x142c] ss:$16 sps:$4 sm:$0xff]   ;;  %v10230_v38 = vld [vmem:[#allocation2 + $0x17a8] ss:$16 sps:$4 sm:$0xff]  }
 0x308   :  { %5807 = vmatprep.subr.bf16.mxu1 %v10163_v26  ;;  %v10227_v26 = vld [vmem:[#allocation2 + $0x1428] ss:$16 sps:$4 sm:$0xff]  }
 0x30a   :  { %5857 = vmatpush2.bf16.msra.mxu0 %v10164_v33  ;;  %v10235_v33 = vld [vmem:[#allocation2 + $0x140c] ss:$16 sps:$4 sm:$0xff]  }
 0x30b   :  { %5808 = vmatpush2.bf16.msra.mxu1 %v10161_v35  ;;  %5908 = vmatprep.subr.bf16.mxu0 %v10172_v27  ;;  %v5992_v35 = vlaneseq  ;;  %v10233_v27 = vld [vmem:[#allocation2 + $0x1408] ss:$16 sps:$4 sm:$0xff]  }
 0x30c   :  { %5809 = vmatprep.subr.bf16.mxu1 %v10169_v36  ;;  %v10238_v36 = vld [vmem:[#allocation2 + $0x178c] ss:$16 sps:$4 sm:$0xff]  }
 0x30d   :  { %5859 = vmatmul.mubr.bf16.vlgmr.msra.gmra.mxu0 %v10982_v6  ;;  %v5614_v28 = vpop.f32.mrf.mxu0  ;;  %v10187_v6 = vld [vmem:[#allocation2 + $0x110c] ss:$16 sps:$4 sm:$0xff]  }
 0x30e   :  { %5909 = vmatpush1.bf16.msra.mxu0 %v10170_v58  ;;  %5940 = vmatprep.mubr.bf16.mxu0 %v10990_v11  ;;  %v10191_v11 = vld [vmem:[#allocation2 + $0x14e8] ss:$16 sps:$4 sm:$0xff]   ;;  %v11077_v58 = vshrl.u32 %v5992_v35, 7 }
 0x30f   :  { %5810 = vmatpush2.bf16.msra.mxu1 %v10167_v48  ;;  %5910 = vmatprep.subr.bf16.mxu0 %v10178_v10  ;;  %v5616_v42 = vpop.f32.mrf.mxu0  ;;  %v10236_v48 = vld [vmem:[#allocation2 + $0x1788] ss:$16 sps:$4 sm:$0xff]   ;;  %v10244_v10 = vld [vmem:[#allocation2 + $0x176c] ss:$16 sps:$4 sm:$0xff]  }
 0x310   :  { %5811 = vmatprep.subr.bf16.mxu1 %v10175_v25  ;;  %v10241_v25 = vld [vmem:[#allocation2 + $0x15ec] ss:$16 sps:$4 sm:$0xff]  }
 0x311   :  { %v5618_v45 = vpop.f32.mrf.mxu0 }
 0x312   :  { %5911 = vmatpush1.bf16.msra.mxu0 %v10176_v41  ;;  %v10242_v41 = vld [vmem:[#allocation2 + $0x1768] ss:$16 sps:$4 sm:$0xff]  }
 0x313   :  { %5812 = vmatpush2.bf16.msra.mxu1 %v10173_v37  ;;  %5912 = vmatprep.subr.bf16.mxu0 %v10184_v39  ;;  %v5619_v56 = vpop.f32.mrf.mxu0  ;;  %v10239_v37 = vld [vmem:[#allocation2 + $0x15e8] ss:$16 sps:$4 sm:$0xff]   ;;  %v10250_v39 = vld [vmem:[#allocation2 + $0x174c] ss:$16 sps:$4 sm:$0xff]  }
 0x314   :  { %5813 = vmatprep.subr.bf16.mxu1 %v10181_v32  ;;  %v10247_v32 = vld [vmem:[#allocation2 + $0x15cc] ss:$16 sps:$4 sm:$0xff]   ;;  %v11083_v56 = vld [vmem:[#allocation6] sm:$0xf] }
 0x316   :  { %5913 = vmatpush1.bf16.msra.mxu0 %v10182_v13  ;;  %v10248_v13 = vld [vmem:[#allocation2 + $0x1748] ss:$16 sps:$4 sm:$0xff]  }
 0x317   :  { %5814 = vmatpush2.bf16.msra.mxu1 %v10179_v22  ;;  %5914 = vmatprep.subr.bf16.mxu0 %v10190_v46  ;;  %v10245_v22 = vld [vmem:[#allocation2 + $0x15c8] ss:$16 sps:$4 sm:$0xff]   ;;  %v10256_v46 = vld [vmem:[#allocation2 + $0x172c] ss:$16 sps:$4 sm:$0xff]  }
 0x318   :  { %5815 = vmatprep.subr.bf16.mxu1 %v10187_v6  ;;  %v10253_v6 = vld [vmem:[#allocation2 + $0x15ac] ss:$16 sps:$4 sm:$0xff]  }
 0x31a   :  { %5915 = vmatpush1.bf16.msra.mxu0 %v10188_v53 }
 0x31b   :  { %5816 = vmatpush2.bf16.msra.mxu1 %v10185_v52  ;;  %5916 = vmatprep.subr.bf16.mxu0 %v10196_v51  ;;  %v10254_v51 = vld [vmem:[#allocation2 + $0x1728] ss:$16 sps:$4 sm:$0xff]  }
 0x31c   :  { %5867 = vmatprep.subr.bf16.mxu1 %v10193_v34  ;;  %v10251_v34 = vld [vmem:[#allocation2 + $0x15a8] ss:$16 sps:$4 sm:$0xff]  }
 0x31e   :  { %v5573_v31 = vpop.f32.mrf.mxu1  ;;  %5818 = vmatmul.mubr.bf16.vlgmr.msra.gmra.mxu1 %v10978_v5  ;;  %5917 = vmatpush1.bf16.msra.mxu0 %v10194_v18  ;;  %v10203_v5 = vld [vmem:[#allocation2 + $0x14a8] ss:$16 sps:$4 sm:$0xff]   ;;  %v10262_v18 = vld [vmem:[#allocation2 + $0x170c] ss:$16 sps:$4 sm:$0xff]  }
 0x31f   :  { %v5574_v59 = vadd.f32 %v5573_v31, %v11062_v40  ;;  %5868 = vmatpush1.bf16.msra.mxu1 %v10191_v11  ;;  %5918 = vmatprep.subr.bf16.mxu0 %v10202_v54  ;;  %v10206_v40 = vld [vmem:[#allocation2 + $0x1628] ss:$16 sps:$4 sm:$0xff]   ;;  %v10259_v11 = vld [vmem:[#allocation2 + $0x158c] ss:$16 sps:$4 sm:$0xff]  }
 0x320   :  { %v5575_v62 = vpop.f32.mrf.mxu1  ;;  %5869 = vmatprep.subr.bf16.mxu1 %v10199_v19  ;;  %5899 = vmatprep.mubr.bf16.mxu1 %v10986_v17  ;;  %v10220_v17 = vld [vmem:[#allocation2 + $0x17ec] ss:$16 sps:$4 sm:$0xff]   ;;  %v10257_v54 = vld [vmem:[#allocation2 + $0x1588] ss:$16 sps:$4 sm:$0xff]  }
 0x321   :  { %v5576_v21 = vadd.f32 %v5575_v62, %v11064_v44  ;;  %v11072_v9 = vadd.f32 %v5614_v28, %v5574_v59  ;;  %v10212_v44 = vld [vmem:[#allocation2 + $0x1608] ss:$16 sps:$4 sm:$0xff]   ;;  %v5998_v28 = vsub.s32 1, %v11077_v58  ;;  %v10265_v59 = vld [vmem:[#allocation2 + $0x156c] ss:$16 sps:$4 sm:$0xff]  }
 0x322   :  { %v5577_v0 = vpop.f32.mrf.mxu1  ;;  %5919 = vmatpush1.bf16.msra.mxu0 %v10200_v61  ;;  %v10260_v31 = vld [vmem:[#allocation2 + $0x1708] ss:$16 sps:$4 sm:$0xff]  }
 0x323   :  { %v11075_v1 = vadd.f32 %v5616_v42, %v5576_v21  ;;  %5870 = vmatpush1.bf16.msra.mxu1 %v10197_v60  ;;  %5920 = vmatprep.subr.bf16.mxu0 %v10208_v30  ;;  %v11080_v42 = vld [vmem:[#allocation4] sm:$0xf]  ;;  %v6025_v53 = vrot.slane %v11083_v56, %v5998_v28  ;;  %v10268_v60 = vld [vmem:[#allocation7 + $0x154] ss:$24 sps:$4 sm:$0xff]   ;;  %v10263_v61 = vld [vmem:[#allocation2 + $0x1568] ss:$16 sps:$4 sm:$0xff]  }
 0x324   :  { %v5578_v2 = vpop.f32.mrf.mxu1  ;;  %5871 = vmatprep.subr.bf16.mxu1 %v10205_v63  ;;  %v5999_v45 = vrot.slane %v11080_v42, %v5998_v28  ;;  %v10266_v62 = vld [vmem:[#allocation7 + $0x150] ss:$24 sps:$4 sm:$0xff]   ;;  %v10271_v63 = vld [vmem:[#allocation2 + $0x154c] ss:$16 sps:$4 sm:$0xff]  }
 0x325   :  { %v10274_v30 = vld [vmem:[#allocation7 + $0x124] ss:$24 sps:$4 sm:$0xff]  }
 0x326   :  { %5921 = vmatpush1.bf16.msra.mxu0 %v10206_v40  ;;  %v6013_v52 = vmul.f32 %v5999_v45, %v11056_v55  ;;  %v10272_v40 = vld [vmem:[#allocation7 + $0x120] ss:$24 sps:$4 sm:$0xff]   ;;  %v10277_v2 = vld [vmem:[#allocation2 + $0x152c] ss:$16 sps:$4 sm:$0xff]  }
 0x327   :  { %5872 = vmatpush1.bf16.msra.mxu1 %v10203_v5  ;;  %5922 = vmatprep.subr.bf16.mxu0 %v10214_v16  ;;  %v10269_v5 = vld [vmem:[#allocation2 + $0x1548] ss:$16 sps:$4 sm:$0xff]   ;;  %v10310_v45 = vld [vmem:[#allocation7 + $0x4] ss:$24 sps:$4 sm:$0xff]  }
 0x328   :  { %5873 = vmatprep.subr.bf16.mxu1 %v10211_v15  ;;  %v6039_v19 = vadd.f32 %v6025_v53, %v6013_v52  ;;  %v10280_v15 = vld [vmem:[#allocation7 + $0xf4] ss:$24 sps:$4 sm:$0xff]   ;;  %v10317_v53 = vld [vmem:[#allocation7 + $0x270] ss:$24 sps:$4 sm:$0xff]  }
 0x329   :  { %v10319_v52 = vld [vmem:[#allocation7 + $0x274] ss:$24 sps:$4 sm:$0xff]  }
 0x32a   :  { %5923 = vmatpush1.bf16.msra.mxu0 %v10212_v44  ;;  %v6043_v55 = vmax.f32 %v6039_v19, 0.0  ;;  %v10275_v44 = vld [vmem:[#allocation2 + $0x1528] ss:$16 sps:$4 sm:$0xff]  }
 0x32b   :  { %5874 = vmatpush1.bf16.msra.mxu1 %v10209_v43  ;;  %5924 = vmatprep.subr.bf16.mxu0 %v10220_v17  ;;  %v10286_v17 = vld [vmem:[#allocation7 + $0xc4] ss:$24 sps:$4 sm:$0xff]   ;;  %v10419_v19 = vld [vmem:[#allocation7 + $0x450] ss:$24 sps:$4 sm:$0xff]  }
 0x32c   :  { %5875 = vmatprep.subr.bf16.mxu1 %v10217_v12  ;;  %v11088_v21 = vpack.c.bf16 %v6043_v55, %v6043_v55  ;;  %v10278_v12 = vld [vmem:[#allocation7 + $0xf0] ss:$24 sps:$4 sm:$0xff]   ;;  %v10427_v55 = vld [vmem:[#allocation7 + $0x424] ss:$24 sps:$4 sm:$0xff]  }
 0x32e   :  { %5925 = vmatpush2.bf16.msra.mxu0 %v10218_v29  ;;  %v10281_v29 = vld [vmem:[#allocation2 + $0x1508] ss:$16 sps:$4 sm:$0xff]  }
 0x32f   :  { %5876 = vmatpush1.bf16.msra.mxu1 %v10215_v23  ;;  %5926 = vmatprep.subr.bf16.mxu0 %v10226_v4  ;;  %v10289_v4 = vld [vmem:[#allocation2 + $0x186c] ss:$16 sps:$4 sm:$0xff]  }
 0x330   :  { %5877 = vmatprep.subr.bf16.mxu1 %v10223_v3  ;;  %v10284_v3 = vld [vmem:[#allocation7 + $0xc0] ss:$24 sps:$4 sm:$0xff]  }
 0x332   :  { %5927 = vmatpush2.bf16.msra.mxu0 %v10224_v24  ;;  %v10287_v24 = vld [vmem:[#allocation2 + $0x1868] ss:$16 sps:$4 sm:$0xff]  }
 0x333   :  { %5878 = vmatpush1.bf16.msra.mxu1 %v10221_v49  ;;  %5928 = vmatprep.subr.bf16.mxu0 %v10232_v14  ;;  %v10292_v49 = vld [vmem:[#allocation7 + $0x94] ss:$24 sps:$4 sm:$0xff]  }
 0x334   :  { %5879 = vmatprep.subr.bf16.mxu1 %v10229_v50  ;;  %v10290_v50 = vld [vmem:[#allocation7 + $0x90] ss:$24 sps:$4 sm:$0xff]   ;;  %v10295_v14 = vld [vmem:[#allocation2 + $0x184c] ss:$16 sps:$4 sm:$0xff]  }
 0x336   :  { %5929 = vmatpush2.bf16.msra.mxu0 %v10230_v38 }
 0x337   :  { %5880 = vmatpush1.bf16.msra.mxu1 %v10227_v26  ;;  %5930 = vmatprep.subr.bf16.mxu0 %v10238_v36  ;;  %v10298_v26 = vld [vmem:[#allocation7 + $0x64] ss:$24 sps:$4 sm:$0xff]   ;;  %v10296_v36 = vld [vmem:[#allocation7 + $0x60] ss:$24 sps:$4 sm:$0xff]  }
 0x338   :  { %5881 = vmatprep.subr.bf16.mxu1 %v10235_v33  ;;  %v10293_v33 = vld [vmem:[#allocation2 + $0x1848] ss:$16 sps:$4 sm:$0xff]  }
 0x33a   :  { %5931 = vmatpush2.bf16.msra.mxu0 %v10236_v48  ;;  %v10301_v48 = vld [vmem:[#allocation2 + $0x182c] ss:$16 sps:$4 sm:$0xff]  }
 0x33b   :  { %5882 = vmatpush1.bf16.msra.mxu1 %v10233_v27  ;;  %5932 = vmatprep.subr.bf16.mxu0 %v10244_v10 }
 0x33c   :  { %5883 = vmatprep.subr.bf16.mxu1 %v10241_v25  ;;  %v10304_v25 = vld [vmem:[#allocation7 + $0x34] ss:$24 sps:$4 sm:$0xff]  }
 0x33e   :  { %5933 = vmatpush2.bf16.msra.mxu0 %v10242_v41 }
 0x33f   :  { %5884 = vmatpush2.bf16.msra.mxu1 %v10239_v37  ;;  %5934 = vmatprep.subr.bf16.mxu0 %v10250_v39  ;;  %v10307_v39 = vld [vmem:[#allocation2 + $0x180c] ss:$16 sps:$4 sm:$0xff]  }
 0x340   :  { %5885 = vmatprep.subr.bf16.mxu1 %v10247_v32 }
 0x342   :  { %5935 = vmatpush2.bf16.msra.mxu0 %v10248_v13  ;;  %v10313_v13 = vld [vmem:[#allocation7 + $0x2d4] ss:$24 sps:$4 sm:$0xff]  }
 0x343   :  { %5886 = vmatpush2.bf16.msra.mxu1 %v10245_v22  ;;  %5936 = vmatprep.subr.bf16.mxu0 %v10256_v46  ;;  %v10305_v22 = vld [vmem:[#allocation2 + $0x1808] ss:$16 sps:$4 sm:$0xff]  }
 0x344   :  { %5887 = vmatprep.subr.bf16.mxu1 %v10253_v6  ;;  %v10316_v6 = vld [vmem:[#allocation7 + $0x2a4] ss:$24 sps:$4 sm:$0xff]   ;;  %v10314_v46 = vld [vmem:[#allocation7 + $0x2a0] ss:$24 sps:$4 sm:$0xff]  }
 0x346   :  { %5937 = vmatpush2.bf16.msra.mxu0 %v10254_v51  ;;  %v5994_v51 = vsub.s32 0, %v11077_v58 }
 0x347   :  { %5888 = vmatpush2.bf16.msra.mxu1 %v10251_v34  ;;  %5938 = vmatprep.subr.bf16.mxu0 %v10262_v18  ;;  %v10322_v34 = vld [vmem:[#allocation7 + $0x244] ss:$24 sps:$4 sm:$0xff]   ;;  %v10325_v18 = vld [vmem:[#allocation7 + $0x214] ss:$24 sps:$4 sm:$0xff]  }
 0x348   :  { %5889 = vmatprep.subr.bf16.mxu1 %v10259_v11  ;;  %v10320_v11 = vld [vmem:[#allocation7 + $0x240] ss:$24 sps:$4 sm:$0xff]  }
 0x34a   :  { %5939 = vmatpush2.bf16.msra.mxu0 %v10260_v31  ;;  %v5995_v31 = vrot.slane %v11080_v42, %v5994_v51 }
 0x34b   :  { %5890 = vmatpush2.bf16.msra.mxu1 %v10257_v54  ;;  %7202 = vmatprep.subr.bf16.mxu0 %v10268_v60  ;;  %v10421_v54 = vld [vmem:[#allocation7 + $0x454] ss:$24 sps:$4 sm:$0xff]   ;;  %v10425_v60 = vld [vmem:[#allocation7 + $0x420] ss:$24 sps:$4 sm:$0xff]  }
 0x34c   :  { %5891 = vmatprep.subr.bf16.mxu1 %v10265_v59  ;;  %v10328_v59 = vld [vmem:[#allocation7 + $0x1e4] ss:$24 sps:$4 sm:$0xff]  }
 0x34d   :  { %5941 = vmatmul.mubr.bf16.vlgmr.msra.gmra.mxu0 %v11008_v8  ;;  %v5696_v0 = vpop.f32.mrf.mxu0  ;;  %v10283_v8 = vld [vmem:[#allocation2 + $0x150c] ss:$16 sps:$4 sm:$0xff]  }
 0x34e   :  { %7203 = vmatpush1.bf16.msra.mxu0 %v10266_v62  ;;  %7234 = vmatprep.mubr.bf16.mxu0 %v11088_v21  ;;  %v6021_v62 = vrot.slane %v11083_v56, %v5994_v51 }
 0x34f   :  { %5892 = vmatpush2.bf16.msra.mxu1 %v10263_v61  ;;  %v5698_v16 = vpop.f32.mrf.mxu0  ;;  %7204 = vmatprep.subr.bf16.mxu0 %v10274_v30  ;;  %v6012_v61 = vmul.f32 %v5995_v31, %v11054_v20  ;;  %v10331_v30 = vld [vmem:[#allocation7 + $0x1b4] ss:$24 sps:$4 sm:$0xff]  }
 0x350   :  { %5893 = vmatprep.subr.bf16.mxu1 %v10271_v63  ;;  %v10326_v63 = vld [vmem:[#allocation7 + $0x1e0] ss:$24 sps:$4 sm:$0xff]   ;;  %v10358_v31 = vld [vmem:[#allocation7 + $0xc] ss:$24 sps:$4 sm:$0xff]  }
 0x351   :  { %v5700_v43 = vpop.f32.mrf.mxu0 }
 0x352   :  { %7205 = vmatpush1.bf16.msra.mxu0 %v10272_v40  ;;  %v6038_v40 = vadd.f32 %v6021_v62, %v6012_v61  ;;  %v10439_v43 = vld [vmem:[#allocation7 + $0x3c4] ss:$24 sps:$4 sm:$0xff]   ;;  %v10467_v61 = vld [vmem:[#allocation7 + $0x510] ss:$24 sps:$4 sm:$0xff]  }
 0x353   :  { %5894 = vmatpush2.bf16.msra.mxu1 %v10269_v5  ;;  %7206 = vmatprep.subr.bf16.mxu0 %v10280_v15  ;;  %v5701_v23 = vpop.f32.mrf.mxu0  ;;  %v10433_v5 = vld [vmem:[#allocation7 + $0x3f4] ss:$24 sps:$4 sm:$0xff]   ;;  %v10334_v15 = vld [vmem:[#allocation7 + $0x184] ss:$24 sps:$4 sm:$0xff]   ;;  %v10359_v62 = vld [vmem:[#allocation7 + $0x2d8] ss:$24 sps:$4 sm:$0xff]  }
 0x354   :  { %5895 = vmatprep.subr.bf16.mxu1 %v10277_v2  ;;  %v10329_v2 = vld [vmem:[#allocation7 + $0x1b0] ss:$24 sps:$4 sm:$0xff]   ;;  %v6042_v20 = vmax.f32 %v6038_v40, 0.0  ;;  %v10367_v40 = vld [vmem:[#allocation7 + $0x27c] ss:$24 sps:$4 sm:$0xff]  }
 0x355   :  { %v10335_v23 = vld [vmem:[#allocation7 + $0x158] ss:$24 sps:$4 sm:$0xff]  }
 0x356   :  { %7207 = vmatpush1.bf16.msra.mxu0 %v10278_v12  ;;  %v10337_v12 = vld [vmem:[#allocation7 + $0x15c] ss:$24 sps:$4 sm:$0xff]  }
 0x357   :  { %5896 = vmatpush2.bf16.msra.mxu1 %v10275_v44  ;;  %7208 = vmatprep.subr.bf16.mxu0 %v10286_v17  ;;  %v10332_v44 = vld [vmem:[#allocation7 + $0x180] ss:$24 sps:$4 sm:$0xff]   ;;  %v10445_v17 = vld [vmem:[#allocation7 + $0x394] ss:$24 sps:$4 sm:$0xff]  }
 0x358   :  { %5897 = vmatprep.subr.bf16.mxu1 %v10283_v8  ;;  %v10443_v8 = vld [vmem:[#allocation7 + $0x390] ss:$24 sps:$4 sm:$0xff]  }
 0x35a   :  { %7209 = vmatpush1.bf16.msra.mxu0 %v10284_v3  ;;  %v10340_v3 = vld [vmem:[#allocation7 + $0x12c] ss:$24 sps:$4 sm:$0xff]  }
 0x35b   :  { %5898 = vmatpush2.bf16.msra.mxu1 %v10281_v29  ;;  %7210 = vmatprep.subr.bf16.mxu0 %v10292_v49  ;;  %v11105_v29 = vpack.c.bf16 %v6042_v20, %v6042_v20  ;;  %v10446_v49 = vld [vmem:[#allocation7 + $0x360] ss:$24 sps:$4 sm:$0xff]   ;;  %v10478_v20 = vld [vmem:[#allocation7 + $0x484] ss:$24 sps:$4 sm:$0xff]  }
 0x35c   :  { %5957 = vmatprep.subr.bf16.mxu1 %v10289_v4 }
 0x35e   :  { %v5655_v38 = vpop.f32.mrf.mxu1  ;;  %5900 = vmatmul.mubr.bf16.vlgmr.msra.gmra.mxu1 %v11004_v7  ;;  %7211 = vmatpush1.bf16.msra.mxu0 %v10290_v50  ;;  %v10299_v7 = vld [vmem:[#allocation2 + $0x1828] ss:$16 sps:$4 sm:$0xff]  }
 0x35f   :  { %v5656_v35 = vadd.f32 %v5655_v38, %v11072_v9  ;;  %5958 = vmatpush1.bf16.msra.mxu1 %v10287_v24  ;;  %7212 = vmatprep.subr.bf16.mxu0 %v10298_v26  ;;  %v10302_v9 = vld [vmem:[#allocation7 + $0x30] ss:$24 sps:$4 sm:$0xff]   ;;  %v10448_v24 = vld [vmem:[#allocation7 + $0x364] ss:$24 sps:$4 sm:$0xff]  }
 0x360   :  { %v5657_v27 = vpop.f32.mrf.mxu1  ;;  %5959 = vmatprep.subr.bf16.mxu1 %v10295_v14  ;;  %5981 = vmatprep.mubr.bf16.mxu1 %v10763_v47  ;;  %v10311_v47 = vld [vmem:[#allocation7 + $0x2d0] ss:$24 sps:$4 sm:$0xff]   ;;  %v10451_v14 = vld [vmem:[#allocation7 + $0x334] ss:$24 sps:$4 sm:$0xff]  }
 0x361   :  { %v5658_v10 = vadd.f32 %v5657_v27, %v11075_v1  ;;  %v11094_v28 = vadd.f32 %v5696_v0, %v5656_v35  ;;  %v10308_v1 = vld [vmem:[#allocation7] ss:$24 sps:$4 sm:$0xff]   ;;  %v10431_v0 = vld [vmem:[#allocation7 + $0x3f0] ss:$24 sps:$4 sm:$0xff]   ;;  %v10343_v26 = vld [vmem:[#allocation7 + $0xfc] ss:$24 sps:$4 sm:$0xff]  }
 0x362   :  { %v5659_v37 = vpop.f32.mrf.mxu1  ;;  %7213 = vmatpush1.bf16.msra.mxu0 %v10296_v36  ;;  %v10338_v50 = vld [vmem:[#allocation7 + $0x128] ss:$24 sps:$4 sm:$0xff]   ;;  %v10454_v36 = vld [vmem:[#allocation7 + $0x304] ss:$24 sps:$4 sm:$0xff]   ;;  %v10341_v27 = vld [vmem:[#allocation7 + $0xf8] ss:$24 sps:$4 sm:$0xff]  }
 0x363   :  { %v11097_v41 = vadd.f32 %v5698_v16, %v5658_v10  ;;  %5960 = vmatpush1.bf16.msra.mxu1 %v10293_v33  ;;  %7214 = vmatprep.subr.bf16.mxu0 %v10304_v25  ;;  %v10437_v16 = vld [vmem:[#allocation7 + $0x3c0] ss:$24 sps:$4 sm:$0xff]   ;;  %v10449_v35 = vld [vmem:[#allocation7 + $0x330] ss:$24 sps:$4 sm:$0xff]   ;;  %v10457_v37 = vld [vmem:[#allocation7 + $0x5d4] ss:$24 sps:$4 sm:$0xff]  }
 0x364   :  { %v5660_v32 = vpop.f32.mrf.mxu1  ;;  %5961 = vmatprep.subr.bf16.mxu1 %v10301_v48  ;;  %v10346_v48 = vld [vmem:[#allocation7 + $0xcc] ss:$24 sps:$4 sm:$0xff]   ;;  %v10452_v10 = vld [vmem:[#allocation7 + $0x300] ss:$24 sps:$4 sm:$0xff]  }
 0x365   :  { %v10455_v32 = vld [vmem:[#allocation7 + $0x5d0] ss:$24 sps:$4 sm:$0xff]  }
 0x366   :  { %7215 = vmatpush1.bf16.msra.mxu0 %v10302_v9  ;;  %v10349_v9 = vld [vmem:[#allocation7 + $0x9c] ss:$24 sps:$4 sm:$0xff]  }
 0x367   :  { %5962 = vmatpush1.bf16.msra.mxu1 %v10299_v7  ;;  %7216 = vmatprep.subr.bf16.mxu0 %v10310_v45  ;;  %v10344_v7 = vld [vmem:[#allocation7 + $0xc8] ss:$24 sps:$4 sm:$0xff]   ;;  %v10352_v45 = vld [vmem:[#allocation7 + $0x6c] ss:$24 sps:$4 sm:$0xff]  }
 0x368   :  { %5963 = vmatprep.subr.bf16.mxu1 %v10307_v39  ;;  %v10347_v39 = vld [vmem:[#allocation7 + $0x98] ss:$24 sps:$4 sm:$0xff]  }
 0x36a   :  { %7217 = vmatpush1.bf16.msra.mxu0 %v10308_v1  ;;  %v10460_v1 = vld [vmem:[#allocation7 + $0x5a4] ss:$24 sps:$4 sm:$0xff]  }
 0x36b   :  { %5964 = vmatpush1.bf16.msra.mxu1 %v10305_v22  ;;  %7218 = vmatprep.subr.bf16.mxu0 %v10313_v13 }
 0x36c   :  { %7243 = vmatprep.subr.bf16.mxu1 %v10421_v54  ;;  %v10461_v54 = vld [vmem:[#allocation7 + $0x570] ss:$24 sps:$4 sm:$0xff]  }
 0x36e   :  { %8790 = vmatmul.mubr.msk.bf16.vlgmr.msra.gmra.mxu1 %vm4920_vm0, %v11024_v57  ;;  %7219 = vmatpush2.bf16.msra.mxu0 %v10311_v47  ;;  %v10323_v57 = vld [vmem:[#allocation7 + $0x210] ss:$24 sps:$4 sm:$0xff]  }
 0x36f   :  { %7220 = vmatprep.subr.bf16.mxu0 %v10316_v6  ;;  %7244 = vmatpush1.bf16.msra.mxu1 %v10419_v19  ;;  %v10350_v47 = vld [vmem:[#allocation7 + $0x68] ss:$24 sps:$4 sm:$0xff]   ;;  %v10353_v19 = vld [vmem:[#allocation7 + $0x38] ss:$24 sps:$4 sm:$0xff]  }
 0x370   :  { %7245 = vmatprep.subr.bf16.mxu1 %v10427_v55  ;;  %v10458_v6 = vld [vmem:[#allocation7 + $0x5a0] ss:$24 sps:$4 sm:$0xff]   ;;  %v10361_v55 = vld [vmem:[#allocation7 + $0x2dc] ss:$24 sps:$4 sm:$0xff]  }
 0x372   :  { %7221 = vmatpush2.bf16.msra.mxu0 %v10314_v46 }
 0x373   :  { %7222 = vmatprep.subr.bf16.mxu0 %v10319_v52  ;;  %7246 = vmatpush1.bf16.msra.mxu1 %v10425_v60  ;;  %v10355_v52 = vld [vmem:[#allocation7 + $0x3c] ss:$24 sps:$4 sm:$0xff]  }
 0x374   :  { %7247 = vmatprep.subr.bf16.mxu1 %v10433_v5  ;;  %v10469_v60 = vld [vmem:[#allocation7 + $0x514] ss:$24 sps:$4 sm:$0xff]   ;;  %v10470_v5 = vld [vmem:[#allocation7 + $0x4e0] ss:$24 sps:$4 sm:$0xff]  }
 0x376   :  { %7223 = vmatpush2.bf16.msra.mxu0 %v10317_v53 }
 0x377   :  { %7224 = vmatprep.subr.bf16.mxu0 %v10322_v34  ;;  %7248 = vmatpush1.bf16.msra.mxu1 %v10431_v0  ;;  %v10362_v0 = vld [vmem:[#allocation7 + $0x2a8] ss:$24 sps:$4 sm:$0xff]  }
 0x378   :  { %7249 = vmatprep.subr.bf16.mxu1 %v10439_v43  ;;  %v10370_v43 = vld [vmem:[#allocation7 + $0x24c] ss:$24 sps:$4 sm:$0xff]  }
 0x37a   :  { %7225 = vmatpush2.bf16.msra.mxu0 %v10320_v11  ;;  %v10463_v11 = vld [vmem:[#allocation7 + $0x574] ss:$24 sps:$4 sm:$0xff]  }
 0x37b   :  { %7226 = vmatprep.subr.bf16.mxu0 %v10325_v18  ;;  %7250 = vmatpush1.bf16.msra.mxu1 %v10437_v16  ;;  %v10473_v16 = vld [vmem:[#allocation7 + $0x4b0] ss:$24 sps:$4 sm:$0xff]  }
 0x37c   :  { %7251 = vmatprep.subr.bf16.mxu1 %v10445_v17  ;;  %v10481_v17 = vld [vmem:[#allocation7 + $0x45c] ss:$24 sps:$4 sm:$0xff]  }
 0x37e   :  { %7227 = vmatpush2.bf16.msra.mxu0 %v10323_v57  ;;  %v10466_v57 = vld [vmem:[#allocation7 + $0x544] ss:$24 sps:$4 sm:$0xff]  }
 0x37f   :  { %7228 = vmatprep.subr.bf16.mxu0 %v10328_v59  ;;  %7252 = vmatpush1.bf16.msra.mxu1 %v10443_v8  ;;  %v10464_v59 = vld [vmem:[#allocation7 + $0x540] ss:$24 sps:$4 sm:$0xff]   ;;  %v10373_v8 = vld [vmem:[#allocation7 + $0x21c] ss:$24 sps:$4 sm:$0xff]  }
 0x380   :  { %7253 = vmatprep.subr.bf16.mxu1 %v10448_v24  ;;  %v10377_v24 = vld [vmem:[#allocation7 + $0x1b8] ss:$24 sps:$4 sm:$0xff]  }
 0x382   :  { %7229 = vmatpush2.bf16.msra.mxu0 %v10326_v63  ;;  %v10364_v63 = vld [vmem:[#allocation7 + $0x2ac] ss:$24 sps:$4 sm:$0xff]  }
 0x383   :  { %7230 = vmatprep.subr.bf16.mxu0 %v10331_v30  ;;  %7254 = vmatpush1.bf16.msra.mxu1 %v10446_v49  ;;  %v10472_v30 = vld [vmem:[#allocation7 + $0x4e4] ss:$24 sps:$4 sm:$0xff]  }
 0x384   :  { %7255 = vmatprep.subr.bf16.mxu1 %v10451_v14  ;;  %v10379_v49 = vld [vmem:[#allocation7 + $0x1bc] ss:$24 sps:$4 sm:$0xff]   ;;  %v10380_v14 = vld [vmem:[#allocation7 + $0x188] ss:$24 sps:$4 sm:$0xff]  }
 0x386   :  { %7231 = vmatpush2.bf16.msra.mxu0 %v10329_v2  ;;  %v10475_v2 = vld [vmem:[#allocation7 + $0x4b4] ss:$24 sps:$4 sm:$0xff]  }
 0x387   :  { %7232 = vmatprep.subr.bf16.mxu0 %v10334_v15  ;;  %7256 = vmatpush1.bf16.msra.mxu1 %v10449_v35  ;;  %v10365_v15 = vld [vmem:[#allocation7 + $0x278] ss:$24 sps:$4 sm:$0xff]   ;;  %v10388_v35 = vld [vmem:[#allocation7 + $0x134] ss:$24 sps:$4 sm:$0xff]  }
 0x388   :  { %7257 = vmatprep.subr.bf16.mxu1 %v10454_v36  ;;  %v10386_v36 = vld [vmem:[#allocation7 + $0x130] ss:$24 sps:$4 sm:$0xff]  }
 0x38a   :  { %7233 = vmatpush2.bf16.msra.mxu0 %v10332_v44  ;;  %v10368_v44 = vld [vmem:[#allocation7 + $0x248] ss:$24 sps:$4 sm:$0xff]  }
 0x38b   :  { %7284 = vmatprep.subr.bf16.mxu0 %v10337_v12  ;;  %7258 = vmatpush1.bf16.msra.mxu1 %v10452_v10  ;;  %v10476_v12 = vld [vmem:[#allocation7 + $0x480] ss:$24 sps:$4 sm:$0xff]  }
 0x38c   :  { %7259 = vmatprep.subr.bf16.mxu1 %v10457_v37  ;;  %v10389_v10 = vld [vmem:[#allocation7 + $0x100] ss:$24 sps:$4 sm:$0xff]   ;;  %v10394_v37 = vld [vmem:[#allocation7 + $0xd4] ss:$24 sps:$4 sm:$0xff]  }
 0x38d   :  { %7235 = vmatmul.mubr.bf16.vlgmr.msra.gmra.mxu0 %v11105_v29  ;;  %v5778_v4 = vpop.f32.mrf.mxu0 }
 0x38e   :  { %7285 = vmatpush1.bf16.msra.mxu0 %v10335_v23  ;;  %7316 = vmatprep.mubr.bf16.mxu0 %v11088_v21  ;;  %v10371_v23 = vld [vmem:[#allocation7 + $0x218] ss:$24 sps:$4 sm:$0xff]  }
 0x38f   :  { %7286 = vmatprep.subr.bf16.mxu0 %v10340_v3  ;;  %v5780_v38 = vpop.f32.mrf.mxu0  ;;  %7260 = vmatpush2.bf16.msra.mxu1 %v10455_v32  ;;  %v10376_v3 = vld [vmem:[#allocation7 + $0x1ec] ss:$24 sps:$4 sm:$0xff]  }
 0x390   :  { %7261 = vmatprep.subr.bf16.mxu1 %v10460_v1  ;;  %v10397_v32 = vld [vmem:[#allocation7 + $0xa4] ss:$24 sps:$4 sm:$0xff]   ;;  %v10398_v1 = vld [vmem:[#allocation7 + $0x70] ss:$24 sps:$4 sm:$0xff]  }
 0x391   :  { %v5782_v33 = vpop.f32.mrf.mxu0 }
 0x392   :  { %7287 = vmatpush1.bf16.msra.mxu0 %v10338_v50  ;;  %v10382_v50 = vld [vmem:[#allocation7 + $0x18c] ss:$24 sps:$4 sm:$0xff]  }
 0x393   :  { %7288 = vmatprep.subr.bf16.mxu0 %v10343_v26  ;;  %v5783_v25 = vpop.f32.mrf.mxu0  ;;  %7262 = vmatpush2.bf16.msra.mxu1 %v10458_v6  ;;  %v10385_v26 = vld [vmem:[#allocation7 + $0x164] ss:$24 sps:$4 sm:$0xff]  }
 0x394   :  { %7263 = vmatprep.subr.bf16.mxu1 %v10463_v11 }
 0x396   :  { %7289 = vmatpush1.bf16.msra.mxu0 %v10341_v27  ;;  %v10391_v27 = vld [vmem:[#allocation7 + $0x104] ss:$24 sps:$4 sm:$0xff]  }
 0x397   :  { %7290 = vmatprep.subr.bf16.mxu0 %v10346_v48  ;;  %7264 = vmatpush2.bf16.msra.mxu1 %v10461_v54  ;;  %v10404_v54 = vld [vmem:[#allocation7 + $0x10] ss:$24 sps:$4 sm:$0xff]  }
 0x398   :  { %7265 = vmatprep.subr.bf16.mxu1 %v10466_v57  ;;  %v10410_v57 = vld [vmem:[#allocation7 + $0x2b0] ss:$24 sps:$4 sm:$0xff]  }
 0x39a   :  { %7291 = vmatpush1.bf16.msra.mxu0 %v10344_v7 }
 0x39b   :  { %7292 = vmatprep.subr.bf16.mxu0 %v10349_v9  ;;  %7266 = vmatpush2.bf16.msra.mxu1 %v10464_v59  ;;  %v10392_v9 = vld [vmem:[#allocation7 + $0xd0] ss:$24 sps:$4 sm:$0xff]   ;;  %v10413_v59 = vld [vmem:[#allocation7 + $0x280] ss:$24 sps:$4 sm:$0xff]  }
 0x39c   :  { %7267 = vmatprep.subr.bf16.mxu1 %v10469_v60  ;;  %v10418_v60 = vld [vmem:[#allocation7 + $0x254] ss:$24 sps:$4 sm:$0xff]  }
 0x39e   :  { %v5737_v22 = vpop.f32.mrf.mxu1  ;;  %7293 = vmatpush1.bf16.msra.mxu0 %v10347_v39  ;;  %v10395_v39 = vld [vmem:[#allocation7 + $0xa0] ss:$24 sps:$4 sm:$0xff]  }
 0x39f   :  { %v5738_v13 = vadd.f32 %v5737_v22, %v11094_v28  ;;  %7294 = vmatprep.subr.bf16.mxu0 %v10352_v45  ;;  %7268 = vmatpush2.bf16.msra.mxu1 %v10467_v61  ;;  %v10400_v45 = vld [vmem:[#allocation7 + $0x74] ss:$24 sps:$4 sm:$0xff]   ;;  %v10422_v61 = vld [vmem:[#allocation7 + $0x220] ss:$24 sps:$4 sm:$0xff]  }
 0x3a0   :  { %v5739_v46 = vpop.f32.mrf.mxu1  ;;  %7269 = vmatprep.subr.bf16.mxu1 %v10472_v30  ;;  %v10436_v30 = vld [vmem:[#allocation7 + $0x1c4] ss:$24 sps:$4 sm:$0xff]  }
 0x3a1   :  { %v5740_v53 = vadd.f32 %v5739_v46, %v11097_v41  ;;  %v11111_v34 = vadd.f32 %v5778_v4, %v5738_v13  ;;  %v10356_v41 = vld [vmem:[#allocation7 + $0x8] ss:$24 sps:$4 sm:$0xff]  }
 0x3a2   :  { %v5741_v51 = vpop.f32.mrf.mxu1  ;;  %7295 = vmatpush1.bf16.msra.mxu0 %v10350_v47  ;;  %v10374_v4 = vld [vmem:[#allocation7 + $0x1e8] ss:$24 sps:$4 sm:$0xff]   ;;  %v10403_v47 = vld [vmem:[#allocation7 + $0x44] ss:$24 sps:$4 sm:$0xff]  }
 0x3a3   :  { %v11113_v18 = vadd.f32 %v5780_v38, %v5740_v53  ;;  %7296 = vmatprep.subr.bf16.mxu0 %v10355_v52  ;;  %7270 = vmatpush2.bf16.msra.mxu1 %v10470_v5  ;;  %v10383_v38 = vld [vmem:[#allocation7 + $0x160] ss:$24 sps:$4 sm:$0xff]   ;;  %v10442_v5 = vld [vmem:[#allocation7 + $0x194] ss:$24 sps:$4 sm:$0xff]  }
 0x3a4   :  { %v5742_v28 = vpop.f32.mrf.mxu1  ;;  %7271 = vmatprep.subr.bf16.mxu1 %v10475_v2  ;;  %v10401_v51 = vld [vmem:[#allocation7 + $0x40] ss:$24 sps:$4 sm:$0xff]  }
 0x3a5   :  { %v10409_v28 = vld [vmem:[#allocation7 + $0x2e4] ss:$24 sps:$4 sm:$0xff]  }
 0x3a6   :  { %7297 = vmatpush1.bf16.msra.mxu0 %v10353_v19  ;;  %v10406_v19 = vld [vmem:[#allocation7 + $0x14] ss:$24 sps:$4 sm:$0xff]  }
 0x3a7   :  { %7298 = vmatprep.subr.bf16.mxu0 %v10358_v31  ;;  %7272 = vmatpush2.bf16.msra.mxu1 %v10473_v16  ;;  %v10412_v31 = vld [vmem:[#allocation7 + $0x2b4] ss:$24 sps:$4 sm:$0xff]  }
 0x3a8   :  { %7273 = vmatprep.subr.bf16.mxu1 %v10478_v20 }
 0x3aa   :  { %7299 = vmatpush1.bf16.msra.mxu0 %v10356_v41  ;;  %v10416_v41 = vld [vmem:[#allocation7 + $0x250] ss:$24 sps:$4 sm:$0xff]  }
 0x3ab   :  { %7300 = vmatprep.subr.bf16.mxu0 %v10361_v55  ;;  %7274 = vmatpush2.bf16.msra.mxu1 %v10476_v12  ;;  %v10424_v55 = vld [vmem:[#allocation7 + $0x224] ss:$24 sps:$4 sm:$0xff]  }
 0x3ac   :  { %7325 = vmatprep.subr.bf16.mxu1 %v10481_v17 }
 0x3ae   :  { %7301 = vmatpush2.bf16.msra.mxu0 %v10359_v62  ;;  %v10430_v62 = vld [vmem:[#allocation7 + $0x1f4] ss:$24 sps:$4 sm:$0xff]  }
 0x3af   :  { %7302 = vmatprep.subr.bf16.mxu0 %v10364_v63  ;;  %v10428_v63 = vld [vmem:[#allocation7 + $0x1f0] ss:$24 sps:$4 sm:$0xff]  }
 0x3b2   :  { %7303 = vmatpush2.bf16.msra.mxu0 %v10362_v0  ;;  %v10434_v0 = vld [vmem:[#allocation7 + $0x1c0] ss:$24 sps:$4 sm:$0xff]  }
 0x3b3   :  { %7304 = vmatprep.subr.bf16.mxu0 %v10367_v40  ;;  %v10440_v40 = vld [vmem:[#allocation7 + $0x190] ss:$24 sps:$4 sm:$0xff]  }
 0x3b6   :  { %7305 = vmatpush2.bf16.msra.mxu0 %v10365_v15 }
 0x3b7   :  { %7306 = vmatprep.subr.bf16.mxu0 %v10370_v43 }
 0x3ba   :  { %7307 = vmatpush2.bf16.msra.mxu0 %v10368_v44 }
 0x3bb   :  { %7308 = vmatprep.subr.bf16.mxu0 %v10373_v8 }
 0x3be   :  { %7309 = vmatpush2.bf16.msra.mxu0 %v10371_v23  ;;  %v6002_v23 = vsub.s32 2, %v11077_v58 }
 0x3bf   :  { %7310 = vmatprep.subr.bf16.mxu0 %v10376_v3 }
 0x3c2   :  { %7311 = vmatpush2.bf16.msra.mxu0 %v10374_v4  ;;  %v6006_v4 = vsub.s32 3, %v11077_v58 }
 0x3c3   :  { %7312 = vmatprep.subr.bf16.mxu0 %v10379_v49 }
 0x3c6   :  { %7313 = vmatpush2.bf16.msra.mxu0 %v10377_v24  ;;  %v6003_v24 = vrot.slane %v11080_v42, %v6002_v23 }
 0x3c7   :  { %7314 = vmatprep.subr.bf16.mxu0 %v10382_v50 }
 0x3ca   :  { %7315 = vmatpush2.bf16.msra.mxu0 %v10380_v14 }
 0x3cb   :  { %7366 = vmatprep.subr.bf16.mxu0 %v10385_v26  ;;  %v6029_v26 = vrot.slane %v11083_v56, %v6002_v23  ;;  %v10520_v23 = vld [vmem:[#allocation7 + $0x4ec] ss:$24 sps:$4 sm:$0xff]  }
 0x3cd   :  { %7317 = vmatmul.mubr.bf16.vlgmr.msra.gmra.mxu0 %v11105_v29  ;;  %v5860_v33 = vpop.f32.mrf.mxu0 }
 0x3ce   :  { %7367 = vmatpush1.bf16.msra.mxu0 %v10383_v38  ;;  %7398 = vmatprep.mubr.bf16.mxu0 %v11088_v21  ;;  %v6007_v38 = vrot.slane %v11080_v42, %v6006_v4  ;;  %v10482_v42 = vld [vmem:[#allocation7 + $0x428] ss:$24 sps:$4 sm:$0xff]  }
 0x3cf   :  { %7368 = vmatprep.subr.bf16.mxu0 %v10388_v35  ;;  %v5862_v48 = vpop.f32.mrf.mxu0 }
 0x3d1   :  { %v5864_v25 = vpop.f32.mrf.mxu0 }
 0x3d2   :  { %7369 = vmatpush1.bf16.msra.mxu0 %v10386_v36 }
 0x3d3   :  { %7370 = vmatprep.subr.bf16.mxu0 %v10391_v27  ;;  %v5865_v7 = vpop.f32.mrf.mxu0  ;;  %v6033_v27 = vrot.slane %v11083_v56, %v6006_v4  ;;  %v10487_v56 = vld [vmem:[#allocation7 + $0x3fc] ss:$24 sps:$4 sm:$0xff]  }
 0x3d4   :  { %v10523_v4 = vld [vmem:[#allocation7 + $0x4bc] ss:$24 sps:$4 sm:$0xff]  }
 0x3d6   :  { %7371 = vmatpush1.bf16.msra.mxu0 %v10389_v10 }
 0x3d7   :  { %7372 = vmatprep.subr.bf16.mxu0 %v10394_v37 }
 0x3da   :  { %7373 = vmatpush1.bf16.msra.mxu0 %v10392_v9 }
 0x3db   :  { %7374 = vmatprep.subr.bf16.mxu0 %v10397_v32 }
 0x3de   :  { %v5819_v22 = vpop.f32.mrf.mxu1  ;;  %7375 = vmatpush1.bf16.msra.mxu0 %v10395_v39  ;;  %v10479_v39 = vld [vmem:[#allocation7 + $0x458] ss:$24 sps:$4 sm:$0xff]  }
 0x3df   :  { %v5820_v21 = vadd.f32 %v5819_v22, %v11111_v34  ;;  %7376 = vmatprep.subr.bf16.mxu0 %v10400_v45  ;;  %v10407_v34 = vld [vmem:[#allocation7 + $0x2e0] ss:$24 sps:$4 sm:$0xff]   ;;  %v10484_v22 = vld [vmem:[#allocation7 + $0x42c] ss:$24 sps:$4 sm:$0xff]  }
 0x3e0   :  { %v5821_v13 = vpop.f32.mrf.mxu1 }
 0x3e1   :  { %v5822_v6 = vadd.f32 %v5821_v13, %v11113_v18  ;;  %v5861_v46 = vadd.f32 %v5860_v33, %v5820_v21  ;;  %v10415_v18 = vld [vmem:[#allocation7 + $0x284] ss:$24 sps:$4 sm:$0xff]   ;;  %v10485_v21 = vld [vmem:[#allocation7 + $0x3f8] ss:$24 sps:$4 sm:$0xff]   ;;  %v10488_v13 = vld [vmem:[#allocation7 + $0x3c8] ss:$24 sps:$4 sm:$0xff]  }
 0x3e2   :  { %v5823_v52 = vpop.f32.mrf.mxu1  ;;  %7377 = vmatpush1.bf16.msra.mxu0 %v10398_v1  ;;  %v10490_v1 = vld [vmem:[#allocation7 + $0x3cc] ss:$24 sps:$4 sm:$0xff]  }
 0x3e3   :  { %v5863_v53 = vadd.f32 %v5862_v48, %v5822_v6  ;;  %7378 = vmatprep.subr.bf16.mxu0 %v10403_v47  ;;  %v10493_v47 = vld [vmem:[#allocation7 + $0x39c] ss:$24 sps:$4 sm:$0xff]   ;;  %v10491_v6 = vld [vmem:[#allocation7 + $0x398] ss:$24 sps:$4 sm:$0xff]   ;;  %v10494_v52 = vld [vmem:[#allocation7 + $0x368] ss:$24 sps:$4 sm:$0xff]  }
 0x3e4   :  { %v5824_v11 = vpop.f32.mrf.mxu1 }
 0x3e6   :  { %7379 = vmatpush1.bf16.msra.mxu0 %v10401_v51  ;;  %v10499_v51 = vld [vmem:[#allocation7 + $0x33c] ss:$24 sps:$4 sm:$0xff]  }
 0x3e7   :  { %7380 = vmatprep.subr.bf16.mxu0 %v10406_v19  ;;  %v10497_v19 = vld [vmem:[#allocation7 + $0x338] ss:$24 sps:$4 sm:$0xff]  }
 0x3ea   :  { %7381 = vmatpush1.bf16.msra.mxu0 %v10404_v54 }
 0x3eb   :  { %7382 = vmatprep.subr.bf16.mxu0 %v10409_v28  ;;  %v10502_v28 = vld [vmem:[#allocation7 + $0x30c] ss:$24 sps:$4 sm:$0xff]  }
 0x3ee   :  { %7383 = vmatpush2.bf16.msra.mxu0 %v10407_v34 }
 0x3ef   :  { %7384 = vmatprep.subr.bf16.mxu0 %v10412_v31  ;;  %v10575_v31 = vld [vmem:[#allocation9 + $0x78] sm:$0xff]  }
 0x3f2   :  { %7385 = vmatpush2.bf16.msra.mxu0 %v10410_v57  ;;  %v10576_v57 = vld [vmem:[#allocation9 + $0x38] sm:$0xff]  }
 0x3f3   :  { %7386 = vmatprep.subr.bf16.mxu0 %v10415_v18  ;;  %v10577_v18 = vld [vmem:[#allocation9 + $0x70] sm:$0xff]  }
 0x3f6   :  { %7387 = vmatpush2.bf16.msra.mxu0 %v10413_v59  ;;  %v10500_v59 = vld [vmem:[#allocation7 + $0x308] ss:$24 sps:$4 sm:$0xff]  }
 0x3f7   :  { %7388 = vmatprep.subr.bf16.mxu0 %v10418_v60  ;;  %v10505_v60 = vld [vmem:[#allocation7 + $0x5dc] ss:$24 sps:$4 sm:$0xff]  }
 0x3fa   :  { %7389 = vmatpush2.bf16.msra.mxu0 %v10416_v41  ;;  %v10578_v41 = vld [vmem:[#allocation9 + $0x30] sm:$0xff]  }
 0x3fb   :  { %7390 = vmatprep.subr.bf16.mxu0 %v10424_v55  ;;  %v10579_v55 = vld [vmem:[#allocation9 + $0x68] sm:$0xff]  }
 0x3fe   :  { %7391 = vmatpush2.bf16.msra.mxu0 %v10422_v61  ;;  %v10503_v61 = vld [vmem:[#allocation7 + $0x5d8] ss:$24 sps:$4 sm:$0xff]  }
 0x3ff   :  { %7392 = vmatprep.subr.bf16.mxu0 %v10430_v62  ;;  %v10508_v62 = vld [vmem:[#allocation7 + $0x5ac] ss:$24 sps:$4 sm:$0xff]  }
 0x402   :  { %7393 = vmatpush2.bf16.msra.mxu0 %v10428_v63  ;;  %v10580_v63 = vld [vmem:[#allocation9 + $0x28] sm:$0xff]  }
 0x403   :  { %7394 = vmatprep.subr.bf16.mxu0 %v10436_v30  ;;  %v10581_v30 = vld [vmem:[#allocation9 + $0x60] sm:$0xff]  }
 0x406   :  { %7395 = vmatpush2.bf16.msra.mxu0 %v10434_v0  ;;  %v10506_v0 = vld [vmem:[#allocation7 + $0x5a8] ss:$24 sps:$4 sm:$0xff]  }
 0x407   :  { %7396 = vmatprep.subr.bf16.mxu0 %v10442_v5  ;;  %v10511_v5 = vld [vmem:[#allocation7 + $0x57c] ss:$24 sps:$4 sm:$0xff]  }
 0x40a   :  { %7397 = vmatpush2.bf16.msra.mxu0 %v10440_v40  ;;  %v10582_v40 = vld [vmem:[#allocation9 + $0x20] sm:$0xff]  }
 0x40b   :  { %9032 = vmatprep.subr.bf16.mxu0 %v10575_v31  ;;  %v10565_v31 = vld [vmem:[#allocation7 + $0x524] ss:$24 sps:$4 sm:$0xff]  }
 0x40d   :  { %7399 = vmatmul.mubr.bf16.vlgmr.msra.gmra.mxu0 %v11105_v29  ;;  %v5942_v2 = vpop.f32.mrf.mxu0 }
 0x40e   :  { %9033 = vmatpush3.bf16.msra.mxu0 %v10576_v57  ;;  %v10563_v57 = vld [vmem:[#allocation7 + $0x520] ss:$24 sps:$4 sm:$0xff]  }
 0x40f   :  { %v5944_v15 = vpop.f32.mrf.mxu0  ;;  %9034 = vmatprep.subr.bf16.mxu0 %v10577_v18  ;;  %v10568_v18 = vld [vmem:[#allocation7 + $0x4f4] ss:$24 sps:$4 sm:$0xff]  }
 0x411   :  { %v5946_v16 = vpop.f32.mrf.mxu0 }
 0x412   :  { %9035 = vmatpush3.bf16.msra.mxu0 %v10578_v41  ;;  %v10514_v16 = vld [vmem:[#allocation7 + $0x54c] ss:$24 sps:$4 sm:$0xff]   ;;  %v10569_v41 = vld [vmem:[#allocation7 + $0x4c0] ss:$24 sps:$4 sm:$0xff]  }
 0x413   :  { %v5947_v43 = vpop.f32.mrf.mxu0  ;;  %9036 = vmatprep.subr.bf16.mxu0 %v10579_v55  ;;  %v10574_v55 = vld [vmem:[#allocation7 + $0x494] ss:$24 sps:$4 sm:$0xff]  }
 0x414   :  { %v10584_v43 = vld [vmem:[#allocation9 + $0x18] sm:$0xff]  }
 0x416   :  { %9037 = vmatpush3.bf16.msra.mxu0 %v10580_v63  ;;  %v10592_v63 = vld [vmem:[#allocation9 + $0xb8] sm:$0xff]  }
 0x417   :  { %9038 = vmatprep.subr.bf16.mxu0 %v10581_v30  ;;  %v10593_v30 = vld [vmem:[#allocation9 + $0xf0] sm:$0xff]  }
 0x41a   :  { %9039 = vmatpush3.bf16.msra.mxu0 %v10582_v40  ;;  %v10596_v40 = vld [vmem:[#allocation9 + $0xa8] sm:$0xff]  }
 0x41e   :  { %v5901_v20 = vpop.f32.mrf.mxu1 }
 0x41f   :  { %v5902_v17 = vadd.f32 %v5901_v20, %v5861_v46  ;;  %v10496_v46 = vld [vmem:[#allocation7 + $0x36c] ss:$24 sps:$4 sm:$0xff]   ;;  %v10585_v20 = vld [vmem:[#allocation9 + $0x50] sm:$0xff]  }
 0x420   :  { %v5903_v44 = vpop.f32.mrf.mxu1 }
 0x421   :  { %v5904_v3 = vadd.f32 %v5903_v44, %v5863_v53  ;;  %v5943_v49 = vadd.f32 %v5942_v2, %v5902_v17  ;;  %v10583_v2 = vld [vmem:[#allocation9 + $0x58] sm:$0xff]   ;;  %v10512_v44 = vld [vmem:[#allocation7 + $0x548] ss:$24 sps:$4 sm:$0xff]  }
 0x422   :  { %v5905_v12 = vpop.f32.mrf.mxu1  ;;  %9040 = vmatprep.subr.bf16.mxu0 %v10583_v2  ;;  %v10515_v17 = vld [vmem:[#allocation7 + $0x518] ss:$24 sps:$4 sm:$0xff]   ;;  %v10597_v2 = vld [vmem:[#allocation9 + $0xe0] sm:$0xff]  }
 0x423   :  { %v5945_v14 = vadd.f32 %v5944_v15, %v5904_v3  ;;  %v10509_v15 = vld [vmem:[#allocation7 + $0x578] ss:$24 sps:$4 sm:$0xff]   ;;  %v10517_v12 = vld [vmem:[#allocation7 + $0x51c] ss:$24 sps:$4 sm:$0xff]   ;;  %9041 = vmatpush3.bf16.msra.mxu0 %v10584_v43  ;;  %v10518_v3 = vld [vmem:[#allocation7 + $0x4e8] ss:$24 sps:$4 sm:$0xff]  }
 0x424   :  { %v5906_v8 = vpop.f32.mrf.mxu1  ;;  %9042 = vmatprep.subr.bf16.mxu0 %v10585_v20  ;;  %v10607_v43 = vld [vmem:[#allocation9 + $0x178] sm:$0xff]  }
 0x425   :  { %v10586_v8 = vld [vmem:[#allocation9 + $0x10] sm:$0xff]   ;;  %v10600_v20 = vld [vmem:[#allocation9 + $0x98] sm:$0xff]  }
 0x427   :  { %9043 = vmatpush3.bf16.msra.mxu0 %v10586_v8  ;;  %v10603_v8 = vld [vmem:[#allocation9 + $0xc8] sm:$0xff]  }
 0x42e   :  { %v5983_v50 = vpop.f32.mrf.mxu1 }
 0x42f   :  { %v5984_v29 = vadd.f32 %v5983_v50, %v5943_v49  ;;  %v10521_v49 = vld [vmem:[#allocation7 + $0x4b8] ss:$24 sps:$4 sm:$0xff]   ;;  %v10524_v50 = vld [vmem:[#allocation7 + $0x488] ss:$24 sps:$4 sm:$0xff]  }
 0x430   :  { %v5985_v35 = vpop.f32.mrf.mxu1 }
 0x431   :  { %v6014_v33 = vmul.f32 %v6003_v24, %v5984_v29  ;;  %v5986_v36 = vadd.f32 %v5985_v35, %v5945_v14  ;;  %v10526_v24 = vld [vmem:[#allocation7 + $0x48c] ss:$24 sps:$4 sm:$0xff]   ;;  %v10527_v29 = vld [vmem:[#allocation7 + $0x460] ss:$24 sps:$4 sm:$0xff]  }
 0x432   :  { %v5987_v48 = vpop.f32.mrf.mxu1  ;;  %v10529_v14 = vld [vmem:[#allocation7 + $0x464] ss:$24 sps:$4 sm:$0xff]   ;;  %v10587_v35 = vld [vmem:[#allocation9 + $0x48] sm:$0xff]  }
 0x433   :  { %v6040_v25 = vadd.f32 %v6029_v26, %v6014_v33  ;;  %v6015_v10 = vmul.f32 %v6007_v38, %v5986_v36  ;;  %v10532_v26 = vld [vmem:[#allocation7 + $0x434] ss:$24 sps:$4 sm:$0xff]   ;;  %v10530_v38 = vld [vmem:[#allocation7 + $0x430] ss:$24 sps:$4 sm:$0xff]   ;;  %v10535_v33 = vld [vmem:[#allocation7 + $0x404] ss:$24 sps:$4 sm:$0xff]   ;;  %9044 = vmatprep.subr.bf16.mxu0 %v10587_v35 }
 0x434   :  { %v5988_v37 = vpop.f32.mrf.mxu1  ;;  %v10588_v36 = vld [vmem:[#allocation9 + $0x8] sm:$0xff]   ;;  %v10589_v48 = vld [vmem:[#allocation9 + $0x40] sm:$0xff]  }
 0x435   :  { %v6041_v58 = vadd.f32 %v6033_v27, %v6015_v10  ;;  %v6044_v7 = vmax.f32 %v6040_v25, 0.0  ;;  %9045 = vmatpush3.bf16.msra.mxu0 %v10588_v36  ;;  %v10533_v27 = vld [vmem:[#allocation7 + $0x400] ss:$24 sps:$4 sm:$0xff]   ;;  %v10538_v25 = vld [vmem:[#allocation7 + $0x3d4] ss:$24 sps:$4 sm:$0xff]  }
 0x436   :  { %v10590_v10 = vld [vmem:[#allocation9] sm:$0xff]   ;;  %9046 = vmatprep.subr.bf16.mxu0 %v10589_v48  ;;  %v10536_v37 = vld [vmem:[#allocation7 + $0x3d0] ss:$24 sps:$4 sm:$0xff]   ;;  %v10608_v48 = vld [vmem:[#allocation9 + $0x138] sm:$0xff]  }
 0x437   :  { %v6045_v9 = vmax.f32 %v6041_v58, 0.0  ;;  %v11128_v45 = vpack.c.bf16 %v6044_v7, %v6044_v7  ;;  %v10541_v58 = vld [vmem:[#allocation7 + $0x3a4] ss:$24 sps:$4 sm:$0xff]   ;;  %v10539_v7 = vld [vmem:[#allocation7 + $0x3a0] ss:$24 sps:$4 sm:$0xff]  }
 0x439   :  { %v11126_v32 = vpack.c.bf16 %v6045_v9, %v6045_v9  ;;  %9047 = vmatpush3.bf16.msra.mxu0 %v10590_v10  ;;  %v10544_v9 = vld [vmem:[#allocation7 + $0x374] ss:$24 sps:$4 sm:$0xff]  }
 0x43a   :  { %9076 = vmatprep.subr.bf16.mxu0 %v10607_v43  ;;  %v10609_v10 = vld [vmem:[#allocation9 + $0x170] sm:$0xff]  }
 0x43b   :  { %7275 = vmatprep.mubr.bf16.mxu1 %v11126_v32 }
 0x43c   :  { %7276 = vmatmul.mubr.bf16.vlgmr.msra.gmra.mxu1 %v11128_v45 }
 0x43d   :  { %7326 = vmatpush1.bf16.msra.mxu1 %v10479_v39  ;;  %7357 = vmatprep.mubr.bf16.mxu1 %v11126_v32 }
 0x43e   :  { %7327 = vmatprep.subr.bf16.mxu1 %v10484_v22  ;;  %v10547_v22 = vld [vmem:[#allocation7 + $0x344] ss:$24 sps:$4 sm:$0xff]  }
 0x441   :  { %7328 = vmatpush1.bf16.msra.mxu1 %v10482_v42 }
 0x442   :  { %7329 = vmatprep.subr.bf16.mxu1 %v10487_v56  ;;  %v10545_v56 = vld [vmem:[#allocation7 + $0x340] ss:$24 sps:$4 sm:$0xff]  }
 0x445   :  { %7330 = vmatpush1.bf16.msra.mxu1 %v10485_v21 }
 0x446   :  { %7331 = vmatprep.subr.bf16.mxu1 %v10490_v1  ;;  %v10550_v1 = vld [vmem:[#allocation7 + $0x314] ss:$24 sps:$4 sm:$0xff]  }
 0x449   :  { %7332 = vmatpush1.bf16.msra.mxu1 %v10488_v13 }
 0x44a   :  { %7333 = vmatprep.subr.bf16.mxu1 %v10493_v47  ;;  %v10548_v47 = vld [vmem:[#allocation7 + $0x310] ss:$24 sps:$4 sm:$0xff]  }
 0x44d   :  { %7334 = vmatpush1.bf16.msra.mxu1 %v10491_v6  ;;  %v11133_v53 = vpop.f32.mrf.mxu0  ;;  %v10553_v6 = vld [vmem:[#allocation7 + $0x5e4] ss:$24 sps:$4 sm:$0xff]  }
 0x44e   :  { %7335 = vmatprep.subr.bf16.mxu1 %v10496_v46  ;;  %v10551_v46 = vld [vmem:[#allocation7 + $0x5e0] ss:$24 sps:$4 sm:$0xff]  }
 0x44f   :  { %v11135_v11 = vpop.f32.mrf.mxu0 }
 0x451   :  { %7336 = vmatpush1.bf16.msra.mxu1 %v10494_v52  ;;  %v7240_v54 = vpop.f32.mrf.mxu0  ;;  %v10556_v52 = vld [vmem:[#allocation7 + $0x5b4] ss:$24 sps:$4 sm:$0xff]  }
 0x452   :  { %7337 = vmatprep.subr.bf16.mxu1 %v10499_v51  ;;  %v10554_v51 = vld [vmem:[#allocation7 + $0x5b0] ss:$24 sps:$4 sm:$0xff]   ;;  %v10557_v54 = vld [vmem:[#allocation7 + $0x580] ss:$24 sps:$4 sm:$0xff]  }
 0x453   :  { %v7241_v34 = vpop.f32.mrf.mxu0 }
 0x454   :  { %v10560_v34 = vld [vmem:[#allocation7 + $0x550] ss:$24 sps:$4 sm:$0xff]  }
 0x455   :  { %7338 = vmatpush1.bf16.msra.mxu1 %v10497_v19  ;;  %v10559_v19 = vld [vmem:[#allocation7 + $0x584] ss:$24 sps:$4 sm:$0xff]  }
 0x456   :  { %7339 = vmatprep.subr.bf16.mxu1 %v10502_v28  ;;  %v10562_v28 = vld [vmem:[#allocation7 + $0x554] ss:$24 sps:$4 sm:$0xff]  }
 0x459   :  { %7340 = vmatpush1.bf16.msra.mxu1 %v10500_v59  ;;  %v10566_v59 = vld [vmem:[#allocation7 + $0x4f0] ss:$24 sps:$4 sm:$0xff]  }
 0x45a   :  { %7341 = vmatprep.subr.bf16.mxu1 %v10505_v60  ;;  %v10571_v60 = vld [vmem:[#allocation7 + $0x4c4] ss:$24 sps:$4 sm:$0xff]  }
 0x45d   :  { %7342 = vmatpush2.bf16.msra.mxu1 %v10503_v61  ;;  %v10572_v61 = vld [vmem:[#allocation7 + $0x490] ss:$24 sps:$4 sm:$0xff]  }
 0x45e   :  { %7343 = vmatprep.subr.bf16.mxu1 %v10508_v62  ;;  %v10591_v62 = vld [vmem:[#allocation9 + $0xf8] sm:$0xff]  }
 0x461   :  { %7344 = vmatpush2.bf16.msra.mxu1 %v10506_v0  ;;  %v10594_v0 = vld [vmem:[#allocation9 + $0xb0] sm:$0xff]  }
 0x462   :  { %7345 = vmatprep.subr.bf16.mxu1 %v10511_v5  ;;  %v10595_v5 = vld [vmem:[#allocation9 + $0xe8] sm:$0xff]  }
 0x465   :  { %7346 = vmatpush2.bf16.msra.mxu1 %v10509_v15  ;;  %v10598_v15 = vld [vmem:[#allocation9 + $0xa0] sm:$0xff]  }
 0x466   :  { %7347 = vmatprep.subr.bf16.mxu1 %v10514_v16  ;;  %v10599_v16 = vld [vmem:[#allocation9 + $0xd8] sm:$0xff]  }
 0x469   :  { %7348 = vmatpush2.bf16.msra.mxu1 %v10512_v44  ;;  %v10601_v44 = vld [vmem:[#allocation9 + $0xd0] sm:$0xff]  }
 0x46a   :  { %7349 = vmatprep.subr.bf16.mxu1 %v10517_v12 }
 0x46d   :  { %7350 = vmatpush2.bf16.msra.mxu1 %v10515_v17 }
 0x46e   :  { %7351 = vmatprep.subr.bf16.mxu1 %v10520_v23  ;;  %v10604_v23 = vld [vmem:[#allocation9 + $0x88] sm:$0xff]  }
 0x471   :  { %7352 = vmatpush2.bf16.msra.mxu1 %v10518_v3 }
 0x472   :  { %7353 = vmatprep.subr.bf16.mxu1 %v10523_v4  ;;  %v10605_v4 = vld [vmem:[#allocation9 + $0xc0] sm:$0xff]  }
 0x475   :  { %7354 = vmatpush2.bf16.msra.mxu1 %v10521_v49 }
 0x476   :  { %7355 = vmatprep.subr.bf16.mxu1 %v10526_v24  ;;  %v10606_v24 = vld [vmem:[#allocation9 + $0x80] sm:$0xff]  }
 0x479   :  { %7356 = vmatpush2.bf16.msra.mxu1 %v10524_v50 }
 0x47a   :  { %7407 = vmatprep.subr.bf16.mxu1 %v10529_v14 }
 0x47c   :  { %7358 = vmatmul.mubr.bf16.vlgmr.msra.gmra.mxu1 %v11128_v45 }
 0x47d   :  { %7408 = vmatpush1.bf16.msra.mxu1 %v10527_v29  ;;  %7439 = vmatprep.mubr.bf16.mxu1 %v11126_v32  ;;  %v10542_v32 = vld [vmem:[#allocation7 + $0x370] ss:$24 sps:$4 sm:$0xff]  }
 0x47e   :  { %7409 = vmatprep.subr.bf16.mxu1 %v10532_v26 }
 0x481   :  { %7410 = vmatpush1.bf16.msra.mxu1 %v10530_v38 }
 0x482   :  { %7411 = vmatprep.subr.bf16.mxu1 %v10535_v33 }
 0x485   :  { %7412 = vmatpush1.bf16.msra.mxu1 %v10533_v27 }
 0x486   :  { %7413 = vmatprep.subr.bf16.mxu1 %v10538_v25 }
 0x489   :  { %7414 = vmatpush1.bf16.msra.mxu1 %v10536_v37  ;;  %v10610_v37 = vld [vmem:[#allocation9 + $0x130] sm:$0xff]  }
 0x48a   :  { %7415 = vmatprep.subr.bf16.mxu1 %v10541_v58  ;;  %v10611_v58 = vld [vmem:[#allocation9 + $0x168] sm:$0xff]  }
 0x48d   :  { %7416 = vmatpush1.bf16.msra.mxu1 %v10539_v7  ;;  %v11139_v39 = vpop.f32.mrf.mxu0  ;;  %v10612_v7 = vld [vmem:[#allocation9 + $0x128] sm:$0xff]  }
 0x48e   :  { %7417 = vmatprep.subr.bf16.mxu1 %v10544_v9  ;;  %v10615_v9 = vld [vmem:[#allocation9 + $0x158] sm:$0xff]  }
 0x48f   :  { %v11141_v42 = vpop.f32.mrf.mxu0 }
 0x491   :  { %7418 = vmatpush1.bf16.msra.mxu1 %v10542_v32  ;;  %v7322_v21 = vpop.f32.mrf.mxu0  ;;  %v10616_v32 = vld [vmem:[#allocation9 + $0x118] sm:$0xff]  }
 0x492   :  { %7419 = vmatprep.subr.bf16.mxu1 %v10547_v22  ;;  %v10617_v22 = vld [vmem:[#allocation9 + $0x150] sm:$0xff]   ;;  %v10619_v21 = vld [vmem:[#allocation9 + $0x148] sm:$0xff]  }
 0x493   :  { %v7323_v13 = vpop.f32.mrf.mxu0 }
 0x494   :  { %v10621_v13 = vld [vmem:[#allocation9 + $0x140] sm:$0xff]  }
 0x495   :  { %7420 = vmatpush1.bf16.msra.mxu1 %v10545_v56  ;;  %v10618_v56 = vld [vmem:[#allocation9 + $0x110] sm:$0xff]  }
 0x496   :  { %7421 = vmatprep.subr.bf16.mxu1 %v10550_v1  ;;  %v10620_v1 = vld [vmem:[#allocation9 + $0x108] sm:$0xff]  }
 0x499   :  { %7422 = vmatpush1.bf16.msra.mxu1 %v10548_v47  ;;  %v10622_v47 = vld [vmem:[#allocation9 + $0x100] sm:$0xff]  }
 0x49a   :  { %7423 = vmatprep.subr.bf16.mxu1 %v10553_v6 }
 0x49d   :  { %7424 = vmatpush2.bf16.msra.mxu1 %v10551_v46 }
 0x49e   :  { %7425 = vmatprep.subr.bf16.mxu1 %v10556_v52 }
 0x4a1   :  { %7426 = vmatpush2.bf16.msra.mxu1 %v10554_v51 }
 0x4a2   :  { %7427 = vmatprep.subr.bf16.mxu1 %v10559_v19 }
 0x4a5   :  { %7428 = vmatpush2.bf16.msra.mxu1 %v10557_v54 }
 0x4a6   :  { %7429 = vmatprep.subr.bf16.mxu1 %v10562_v28 }
 0x4a9   :  { %7430 = vmatpush2.bf16.msra.mxu1 %v10560_v34 }
 0x4aa   :  { %7431 = vmatprep.subr.bf16.mxu1 %v10565_v31 }
 0x4ad   :  { %7432 = vmatpush2.bf16.msra.mxu1 %v10563_v57 }
 0x4ae   :  { %7433 = vmatprep.subr.bf16.mxu1 %v10568_v18 }
 0x4b1   :  { %7434 = vmatpush2.bf16.msra.mxu1 %v10566_v59 }
 0x4b2   :  { %7435 = vmatprep.subr.bf16.mxu1 %v10571_v60 }
 0x4b5   :  { %7436 = vmatpush2.bf16.msra.mxu1 %v10569_v41 }
 0x4b6   :  { %7437 = vmatprep.subr.bf16.mxu1 %v10574_v55 }
 0x4b9   :  { %7438 = vmatpush2.bf16.msra.mxu1 %v10572_v61 }
 0x4ba   :  { %9054 = vmatprep.subr.bf16.mxu1 %v10591_v62 }
 0x4bc   :  { %7440 = vmatmul.mubr.bf16.vlgmr.msra.gmra.mxu1 %v11128_v45  ;;  %v10602_v45 = vld [vmem:[#allocation9 + $0x90] sm:$0xff]  }
 0x4bd   :  { %9055 = vmatpush3.bf16.msra.mxu1 %v10592_v63 }
 0x4be   :  { %9056 = vmatprep.subr.bf16.mxu1 %v10593_v30 }
 0x4c1   :  { %9057 = vmatpush3.bf16.msra.mxu1 %v10594_v0 }
 0x4c2   :  { %9058 = vmatprep.subr.bf16.mxu1 %v10595_v5 }
 0x4c5   :  { %9059 = vmatpush3.bf16.msra.mxu1 %v10596_v40 }
 0x4c6   :  { %9060 = vmatprep.subr.bf16.mxu1 %v10597_v2 }
 0x4c9   :  { %9061 = vmatpush3.bf16.msra.mxu1 %v10598_v15  ;;  %v8983_v15 = vld [vmem:[#allocation10] ss:$0 sm:$0xff] }
 0x4ca   :  { %9062 = vmatprep.subr.bf16.mxu1 %v10599_v16 }
 0x4cd   :  { %9063 = vmatpush3.bf16.msra.mxu1 %v10600_v20  ;;  %v11144_v12 = vpop.f32.mrf.mxu0 }
 0x4ce   :  { %9064 = vmatprep.subr.bf16.mxu1 %v10601_v44 }
 0x4cf   :  { %v11146_v17 = vpop.f32.mrf.mxu0 }
 0x4d1   :  { %9065 = vmatpush3.bf16.msra.mxu1 %v10602_v45  ;;  %v7404_v3 = vpop.f32.mrf.mxu0 }
 0x4d2   :  { %9066 = vmatprep.subr.bf16.mxu1 %v10603_v8 }
 0x4d3   :  { %v7405_v49 = vpop.f32.mrf.mxu0 }
 0x4d5   :  { %9067 = vmatpush3.bf16.msra.mxu1 %v10604_v23 }
 0x4d6   :  { %9068 = vmatprep.subr.bf16.mxu1 %v10605_v4 }
 0x4d9   :  { %9069 = vmatpush3.bf16.msra.mxu1 %v10606_v24 }
 0x4fc   :  { %v7277_v50 = vpop.f32.mrf.mxu1 }
 0x4fd   :  { %v7278_v14 = vadd.f32 %v7277_v50, %v11133_v53  ;;  %v10613_v53 = vld [vmem:[#allocation9 + $0x160] sm:$0xff]  }
 0x4fe   :  { %v7279_v29 = vpop.f32.mrf.mxu1 }
 0x4ff   :  { %v7280_v26 = vadd.f32 %v7279_v29, %v11135_v11  ;;  %v7448_v38 = vmax.f32 %v7278_v14, 0.0  ;;  %v10614_v11 = vld [vmem:[#allocation9 + $0x120] sm:$0xff]  }
 0x500   :  { %v7281_v35 = vpop.f32.mrf.mxu1 }
 0x501   :  { %v7449_v33 = vmax.f32 %v7280_v26, 0.0  ;;  %v7454_v25 = vpack.c.bf16 %v7448_v38, %v7448_v38 }
 0x502   :  { %v7282_v36 = vpop.f32.mrf.mxu1 }
 0x503   :  { %v7455_v27 = vpack.c.bf16 %v7449_v33, %v7449_v33 }
 0x505   :  { %7883 = vmatprep.mubr.bf16.mxu0 %v7455_v27 }
 0x506   :  { %7884 = vmatmul.mubr.bf16.vlgmr.msra.gmra.mxu0 %v7454_v25 }
 0x507   :  { %9077 = vmatpush3.bf16.msra.mxu0 %v10608_v48 }
 0x508   :  { %9078 = vmatprep.subr.bf16.mxu0 %v10609_v10 }
 0x50b   :  { %9079 = vmatpush3.bf16.msra.mxu0 %v10610_v37 }
 0x50c   :  { %9080 = vmatprep.subr.bf16.mxu0 %v10611_v58 }
 0x50f   :  { %9081 = vmatpush3.bf16.msra.mxu0 %v10612_v7 }
 0x510   :  { %9082 = vmatprep.subr.bf16.mxu0 %v10613_v53 }
 0x513   :  { %9083 = vmatpush3.bf16.msra.mxu0 %v10614_v11 }
 0x514   :  { %9084 = vmatprep.subr.bf16.mxu0 %v10615_v9 }
 0x517   :  { %9085 = vmatpush3.bf16.msra.mxu0 %v10616_v32 }
 0x518   :  { %9086 = vmatprep.subr.bf16.mxu0 %v10617_v22 }
 0x51b   :  { %9087 = vmatpush3.bf16.msra.mxu0 %v10618_v56 }
 0x51c   :  { %9088 = vmatprep.subr.bf16.mxu0 %v10619_v21 }
 0x51f   :  { %9089 = vmatpush3.bf16.msra.mxu0 %v10620_v1 }
 0x520   :  { %9090 = vmatprep.subr.bf16.mxu0 %v10621_v13 }
 0x523   :  { %9091 = vmatpush3.bf16.msra.mxu0 %v10622_v47 }
 0x53c   :  { %v7359_v6 = vpop.f32.mrf.mxu1 }
 0x53d   :  { %v7360_v46 = vadd.f32 %v7359_v6, %v11139_v39 }
 0x53e   :  { %v7361_v52 = vpop.f32.mrf.mxu1 }
 0x53f   :  { %v7362_v51 = vadd.f32 %v7361_v52, %v11141_v42  ;;  %v7450_v19 = vmax.f32 %v7360_v46, 0.0 }
 0x540   :  { %v7363_v54 = vpop.f32.mrf.mxu1 }
 0x541   :  { %v7451_v28 = vmax.f32 %v7362_v51, 0.0  ;;  %v7456_v57 = vpack.c.bf16 %v7450_v19, %v7450_v19 }
 0x542   :  { %v7364_v34 = vpop.f32.mrf.mxu1 }
 0x543   :  { %v7457_v31 = vpack.c.bf16 %v7451_v28, %v7451_v28 }
 0x545   :  { %7923 = vmatprep.mubr.bf16.mxu1 %v7457_v31 }
 0x546   :  { %7924 = vmatmul.mubr.bf16.vlgmr.msra.gmra.mxu1 %v7456_v57 }
 0x57c   :  { %v7441_v18 = vpop.f32.mrf.mxu1 }
 0x57d   :  { %v7442_v59 = vadd.f32 %v7441_v18, %v11144_v12 }
 0x57e   :  { %v7443_v60 = vpop.f32.mrf.mxu1 }
 0x57f   :  { %v7444_v41 = vadd.f32 %v7443_v60, %v11146_v17  ;;  %v7452_v55 = vmax.f32 %v7442_v59, 0.0 }
 0x580   :  { %v7445_v61 = vpop.f32.mrf.mxu1 }
 0x581   :  { %v7453_v39 = vmax.f32 %v7444_v41, 0.0  ;;  %v7458_v42 = vpack.c.bf16 %v7452_v55, %v7452_v55 }
 0x582   :  { %v7446_v62 = vpop.f32.mrf.mxu1 }
 0x583   :  { %v7459_v63 = vpack.c.bf16 %v7453_v39, %v7453_v39 }
 0x585   :  { %7963 = vmatprep.mubr.bf16.mxu0 %v7459_v63 }
 0x586   :  { %7964 = vmatmul.mubr.bf16.vlgmr.msra.gmra.mxu0 %v7458_v42 }
 0x5c6   :  { %v9048_v30 = vpop.f32.mrf.mxu0 }
 0x5c8   :  { %v9049_v0 = vpop.f32.mrf.mxu0 }
 0x5c9   :  { %v9050_v5 = vadd.f32 %v9049_v0, %v9048_v30 }
 0x5ca   :  { %v9051_v40 = vpop.f32.mrf.mxu0 }
 0x5cb   :  { %v7886_v20 = vadd.f32 %v9050_v5, %v8983_v15 }
 0x5cc   :  { %v9052_v2 = vpop.f32.mrf.mxu0 }
 0x606   :  { %v9070_v16 = vpop.f32.mrf.mxu1 }
 0x608   :  { %v9071_v43 = vpop.f32.mrf.mxu1 }
 0x609   :  { %v9072_v44 = vadd.f32 %v9071_v43, %v9070_v16 }
 0x60a   :  { %v9073_v45 = vpop.f32.mrf.mxu1 }
 0x60b   :  { %v7926_v12 = vadd.f32 %v9072_v44, %v7886_v20 }
 0x60c   :  { %v9074_v8 = vpop.f32.mrf.mxu1 }
 0x646   :  { %v9092_v17 = vpop.f32.mrf.mxu0 }
 0x648   :  { %v9093_v23 = vpop.f32.mrf.mxu0 }
 0x649   :  { %v9094_v3 = vadd.f32 %v9093_v23, %v9092_v17 }
 0x64a   :  { %v9095_v4 = vpop.f32.mrf.mxu0 }
 0x64b   :  { %v7966_v49 = vadd.f32 %v9094_v3, %v7926_v12 }
 0x64c   :  { %v9096_v24 = vpop.f32.mrf.mxu0 }
 0x64d   :  { %7971 = vst [vmem:[%s11164_s7] sm:$0xff] %v7966_v49 }
 0x64e   :  { %7976 = vsyncpa [#allocation3], 1 }
 0x64f   :  { %7977 = vsyncpa [#allocation5], 1 }
 0x650   :  { %7978 = vsyncpa [#allocation8], 1 }
 0x651   :  { %7979 = vsyncpa [#allocation11], 1 }

</bundles_post_ra>
